<compile_context>
chip_gen: v7x
topology: tpu7x:2x2x1
jax: 0.10.0
libtpu: 0.0.40
codegen_flags: <defaults>
</compile_context>

<pallas_src>
import math

import jax
import jax.numpy as jnp
from jax import lax
from jax.experimental import pallas as pl
from jax.experimental.pallas import tpu as pltpu


# ----------------------------------------------------------------------------
# Helpers
# ----------------------------------------------------------------------------
def _round_up(n, m):
    return ((n + m - 1) // m) * m


def _pad2d(a, rows, cols):
    r, c = a.shape
    return jnp.pad(a, ((0, rows - r), (0, cols - c)))


def _convT_dense_operator(wt, stride, padding, in_shape):
    """Dense linear operator of a ConvTranspose2d (PyTorch semantics, no bias).

    Returns (T, out_shape) with T of shape (Cin*H*W, Cout*OH*OW) such that
    flat_out = flat_in @ T, where both flats use NCHW (channel-major) ordering.
    Built directly from the scatter definition, so stride/padding (including the
    p > K-1 "crop" case) are handled without any lax.pad edge cases.
    """
    Cin, H, W = in_shape
    Cw, Cout, KH, KW = wt.shape
    assert Cw == Cin, (Cw, Cin)
    sh, sw = stride
    ph, pw = padding
    OH = (H - 1) * sh - 2 * ph + KH
    OW = (W - 1) * sw - 2 * pw + KW

    def axis_map(L, K, s, p, OL):
        # A[l, k, o] = 1  iff  o == l*s + k - p   (out-of-range positions drop out)
        l = jnp.arange(L)[:, None, None]
        k = jnp.arange(K)[None, :, None]
        o = jnp.arange(OL)[None, None, :]
        return (l * s + k - p == o).astype(jnp.float32)

    A_h = axis_map(H, KH, sh, ph, OH)          # (H, KH, OH)
    A_w = axis_map(W, KW, sw, pw, OW)          # (W, KW, OW)
    # T[ci,h,w,co,oh,ow] = sum_{kh,kw} wt[ci,co,kh,kw] * A_h[h,kh,oh] * A_w[w,kw,ow]
    T = jnp.einsum("ioab,haq,wbr->ihwoqr", wt.astype(jnp.float32), A_h, A_w)
    return T.reshape(Cin * H * W, Cout * OH * OW), (Cout, OH, OW)


# ----------------------------------------------------------------------------
# Pallas kernel: the whole 3-layer chain fused into one invocation
# ----------------------------------------------------------------------------
def _fused_chain_kernel(x_ref, t1_ref, b1_ref, t2_ref, b2_ref, t3_ref, b3_ref, o_ref):
    # Layer 1: (Mp, 128) @ (128, 256) + (1, 256)
    h = jnp.dot(x_ref[...], t1_ref[...], preferred_element_type=jnp.float32) + b1_ref[...]
    # Layer 2: (Mp, 256) @ (256, 896) + (1, 896)   -- stays on-chip, no HBM round-trip
    h = jnp.dot(h, t2_ref[...], preferred_element_type=jnp.float32) + b2_ref[...]
    # Layer 3: (Mp, 896) @ (896, 1408) + (1, 1408) -- lane-dense full-width store
    o_ref[...] = jnp.dot(h, t3_ref[...], preferred_element_type=jnp.float32) + b3_ref[...]


def _fused_forward(x_pad, t1p, b1p, t2p, b2p, t3p, b3p):
    Mp = x_pad.shape[0]
    F3p = t3p.shape[1]
    vmem = pltpu.MemorySpace.VMEM
    return pl.pallas_call(
        _fused_chain_kernel,
        out_shape=jax.ShapeDtypeStruct((Mp, F3p), jnp.float32),
        in_specs=[pl.BlockSpec(memory_space=vmem)] * 7,
        out_specs=pl.BlockSpec(memory_space=vmem),
    )(x_pad, t1p, b1p, t2p, b2p, t3p, b3p)


# ----------------------------------------------------------------------------
# Independent XLA reference (test harness only)
# ----------------------------------------------------------------------------
def _convT_reference(x, w, b, stride, padding):
    """ConvTranspose2d with PyTorch semantics via lax.conv_general_dilated."""
    _, Cout, KH, KW = w.shape
    sh, sw = stride
    ph, pw = padding
    rhs = jnp.transpose(jnp.flip(w, (2, 3)), (1, 0, 2, 3))        # (Cout, Cin, KH, KW)
    y = lax.conv_general_dilated(
        x.astype(jnp.float32), rhs.astype(jnp.float32),
        window_strides=(1, 1),
        padding=((KH - 1, KH - 1), (KW - 1, KW - 1)),
        lhs_dilation=(sh, sw), rhs_dilation=(1, 1),
        dimension_numbers=("NCHW", "OIHW", "NCHW"),
        precision=lax.Precision.HIGHEST)
    OH = (x.shape[2] - 1) * sh - 2 * ph + KH
    OW = (x.shape[3] - 1) * sw - 2 * pw + KW
    y = y[:, :, ph:ph + OH, pw:pw + OW]
    return y + b[None, :, None, None]


# ----------------------------------------------------------------------------
# Module equivalent
# ----------------------------------------------------------------------------
class MyModulePallas:
    IN_SHAPE = (3, 5, 7)   # (Cin, H, W) implied by the spec input torch.randn(1, 3, 5, 7)

    def __init__(self, key):
        k1, k2, k3, k4, k5, k6 = jax.random.split(key, 6)

        def init_convT(kw_key, kb_key, cin, cout, kh, kw):
            # PyTorch default init: U(-1/sqrt(fan_in), +1/sqrt(fan_in)),
            # fan_in for ConvTranspose2d weight (cin, cout, kh, kw) = cout*kh*kw.
            bound = 1.0 / math.sqrt(cout * kh * kw)
            w = jax.random.uniform(kw_key, (cin, cout, kh, kw), jnp.float32, -bound, bound)
            b = jax.random.uniform(kb_key, (cout,), jnp.float32, -bound, bound)
            return w, b

        self.w1, self.b1 = init_convT(k1, k2, 3, 3, 2, 5)   # ConvTranspose2d(3,3,(2,5),s=(1,3),p=(1,1))
        self.w2, self.b2 = init_convT(k3, k4, 3, 4, 4, 2)   # ConvTranspose2d(3,4,(4,2),s=(4,1),p=(2,2))
        # TODO(synk): the original module declares ConvTranspose2d(5, 6, 1) but feeds it a
        # 4-channel tensor, so PyTorch's forward would raise; we use in_channels=4 so the
        # chain is runnable, keeping every other hyper-parameter identical.
        self.w3, self.b3 = init_convT(k5, k6, 4, 6, 1, 1)

        self.layer_cfg = [
            (self.w1, self.b1, (1, 3), (1, 1)),
            (self.w2, self.b2, (4, 1), (2, 2)),
            (self.w3, self.b3, (1, 1), (0, 0)),
        ]

        # ---- Precompute dense per-layer operators + flat biases (init-time only) ----
        shape = self.IN_SHAPE
        ops = []
        for (w, b, s, p) in self.layer_cfg:
            T, shape = _convT_dense_operator(w, s, p, shape)
            bias_flat = jnp.repeat(b, shape[1] * shape[2]).reshape(1, -1)   # (1, Cout*OH*OW)
            ops.append((T, bias_flat))
        self.out_chw = shape                                                # (6, 12, 18)

        # ---- Zero-pad every operand to (8,128)-aligned shapes ----------------------
        dims = [self.IN_SHAPE[0] * self.IN_SHAPE[1] * self.IN_SHAPE[2]]     # 105
        dims += [t.shape[1] for (t, _) in ops]                              # 252, 864, 1296
        pdims = [_round_up(d, 128) for d in dims]                           # 128, 256, 896, 1408
        self.feat_in, self.feat_out = dims[0], dims[-1]
        self.feat_in_p = pdims[0]
        padded = []
        for li, (t, bflat) in enumerate(ops):
            padded.append((_pad2d(t, pdims[li], pdims[li + 1]),
                           _pad2d(bflat, 1, pdims[li + 1])))
        (self.t1p, self.b1p), (self.t2p, self.b2p), (self.t3p, self.b3p) = padded

    def __call__(self, x):
        if x.shape[1:] != self.IN_SHAPE:
            raise ValueError(f"expected input (N, {self.IN_SHAPE}), got {x.shape}")
        N = x.shape[0]
        # Fold the batch into the row dimension: one kernel call for any N.
        x_flat = x.reshape(N, self.feat_in).astype(jnp.float32)
        Mp = _round_up(max(N, 8), 8)
        x_pad = jnp.pad(x_flat, ((0, Mp - N), (0, self.feat_in_p - self.feat_in)))
        out_pad = _fused_forward(x_pad, self.t1p, self.b1p,
                                 self.t2p, self.b2p, self.t3p, self.b3p)
        C, OH, OW = self.out_chw
        # Slice away alignment padding; the flat order is (C, OH, OW), so this reshape
        # is directly NCHW -- no transpose anywhere in the forward path.
        return out_pad[:N, :self.feat_out].reshape(N, C, OH, OW)


if __name__ == "__main__":
    key = jax.random.PRNGKey(0)
    k_param, k_x = jax.random.split(key)
    model = MyModulePallas(k_param)

    x = jax.random.normal(k_x, (1, 3, 5, 7), dtype=jnp.float32)   # matches torch.randn(1, 3, 5, 7)

    fwd = jax.jit(model.__call__)
    y = fwd(x)
    jax.block_until_ready(y)

    assert y.shape == (1, 6, 12, 18), y.shape
    assert bool(jnp.all(jnp.isfinite(y)))

    # Sanity check the fused kernel against an independent layer-by-layer XLA reference.
    y_ref = x
    for (w, b, s, p) in model.layer_cfg:
        y_ref = _convT_reference(y_ref, w, b, s, p)
    max_err = float(jnp.max(jnp.abs(y - y_ref)))
    assert max_err < 3e-2, f"mismatch vs reference: max|diff|={max_err}"

    print("KERNEL_OK")
</pallas_src>

<mosaic_0001>
module attributes {stable_mosaic.version = 11 : i64} {
  func.func @_fused_chain_kernel(%arg0: memref<8x128xf32, #tpu.memory_space<vmem>>, %arg1: memref<128x256xf32, #tpu.memory_space<vmem>>, %arg2: memref<1x256xf32, #tpu.memory_space<vmem>>, %arg3: memref<256x896xf32, #tpu.memory_space<vmem>>, %arg4: memref<1x896xf32, #tpu.memory_space<vmem>>, %arg5: memref<896x1408xf32, #tpu.memory_space<vmem>>, %arg6: memref<1x1408xf32, #tpu.memory_space<vmem>>, %arg7: memref<8x1408xf32, #tpu.memory_space<vmem>>) attributes {dimension_semantics = [], scalar_prefetch = 0 : i64, scratch_operands = 0 : i64, tpu.core_type = #tpu.core_type<tc>} {
    %c0 = arith.constant 0 : index
    %c0_0 = arith.constant 0 : index
    %0 = vector.load %arg0[%c0, %c0_0] : memref<8x128xf32, #tpu.memory_space<vmem>>, vector<8x128xf32>
    %c0_1 = arith.constant 0 : index
    %c0_2 = arith.constant 0 : index
    %1 = vector.load %arg1[%c0_1, %c0_2] : memref<128x256xf32, #tpu.memory_space<vmem>>, vector<128x256xf32>
    %cst = arith.constant dense<0.000000e+00> : vector<8x256xf32>
    %2 = tpu.matmul %0, %1, %cst {dimension_numbers = #tpu.dot_dimension_numbers<[1], [0], [0], [1], [0, 0, 1, 1], [], []>} : vector<8x128xf32>, vector<128x256xf32>, vector<8x256xf32> -> vector<8x256xf32>
    %c0_3 = arith.constant 0 : index
    %c0_4 = arith.constant 0 : index
    %3 = vector.load %arg2[%c0_3, %c0_4] : memref<1x256xf32, #tpu.memory_space<vmem>>, vector<1x256xf32>
    %4 = vector.broadcast %3 : vector<1x256xf32> to vector<8x256xf32>
    %5 = arith.addf %2, %4 : vector<8x256xf32>
    %c0_5 = arith.constant 0 : index
    %c0_6 = arith.constant 0 : index
    %6 = vector.load %arg3[%c0_5, %c0_6] : memref<256x896xf32, #tpu.memory_space<vmem>>, vector<256x896xf32>
    %cst_7 = arith.constant dense<0.000000e+00> : vector<8x896xf32>
    %7 = tpu.matmul %5, %6, %cst_7 {dimension_numbers = #tpu.dot_dimension_numbers<[1], [0], [0], [1], [0, 0, 1, 1], [], []>} : vector<8x256xf32>, vector<256x896xf32>, vector<8x896xf32> -> vector<8x896xf32>
    %c0_8 = arith.constant 0 : index
    %c0_9 = arith.constant 0 : index
    %8 = vector.load %arg4[%c0_8, %c0_9] : memref<1x896xf32, #tpu.memory_space<vmem>>, vector<1x896xf32>
    %9 = vector.broadcast %8 : vector<1x896xf32> to vector<8x896xf32>
    %10 = arith.addf %7, %9 : vector<8x896xf32>
    %c0_10 = arith.constant 0 : index
    %c0_11 = arith.constant 0 : index
    %11 = vector.load %arg5[%c0_10, %c0_11] : memref<896x1408xf32, #tpu.memory_space<vmem>>, vector<896x1408xf32>
    %cst_12 = arith.constant dense<0.000000e+00> : vector<8x1408xf32>
    %12 = tpu.matmul %10, %11, %cst_12 {dimension_numbers = #tpu.dot_dimension_numbers<[1], [0], [0], [1], [0, 0, 1, 1], [], []>} : vector<8x896xf32>, vector<896x1408xf32>, vector<8x1408xf32> -> vector<8x1408xf32>
    %c0_13 = arith.constant 0 : index
    %c0_14 = arith.constant 0 : index
    %13 = vector.load %arg6[%c0_13, %c0_14] : memref<1x1408xf32, #tpu.memory_space<vmem>>, vector<1x1408xf32>
    %14 = vector.broadcast %13 : vector<1x1408xf32> to vector<8x1408xf32>
    %15 = arith.addf %12, %14 : vector<8x1408xf32>
    %c0_15 = arith.constant 0 : index
    %c0_16 = arith.constant 0 : index
    %16 = vector.load %arg7[%c0_15, %c0_16] : memref<8x1408xf32, #tpu.memory_space<vmem>>, vector<8x1408xf32>
    tpu.vector_store %arg7[%c0_15, %c0_16], %15 {strides = array<i32>} : memref<8x1408xf32, #tpu.memory_space<vmem>>, vector<8x1408xf32>,
    return
  }
}

</mosaic_0001>

<bundles_post_ra>
// kernel: a_call__.1
= control target key start
LH: loop header
LB: loop body
LE: loop exit
PB: predicated region body
PF: predicated region fallthrough
CT: control target
= control target key end

     0   :  { %12 = vsyncpa [#allocation3], 0  ;;  %s5960_s0 = inlined_call_operand.vmem [shape: f32[8,128], index: 0, kind: input, shape index: {}]   ;;  %s5961_s1 = inlined_call_operand.hbm [shape: f32[128,256], index: 1, kind: input, shape index: {}]   ;;  %s5962_s2 = inlined_call_operand.hbm [shape: f32[1,256], index: 2, kind: input, shape index: {}]   ;;  %s5963_s3 = inlined_call_operand.hbm [shape: f32[256,896], index: 3, kind: input, shape index: {}]   ;;  %s5964_s4 = inlined_call_operand.hbm [shape: f32[1,896], index: 4, kind: input, shape index: {}]   ;;  %s5965_s5 = inlined_call_operand.hbm [shape: f32[896,1408], index: 5, kind: input, shape index: {}]   ;;  %s5966_s6 = inlined_call_operand.hbm [shape: f32[1,1408], index: 6, kind: input, shape index: {}]   ;;  %s5967_s7 = inlined_call_operand.vmem [shape: f32[8,1408], index: 7, kind: output, shape index: {}]  }
   0x1   :  { %13 = vsyncpa [#allocation5], 0 }
   0x2   :  { %14 = vsyncpa [#allocation8], 0 }
   0x3   :  { %15 = vsyncpa [#allocation11], 0  ;;  %s5657_s24 = smov [#allocation4]   ;;  %s5658_s26 = smov [#allocation7]  }
   0x4   :  { %s36_s25 = sshll.u32 %s5657_s24, 4  ;;  %s58_s27 = sshll.u32 %s5658_s26, 4  ;;  %s37_s25 = int_to_ptr.vmem [resolvable:$true] %s36_s25  ;;  %s59_s27 = int_to_ptr.vmem [resolvable:$true] %s58_s27 }
   0x5   :  { %s5517_s30 = scalar_lea.hbm %s5962_s2, 32 }
   0x6   :  { %p5518_p0 = scmp.ne.s32.totalorder %s5962_s2, %s5517_s30  ;;  %p5521_p1 = scmp.lt.u32.totalorder %s5517_s30, %s5962_s2 }
   0x8   :  { %p5523_p2 = pnand %p5521_p1, %p5518_p0 }
   0xa   :  { %5526 = shalt.err (!%p5523_p2)
}
   0xb   :  { %s5527_s12 = scalar_lea.vmem %s37_s25, 32  ;;  %p5532_p4 = scmp.lt.s32.totalorder %s37_s25, %s37_s25 }
   0xc   :  { %p5528_p3 = scmp.ne.s32.totalorder %s37_s25, %s5527_s12  ;;  %p5533_p5 = scmp.lt.s32.totalorder %s5527_s12, %s5527_s12 }
   0xe   :  { %p5534_p6 = por %p5533_p5, %p5532_p4 }
  0x10   :  { %p5535_p7 = pnand %p5534_p6, %p5528_p3 }
  0x12   :  { %5538 = shalt.err (!%p5535_p7)
}
  0x13   :  { %39 = dma.hbm_to_vmem [thread:$0]  %s5962_s2, 32, %s37_s25, [#allocation5]  }
  0x14   :  { %s5539_s17 = scalar_lea.hbm %s5964_s4, 112 }
  0x15   :  { %p5540_p8 = scmp.ne.s32.totalorder %s5964_s4, %s5539_s17  ;;  %p5543_p9 = scmp.lt.u32.totalorder %s5539_s17, %s5964_s4 }
  0x17   :  { %p5545_p10 = pnand %p5543_p9, %p5540_p8 }
  0x19   :  { %5548 = shalt.err (!%p5545_p10)
}
  0x1a   :  { %s5549_s22 = scalar_lea.vmem %s59_s27, 112  ;;  %s5553_s23 = scalar_lea.vmem %s59_s27, 128 }
  0x1b   :  { %p5550_p11 = scmp.ne.s32.totalorder %s59_s27, %s5549_s22  ;;  %p5554_p12 = scmp.lt.s32.totalorder %s59_s27, %s59_s27 }
  0x1c   :  { %p5555_p13 = scmp.lt.s32.totalorder %s5553_s23, %s5549_s22 }
  0x1e   :  { %p5556_p0 = por %p5555_p13, %p5554_p12 }
  0x20   :  { %p5557_p1 = pnand %p5556_p0, %p5550_p11 }
  0x22   :  { %5560 = shalt.err (!%p5557_p1)
}
  0x23   :  { %61 = dma.hbm_to_vmem [thread:$0]  %s5964_s4, 112, %s59_s27, [#allocation8]  }
  0x24   :  { %s5659_s25 = smov [#allocation2]   ;;  %s5561_s30 = scalar_lea.hbm %s5961_s1, 4096 }
  0x25   :  { %s23_s26 = sshll.u32 %s5659_s25, 4  ;;  %p5562_p2 = scmp.ne.s32.totalorder %s5961_s1, %s5561_s30  ;;  %s24_s26 = int_to_ptr.vmem [resolvable:$true] %s23_s26 }
  0x26   :  { %p5565_p3 = scmp.lt.u32.totalorder %s5561_s30, %s5961_s1 }
  0x28   :  { %p5567_p4 = pnand %p5565_p3, %p5562_p2 }
  0x2a   :  { %5570 = shalt.err (!%p5567_p4)
}
  0x2b   :  { %s5571_s12 = scalar_lea.vmem %s24_s26, 4096  ;;  %p5576_p6 = scmp.lt.s32.totalorder %s24_s26, %s24_s26 }
  0x2c   :  { %p5572_p5 = scmp.ne.s32.totalorder %s24_s26, %s5571_s12  ;;  %p5577_p7 = scmp.lt.s32.totalorder %s5571_s12, %s5571_s12 }
  0x2e   :  { %p5578_p8 = por %p5577_p7, %p5576_p6 }
  0x30   :  { %p5579_p9 = pnand %p5578_p8, %p5572_p5 }
  0x32   :  { %5582 = shalt.err (!%p5579_p9)
}
  0x33   :  { %s5660_s4 = smov 256   ;;  %s5661_s27 = smov 16  }
  0x34   :  { %29 = dma.hbm_to_vmem [thread:$0]  %s5961_s1, 4096, %s24_s26, [#allocation3], %s5660_s4, %s5660_s4, %s5661_s27  }
  0x35   :  { %s5662_s15 = smov [#allocation6]   ;;  %s5583_s19 = scalar_lea.hbm %s5963_s3, 28672 }
  0x36   :  { %s45_s16 = sshll.u32 %s5662_s15, 4  ;;  %p5584_p10 = scmp.ne.s32.totalorder %s5963_s3, %s5583_s19  ;;  %s46_s16 = int_to_ptr.vmem [resolvable:$true] %s45_s16 }
  0x37   :  { %p5587_p11 = scmp.lt.u32.totalorder %s5583_s19, %s5963_s3 }
  0x39   :  { %p5589_p12 = pnand %p5587_p11, %p5584_p10 }
  0x3b   :  { %5592 = shalt.err (!%p5589_p12)
}
  0x3c   :  { %s5593_s2 = scalar_lea.vmem %s46_s16, 28672  ;;  %p5598_p0 = scmp.lt.s32.totalorder %s46_s16, %s46_s16 }
  0x3d   :  { %p5594_p13 = scmp.ne.s32.totalorder %s46_s16, %s5593_s2  ;;  %p5599_p1 = scmp.lt.s32.totalorder %s5593_s2, %s5593_s2 }
  0x3f   :  { %p5600_p2 = por %p5599_p1, %p5598_p0 }
  0x41   :  { %p5601_p3 = pnand %p5600_p2, %p5594_p13 }
  0x43   :  { %5604 = shalt.err (!%p5601_p3)
}
  0x44   :  { %s5663_s1 = smov 896   ;;  %s5664_s24 = smov 56  }
  0x45   :  { %51 = dma.hbm_to_vmem [thread:$0]  %s5963_s3, 28672, %s46_s16, [#allocation5], %s5663_s1, %s5663_s1, %s5664_s24  }
  0x46   :  { %s5665_s28 = smov [#allocation9]   ;;  %s5605_s9 = scalar_lea.hbm %s5965_s5, 157696 }
  0x47   :  { %s67_s29 = sshll.u32 %s5665_s28, 4  ;;  %p5606_p4 = scmp.ne.s32.totalorder %s5965_s5, %s5605_s9  ;;  %s68_s29 = int_to_ptr.vmem [resolvable:$true] %s67_s29 }
  0x48   :  { %p5609_p5 = scmp.lt.u32.totalorder %s5605_s9, %s5965_s5 }
  0x4a   :  { %p5611_p6 = pnand %p5609_p5, %p5606_p4 }
  0x4c   :  { %5614 = shalt.err (!%p5611_p6)
}
  0x4d   :  { %s5615_s27 = scalar_lea.vmem %s68_s29, 157696  ;;  %p5620_p8 = scmp.lt.s32.totalorder %s68_s29, %s68_s29 }
  0x4e   :  { %p5616_p7 = scmp.ne.s32.totalorder %s68_s29, %s5615_s27  ;;  %p5621_p9 = scmp.lt.s32.totalorder %s5615_s27, %s5615_s27 }
  0x50   :  { %p5622_p10 = por %p5621_p9, %p5620_p8 }
  0x52   :  { %p5623_p11 = pnand %p5622_p10, %p5616_p7 }
  0x54   :  { %5626 = shalt.err (!%p5623_p11)
}
  0x55   :  { %s5666_s3 = smov 1408   ;;  %s5667_s13 = smov 88  }
  0x56   :  { %73 = dma.hbm_to_vmem [thread:$0]  %s5965_s5, 157696, %s68_s29, [#allocation8], %s5666_s3, %s5666_s3, %s5667_s13  }
  0x57   :  { %s5668_s16 = smov [#allocation10]   ;;  %s5627_s20 = scalar_lea.hbm %s5966_s6, 176 }
  0x58   :  { %s80_s17 = sshll.u32 %s5668_s16, 4  ;;  %p5628_p12 = scmp.ne.s32.totalorder %s5966_s6, %s5627_s20  ;;  %s81_s17 = int_to_ptr.vmem [resolvable:$true] %s80_s17 }
  0x59   :  { %p5631_p13 = scmp.lt.u32.totalorder %s5627_s20, %s5966_s6 }
  0x5b   :  { %p5633_p0 = pnand %p5631_p13, %p5628_p12 }
  0x5d   :  { %5636 = shalt.err (!%p5633_p0)
}
  0x5e   :  { %s5637_s1 = scalar_lea.vmem %s81_s17, 176  ;;  %s5641_s5 = scalar_lea.vmem %s81_s17, 192 }
  0x5f   :  { %p5638_p1 = scmp.ne.s32.totalorder %s81_s17, %s5637_s1  ;;  %p5642_p2 = scmp.lt.s32.totalorder %s81_s17, %s81_s17 }
  0x60   :  { %p5643_p3 = scmp.lt.s32.totalorder %s5641_s5, %s5637_s1 }
  0x62   :  { %p5644_p4 = por %p5643_p3, %p5642_p2 }
  0x64   :  { %p5645_p5 = pnand %p5644_p4, %p5638_p1 }
  0x66   :  { %5648 = shalt.err (!%p5645_p5)
}
  0x67   :  { %83 = dma.hbm_to_vmem [thread:$0]  %s5966_s6, 176, %s81_s17, [#allocation11]  }
  0x68   :  { %5649 = dma.done.wait [#allocation3], 4096  }
  0x69   :  { %5650 = vsyncadd [#allocation3], 4294963200 }
  0x6a   :  { %5651 = dma.done.wait [#allocation5], 28704  }
  0x6b   :  { %5652 = vsyncadd [#allocation5], 4294938592 }
  0x6c   :  { %5653 = dma.done.wait [#allocation8], 157808  }
  0x6d   :  { %5654 = vsyncadd [#allocation8], 4294809488 }
  0x6e   :  { %5655 = dma.done.wait [#allocation11], 176  }
  0x6f   :  { %5656 = vsyncadd [#allocation11], 4294967120  ;;  %v5669_v0 = vmov 0.0   ;;  %v104_v1 = vld [vmem:[#allocation2 + $0x8] sm:$0xff]  ;;  %v106_v2 = vld [vmem:[#allocation2 + $0x18] sm:$0xff]  ;;  %vm5671_vm0 = vmmov 0  }
  0x70   :  { %211 = vmatprep.mubr.f32.mxu1 %v5669_v0  ;;  %v103_v3 = vld [vmem:[#allocation2] sm:$0xff]  ;;  %v3964_v4 = vpack.c.bf16 %v106_v2, %v104_v1  ;;  %v105_v5 = vld [vmem:[#allocation2 + $0x10] sm:$0xff]  ;;  %v108_v6 = vld [vmem:[#allocation2 + $0x28] sm:$0xff] }
  0x71   :  { %v110_v7 = vld [vmem:[#allocation2 + $0x38] sm:$0xff]  ;;  %v3966_v8 = vpack.c.bf16 %v105_v5, %v103_v3  ;;  %v107_v10 = vld [vmem:[#allocation2 + $0x20] sm:$0xff]  ;;  %v109_v11 = vld [vmem:[#allocation2 + $0x30] sm:$0xff] }
  0x72   :  { %v3968_v9 = vpack.c.bf16 %v110_v7, %v108_v6  ;;  %v112_v12 = vld [vmem:[#allocation2 + $0x48] sm:$0xff]  ;;  %3965 = vmatprep.subr.bf16.mxu1 %v3964_v4  ;;  %v114_v13 = vld [vmem:[#allocation2 + $0x58] sm:$0xff]  ;;  %v3970_v14 = vpack.c.bf16 %v109_v11, %v107_v10  ;;  %v111_v16 = vld [vmem:[#allocation2 + $0x40] sm:$0xff] }
  0x73   :  { %3967 = vmatpush1.bf16.msra.mxu1 %v3966_v8  ;;  %v3972_v15 = vpack.c.bf16 %v114_v13, %v112_v12  ;;  %v113_v17 = vld [vmem:[#allocation2 + $0x50] sm:$0xff]  ;;  %v116_v18 = vld [vmem:[#allocation2 + $0x68] sm:$0xff]  ;;  %v118_v19 = vld [vmem:[#allocation2 + $0x78] sm:$0xff] }
  0x74   :  { %3969 = vmatprep.subr.bf16.mxu1 %v3968_v9  ;;  %v3974_v20 = vpack.c.bf16 %v113_v17, %v111_v16  ;;  %v3976_v21 = vpack.c.bf16 %v118_v19, %v116_v18  ;;  %v115_v22 = vld [vmem:[#allocation2 + $0x60] sm:$0xff]  ;;  %v117_v23 = vld [vmem:[#allocation2 + $0x70] sm:$0xff]  ;;  %v120_v24 = vld [vmem:[#allocation2 + $0x88] sm:$0xff] }
  0x75   :  { %v122_v25 = vld [vmem:[#allocation2 + $0x98] sm:$0xff]  ;;  %v3978_v27 = vpack.c.bf16 %v117_v23, %v115_v22  ;;  %v119_v28 = vld [vmem:[#allocation2 + $0x80] sm:$0xff]  ;;  %v121_v29 = vld [vmem:[#allocation2 + $0x90] sm:$0xff] }
  0x76   :  { %v221_v26 = vld [vmem:[#allocation6 + $0x18] sm:$0xff]  ;;  %v228_v30 = vld [vmem:[#allocation6 + $0x50] sm:$0xff]  ;;  %v3980_v31 = vpack.c.bf16 %v122_v25, %v120_v24  ;;  %v124_v32 = vld [vmem:[#allocation2 + $0xa8] sm:$0xff]  ;;  %v3982_v42 = vpack.c.bf16 %v121_v29, %v119_v28 }
  0x77   :  { %3971 = vmatpush1.bf16.msra.mxu1 %v3970_v14  ;;  %v4060_v33 = vpack.c.bf16 %v228_v30, %v221_v26  ;;  %v220_v34 = vld [vmem:[#allocation6 + $0x10] sm:$0xff]  ;;  %v227_v35 = vld [vmem:[#allocation6 + $0x48] sm:$0xff]  ;;  %v242_v39 = vld [vmem:[#allocation6 + $0xc0] sm:$0xff] }
  0x78   :  { %3973 = vmatprep.subr.bf16.mxu1 %v3972_v15  ;;  %v126_v36 = vld [vmem:[#allocation2 + $0xb8] sm:$0xff]  ;;  %v4062_v37 = vpack.c.bf16 %v227_v35, %v220_v34  ;;  %v235_v38 = vld [vmem:[#allocation6 + $0x88] sm:$0xff]  ;;  %v234_v41 = vld [vmem:[#allocation6 + $0x80] sm:$0xff] }
  0x79   :  { %4061 = vmatprep.subr.bf16.mxu0 %v4060_v33  ;;  %v4064_v40 = vpack.c.bf16 %v242_v39, %v235_v38  ;;  %v123_v43 = vld [vmem:[#allocation2 + $0xa0] sm:$0xff]  ;;  %v125_v44 = vld [vmem:[#allocation2 + $0xb0] sm:$0xff]  ;;  %v3984_v46 = vpack.c.bf16 %v126_v36, %v124_v32  ;;  %v128_v47 = vld [vmem:[#allocation2 + $0xc8] sm:$0xff] }
  0x7a   :  { %4063 = vmatpush1.bf16.msra.mxu0 %v4062_v37  ;;  %v241_v45 = vld [vmem:[#allocation6 + $0xb8] sm:$0xff]  ;;  %v256_v50 = vld [vmem:[#allocation6 + $0x130] sm:$0xff]  ;;  %v255_v54 = vld [vmem:[#allocation6 + $0x128] sm:$0xff]  ;;  %v3986_v56 = vpack.c.bf16 %v125_v44, %v123_v43 }
  0x7b   :  { %3975 = vmatpush1.bf16.msra.mxu1 %v3974_v20  ;;  %4065 = vmatprep.subr.bf16.mxu0 %v4064_v40  ;;  %v4066_v48 = vpack.c.bf16 %v241_v45, %v234_v41  ;;  %v249_v49 = vld [vmem:[#allocation6 + $0xf8] sm:$0xff]  ;;  %v248_v53 = vld [vmem:[#allocation6 + $0xf0] sm:$0xff]  ;;  %v263_v55 = vld [vmem:[#allocation6 + $0x168] sm:$0xff] }
  0x7c   :  { %3977 = vmatprep.subr.bf16.mxu1 %v3976_v21  ;;  %v130_v51 = vld [vmem:[#allocation2 + $0xd8] sm:$0xff]  ;;  %v4068_v52 = vpack.c.bf16 %v256_v50, %v249_v49  ;;  %v127_v57 = vld [vmem:[#allocation2 + $0xc0] sm:$0xff]  ;;  %v129_v58 = vld [vmem:[#allocation2 + $0xd0] sm:$0xff]  ;;  %v4070_v59 = vpack.c.bf16 %v255_v54, %v248_v53 }
  0x7d   :  { %v270_v60 = vld [vmem:[#allocation6 + $0x1a0] sm:$0xff]  ;;  %v3988_v61 = vpack.c.bf16 %v130_v51, %v128_v47  ;;  %v269_v2 = vld [vmem:[#allocation6 + $0x198] sm:$0xff]  ;;  %v284_v5 = vld [vmem:[#allocation6 + $0x210] sm:$0xff]  ;;  %v3990_v6 = vpack.c.bf16 %v129_v58, %v127_v57 }
  0x7e   :  { %4067 = vmatpush1.bf16.msra.mxu0 %v4066_v48  ;;  %v132_v62 = vld [vmem:[#allocation2 + $0xe8] sm:$0xff]  ;;  %v4072_v63 = vpack.c.bf16 %v270_v60, %v263_v55  ;;  %v134_v3 = vld [vmem:[#allocation2 + $0xf8] sm:$0xff]  ;;  %v131_v7 = vld [vmem:[#allocation2 + $0xe0] sm:$0xff] }
  0x7f   :  { %3979 = vmatpush1.bf16.msra.mxu1 %v3978_v27  ;;  %4069 = vmatprep.subr.bf16.mxu0 %v4068_v52  ;;  %v262_v1 = vld [vmem:[#allocation6 + $0x160] sm:$0xff]  ;;  %v277_v4 = vld [vmem:[#allocation6 + $0x1d8] sm:$0xff]  ;;  %v133_v8 = vld [vmem:[#allocation2 + $0xf0] sm:$0xff]  ;;  %v3992_v10 = vpack.c.bf16 %v134_v3, %v132_v62 }
  0x80   :  { %3981 = vmatprep.subr.bf16.mxu1 %v3980_v31  ;;  %v4074_v9 = vpack.c.bf16 %v269_v2, %v262_v1  ;;  %v219_v11 = vld [vmem:[#allocation6 + $0x8] sm:$0xff]  ;;  %v4076_v12 = vpack.c.bf16 %v284_v5, %v277_v4  ;;  %v276_v13 = vld [vmem:[#allocation6 + $0x1d0] sm:$0xff]  ;;  %v226_v15 = vld [vmem:[#allocation6 + $0x40] sm:$0xff]  ;;  %v3994_v18 = vpack.c.bf16 %v133_v8, %v131_v7 }
  0x81   :  { %v283_v14 = vld [vmem:[#allocation6 + $0x208] sm:$0xff]  ;;  %v298_v17 = vld [vmem:[#allocation6 + $0x280] sm:$0xff]  ;;  %v225_v20 = vld [vmem:[#allocation6 + $0x38] sm:$0xff]  ;;  %v3996_v22 = vpack.c.bf16 %v226_v15, %v219_v11 }
  0x82   :  { %4071 = vmatpush1.bf16.msra.mxu0 %v4070_v59  ;;  %v291_v16 = vld [vmem:[#allocation6 + $0x248] sm:$0xff]  ;;  %v218_v19 = vld [vmem:[#allocation6] sm:$0xff]  ;;  %v4078_v21 = vpack.c.bf16 %v283_v14, %v276_v13  ;;  %v233_v23 = vld [vmem:[#allocation6 + $0x78] sm:$0xff] }
  0x83   :  { %3983 = vmatpush1.bf16.msra.mxu1 %v3982_v42  ;;  %4073 = vmatprep.subr.bf16.mxu0 %v4072_v63  ;;  %v4080_v24 = vpack.c.bf16 %v298_v17, %v291_v16  ;;  %v290_v25 = vld [vmem:[#allocation6 + $0x240] sm:$0xff]  ;;  %v297_v26 = vld [vmem:[#allocation6 + $0x278] sm:$0xff]  ;;  %v240_v27 = vld [vmem:[#allocation6 + $0xb0] sm:$0xff]  ;;  %v3998_v31 = vpack.c.bf16 %v225_v20, %v218_v19 }
  0x84   :  { %3985 = vmatprep.subr.bf16.mxu1 %v3984_v46  ;;  %v305_v28 = vld [vmem:[#allocation6 + $0x2b8] sm:$0xff]  ;;  %v312_v29 = vld [vmem:[#allocation6 + $0x2f0] sm:$0xff]  ;;  %v239_v33 = vld [vmem:[#allocation6 + $0xa8] sm:$0xff]  ;;  %v4082_v34 = vpack.c.bf16 %v297_v26, %v290_v25  ;;  %v4000_v35 = vpack.c.bf16 %v240_v27, %v233_v23 }
  0x85   :  { %v102_v30 = vld [vmem:[%s5960_s0] sm:$0xff]  ;;  %v232_v32 = vld [vmem:[#allocation6 + $0x70] sm:$0xff]  ;;  %v247_v36 = vld [vmem:[#allocation6 + $0xe8] sm:$0xff]  ;;  %v4084_v37 = vpack.c.bf16 %v312_v29, %v305_v28 }
  0x86   :  { %4075 = vmatpush1.bf16.msra.mxu0 %v4074_v9  ;;  %v304_v38 = vld [vmem:[#allocation6 + $0x2b0] sm:$0xff]  ;;  %v311_v39 = vld [vmem:[#allocation6 + $0x2e8] sm:$0xff]  ;;  %v254_v40 = vld [vmem:[#allocation6 + $0x120] sm:$0xff]  ;;  %v4002_v43 = vpack.c.bf16 %v239_v33, %v232_v32 }
  0x87   :  { %3987 = vmatpush1.bf16.msra.mxu1 %v3986_v56  ;;  %4077 = vmatprep.subr.bf16.mxu0 %v4076_v12  ;;  %v319_v41 = vld [vmem:[#allocation6 + $0x328] sm:$0xff]  ;;  %v326_v42 = vld [vmem:[#allocation6 + $0x360] sm:$0xff]  ;;  %v253_v45 = vld [vmem:[#allocation6 + $0x118] sm:$0xff]  ;;  %v4086_v46 = vpack.c.bf16 %v311_v39, %v304_v38  ;;  %v4004_v47 = vpack.c.bf16 %v254_v40, %v247_v36 }
  0x88   :  { %3989 = vmatprep.subr.bf16.mxu1 %v3988_v61  ;;  %v246_v44 = vld [vmem:[#allocation6 + $0xe0] sm:$0xff]  ;;  %v261_v48 = vld [vmem:[#allocation6 + $0x158] sm:$0xff]  ;;  %v4088_v49 = vpack.c.bf16 %v326_v42, %v319_v41  ;;  %v268_v52 = vld [vmem:[#allocation6 + $0x190] sm:$0xff] }
  0x89   :  { %v318_v50 = vld [vmem:[#allocation6 + $0x320] sm:$0xff]  ;;  %v325_v51 = vld [vmem:[#allocation6 + $0x358] sm:$0xff]  ;;  %v340_v54 = vld [vmem:[#allocation6 + $0x3d0] sm:$0xff]  ;;  %v4006_v55 = vpack.c.bf16 %v253_v45, %v246_v44  ;;  %v4008_v59 = vpack.c.bf16 %v268_v52, %v261_v48 }
  0x8a   :  { %4079 = vmatpush1.bf16.msra.mxu0 %v4078_v21  ;;  %v333_v53 = vld [vmem:[#allocation6 + $0x398] sm:$0xff]  ;;  %v260_v56 = vld [vmem:[#allocation6 + $0x150] sm:$0xff]  ;;  %v267_v57 = vld [vmem:[#allocation6 + $0x188] sm:$0xff]  ;;  %v4090_v58 = vpack.c.bf16 %v325_v51, %v318_v50 }
  0x8b   :  { %3991 = vmatpush1.bf16.msra.mxu1 %v3990_v6  ;;  %4081 = vmatprep.subr.bf16.mxu0 %v4080_v24  ;;  %v275_v60 = vld [vmem:[#allocation6 + $0x1c8] sm:$0xff]  ;;  %v4092_v61 = vpack.c.bf16 %v340_v54, %v333_v53  ;;  %v332_v62 = vld [vmem:[#allocation6 + $0x390] sm:$0xff]  ;;  %v282_v1 = vld [vmem:[#allocation6 + $0x200] sm:$0xff]  ;;  %v4010_v4 = vpack.c.bf16 %v267_v57, %v260_v56 }
  0x8c   :  { %3993 = vmatprep.subr.bf16.mxu1 %v3992_v10  ;;  %v339_v63 = vld [vmem:[#allocation6 + $0x3c8] sm:$0xff]  ;;  %v354_v3 = vld [vmem:[#allocation6 + $0x440] sm:$0xff]  ;;  %v281_v6 = vld [vmem:[#allocation6 + $0x1f8] sm:$0xff]  ;;  %v4012_v8 = vpack.c.bf16 %v282_v1, %v275_v60 }
  0x8d   :  { %v347_v2 = vld [vmem:[#allocation6 + $0x408] sm:$0xff]  ;;  %v274_v5 = vld [vmem:[#allocation6 + $0x1c0] sm:$0xff]  ;;  %v4094_v7 = vpack.c.bf16 %v339_v63, %v332_v62  ;;  %v289_v9 = vld [vmem:[#allocation6 + $0x238] sm:$0xff] }
  0x8e   :  { %4083 = vmatpush1.bf16.msra.mxu0 %v4082_v34  ;;  %v4096_v10 = vpack.c.bf16 %v354_v3, %v347_v2  ;;  %v346_v11 = vld [vmem:[#allocation6 + $0x400] sm:$0xff]  ;;  %v353_v12 = vld [vmem:[#allocation6 + $0x438] sm:$0xff]  ;;  %v296_v13 = vld [vmem:[#allocation6 + $0x270] sm:$0xff]  ;;  %v4014_v16 = vpack.c.bf16 %v281_v6, %v274_v5 }
  0x8f   :  { %3995 = vmatpush1.bf16.msra.mxu1 %v3994_v18  ;;  %4085 = vmatprep.subr.bf16.mxu0 %v4084_v37  ;;  %v361_v14 = vld [vmem:[#allocation6 + $0x478] sm:$0xff]  ;;  %v368_v15 = vld [vmem:[#allocation6 + $0x4b0] sm:$0xff]  ;;  %v295_v18 = vld [vmem:[#allocation6 + $0x268] sm:$0xff]  ;;  %v4098_v19 = vpack.c.bf16 %v353_v12, %v346_v11  ;;  %v4016_v20 = vpack.c.bf16 %v296_v13, %v289_v9 }
  0x90   :  { %3997 = vmatprep.subr.bf16.mxu1 %v3996_v22  ;;  %v288_v17 = vld [vmem:[#allocation6 + $0x230] sm:$0xff]  ;;  %v303_v21 = vld [vmem:[#allocation6 + $0x2a8] sm:$0xff]  ;;  %v4100_v22 = vpack.c.bf16 %v368_v15, %v361_v14  ;;  %v310_v25 = vld [vmem:[#allocation6 + $0x2e0] sm:$0xff] }
  0x91   :  { %v360_v23 = vld [vmem:[#allocation6 + $0x470] sm:$0xff]  ;;  %v367_v24 = vld [vmem:[#allocation6 + $0x4a8] sm:$0xff]  ;;  %v382_v27 = vld [vmem:[#allocation6 + $0x520] sm:$0xff]  ;;  %v4018_v28 = vpack.c.bf16 %v295_v18, %v288_v17  ;;  %v4020_v32 = vpack.c.bf16 %v310_v25, %v303_v21 }
  0x92   :  { %212 = vmatmul.mubr.f32.vlgmr.msra.gmra.mrb[0].mxu1 %v102_v30  ;;  %4087 = vmatpush1.bf16.msra.mxu0 %v4086_v46  ;;  %v375_v26 = vld [vmem:[#allocation6 + $0x4e8] sm:$0xff]  ;;  %v302_v29 = vld [vmem:[#allocation6 + $0x2a0] sm:$0xff]  ;;  %v309_v30 = vld [vmem:[#allocation6 + $0x2d8] sm:$0xff] }
  0x93   :  { %3999 = vmatpush1.bf16.msra.mxu1 %v3998_v31  ;;  %4089 = vmatprep.subr.bf16.mxu0 %v4088_v49  ;;  %v4102_v31 = vpack.c.bf16 %v367_v24, %v360_v23  ;;  %v317_v33 = vld [vmem:[#allocation6 + $0x318] sm:$0xff]  ;;  %v4104_v34 = vpack.c.bf16 %v382_v27, %v375_v26  ;;  %v324_v37 = vld [vmem:[#allocation6 + $0x350] sm:$0xff]  ;;  %v4022_v40 = vpack.c.bf16 %v309_v30, %v302_v29  ;;  %v323_v42 = vld [vmem:[#allocation6 + $0x348] sm:$0xff] }
  0x94   :  { %4001 = vmatprep.subr.bf16.mxu1 %v4000_v35  ;;  %v374_v35 = vld [vmem:[#allocation6 + $0x4e0] sm:$0xff]  ;;  %v381_v36 = vld [vmem:[#allocation6 + $0x518] sm:$0xff]  ;;  %v396_v39 = vld [vmem:[#allocation6 + $0x590] sm:$0xff]  ;;  %v4024_v44 = vpack.c.bf16 %v324_v37, %v317_v33 }
  0x95   :  { %v389_v38 = vld [vmem:[#allocation6 + $0x558] sm:$0xff]  ;;  %v316_v41 = vld [vmem:[#allocation6 + $0x310] sm:$0xff]  ;;  %v331_v45 = vld [vmem:[#allocation6 + $0x388] sm:$0xff] }
  0x96   :  { %4091 = vmatpush1.bf16.msra.mxu0 %v4090_v58  ;;  %v4108_v46 = vpack.c.bf16 %v396_v39, %v389_v38  ;;  %v395_v48 = vld [vmem:[#allocation6 + $0x588] sm:$0xff]  ;;  %v338_v49 = vld [vmem:[#allocation6 + $0x3c0] sm:$0xff]  ;;  %v4026_v52 = vpack.c.bf16 %v323_v42, %v316_v41  ;;  %v337_v54 = vld [vmem:[#allocation6 + $0x3b8] sm:$0xff] }
  0x97   :  { %4003 = vmatpush1.bf16.msra.mxu1 %v4002_v43  ;;  %4093 = vmatprep.subr.bf16.mxu0 %v4092_v61  ;;  %v4106_v43 = vpack.c.bf16 %v381_v36, %v374_v35  ;;  %v403_v50 = vld [vmem:[#allocation6 + $0x5c8] sm:$0xff]  ;;  %v410_v51 = vld [vmem:[#allocation6 + $0x600] sm:$0xff]  ;;  %v4028_v56 = vpack.c.bf16 %v338_v49, %v331_v45  ;;  %v345_v57 = vld [vmem:[#allocation6 + $0x3f8] sm:$0xff] }
  0x98   :  { %4005 = vmatprep.subr.bf16.mxu1 %v4004_v47  ;;  %v388_v47 = vld [vmem:[#allocation6 + $0x550] sm:$0xff]  ;;  %v330_v53 = vld [vmem:[#allocation6 + $0x380] sm:$0xff]  ;;  %v4112_v58 = vpack.c.bf16 %v410_v51, %v403_v50  ;;  %v409_v60 = vld [vmem:[#allocation6 + $0x5f8] sm:$0xff] }
  0x99   :  { %v352_v61 = vld [vmem:[#allocation6 + $0x430] sm:$0xff]  ;;  %v417_v62 = vld [vmem:[#allocation6 + $0x638] sm:$0xff]  ;;  %v4030_v1 = vpack.c.bf16 %v337_v54, %v330_v53  ;;  %v351_v5 = vld [vmem:[#allocation6 + $0x428] sm:$0xff] }
  0x9a   :  { %4095 = vmatpush1.bf16.msra.mxu0 %v4094_v7  ;;  %v424_v63 = vld [vmem:[#allocation6 + $0x670] sm:$0xff]  ;;  %v359_v9 = vld [vmem:[#allocation6 + $0x468] sm:$0xff]  ;;  %v358_v14 = vld [vmem:[#allocation6 + $0x460] sm:$0xff] }
  0x9b   :  { %4007 = vmatpush1.bf16.msra.mxu1 %v4006_v55  ;;  %4097 = vmatprep.subr.bf16.mxu0 %v4096_v10  ;;  %v4110_v55 = vpack.c.bf16 %v395_v48, %v388_v47  ;;  %v344_v2 = vld [vmem:[#allocation6 + $0x3f0] sm:$0xff]  ;;  %v4116_v6 = vpack.c.bf16 %v424_v63, %v417_v62  ;;  %v366_v10 = vld [vmem:[#allocation6 + $0x4a0] sm:$0xff]  ;;  %v365_v15 = vld [vmem:[#allocation6 + $0x498] sm:$0xff] }
  0x9c   :  { %4009 = vmatprep.subr.bf16.mxu1 %v4008_v59  ;;  %v402_v59 = vld [vmem:[#allocation6 + $0x5c0] sm:$0xff]  ;;  %v416_v7 = vld [vmem:[#allocation6 + $0x630] sm:$0xff]  ;;  %v4034_v11 = vpack.c.bf16 %v351_v5, %v344_v2  ;;  %v4036_v13 = vpack.c.bf16 %v366_v10, %v359_v9  ;;  %v4038_v18 = vpack.c.bf16 %v365_v15, %v358_v14  ;;  %v379_v21 = vld [vmem:[#allocation6 + $0x508] sm:$0xff] }
  0x9d   :  { %v4114_v3 = vpack.c.bf16 %v409_v60, %v402_v59  ;;  %v380_v17 = vld [vmem:[#allocation6 + $0x510] sm:$0xff]  ;;  %v394_v23 = vld [vmem:[#allocation6 + $0x580] sm:$0xff]  ;;  %v393_v27 = vld [vmem:[#allocation6 + $0x578] sm:$0xff]  ;;  %v137_v59 = vlaneseq }
  0x9e   :  { %4099 = vmatpush1.bf16.msra.mxu0 %v4098_v19  ;;  %v386_v26 = vld [vmem:[#allocation6 + $0x540] sm:$0xff]  ;;  %v408_v29 = vld [vmem:[#allocation6 + $0x5f0] sm:$0xff]  ;;  %v407_v33 = vld [vmem:[#allocation6 + $0x5e8] sm:$0xff] }
  0x9f   :  { %4011 = vmatpush1.bf16.msra.mxu1 %v4010_v4  ;;  %4101 = vmatprep.subr.bf16.mxu0 %v4100_v22  ;;  %v4032_v4 = vpack.c.bf16 %v352_v61, %v345_v57  ;;  %v387_v22 = vld [vmem:[#allocation6 + $0x548] sm:$0xff]  ;;  %v4046_v30 = vpack.c.bf16 %v393_v27, %v386_v26  ;;  %v422_v35 = vld [vmem:[#allocation6 + $0x660] sm:$0xff]  ;;  %v421_v39 = vld [vmem:[#allocation6 + $0x658] sm:$0xff]  ;;  %v5788_v60 = vshrl.u32 %v137_v59, 7 }
  0xa0   :  { %4013 = vmatprep.subr.bf16.mxu1 %v4012_v8  ;;  %v423_v8 = vld [vmem:[#allocation6 + $0x668] sm:$0xff]  ;;  %v4044_v25 = vpack.c.bf16 %v394_v23, %v387_v22  ;;  %v414_v38 = vld [vmem:[#allocation6 + $0x620] sm:$0xff]  ;;  %v429_v41 = vld [vmem:[#allocation6 + $0x698] sm:$0xff] }
  0xa1   :  { %v4118_v12 = vpack.c.bf16 %v423_v8, %v416_v7  ;;  %v436_v42 = vld [vmem:[#allocation6 + $0x6d0] sm:$0xff]  ;;  %v438_v45 = vld [vmem:[#allocation6 + $0x6e0] sm:$0xff]  ;;  %v435_v47 = vld [vmem:[#allocation6 + $0x6c8] sm:$0xff]  ;;  %v5791_v61 = vsub.s32 1, %v5788_v60  ;;  %v5794_v63 = vsub.s32 0, %v5788_v60 }
  0xa2   :  { %4103 = vmatpush1.bf16.msra.mxu0 %v4102_v31  ;;  %v430_v50 = vld [vmem:[#allocation6 + $0x6a0] sm:$0xff]  ;;  %v437_v51 = vld [vmem:[#allocation6 + $0x6d8] sm:$0xff]  ;;  %v223_v53 = vld [vmem:[#allocation6 + $0x28] sm:$0xff] }
  0xa3   :  { %4015 = vmatpush1.bf16.msra.mxu1 %v4014_v16  ;;  %4105 = vmatprep.subr.bf16.mxu0 %v4104_v34  ;;  %v373_v16 = vld [vmem:[#allocation6 + $0x4d8] sm:$0xff]  ;;  %v415_v34 = vld [vmem:[#allocation6 + $0x628] sm:$0xff]  ;;  %v230_v54 = vld [vmem:[#allocation6 + $0x60] sm:$0xff] }
  0xa4   :  { %4017 = vmatprep.subr.bf16.mxu1 %v4016_v20  ;;  %v4040_v19 = vpack.c.bf16 %v380_v17, %v373_v16  ;;  %v372_v20 = vld [vmem:[#allocation6 + $0x4d0] sm:$0xff]  ;;  %v4052_v37 = vpack.c.bf16 %v422_v35, %v415_v34  ;;  %v343_v57 = vld [vmem:[#allocation6 + $0x3e8] sm:$0xff]  ;;  %v135_v62 = vld [vmem:[#allocation4] sm:$0x3] }
  0xa5   :  { %v4042_v24 = vpack.c.bf16 %v379_v21, %v372_v20  ;;  %v222_v2 = vld [vmem:[#allocation6 + $0x20] sm:$0xff]  ;;  %v224_v5 = vld [vmem:[#allocation6 + $0x30] sm:$0xff]  ;;  %v237_v8 = vld [vmem:[#allocation6 + $0x98] sm:$0xff] }
  0xa6   :  { %4107 = vmatpush1.bf16.msra.mxu0 %v4106_v43  ;;  %v431_v43 = vld [vmem:[#allocation6 + $0x6a8] sm:$0xff]  ;;  %v244_v10 = vld [vmem:[#allocation6 + $0xd0] sm:$0xff]  ;;  %v245_v20 = vld [vmem:[#allocation6 + $0xd8] sm:$0xff] }
  0xa7   :  { %4019 = vmatpush1.bf16.msra.mxu1 %v4018_v28  ;;  %4109 = vmatprep.subr.bf16.mxu0 %v4108_v46  ;;  %v401_v28 = vld [vmem:[#allocation6 + $0x5b8] sm:$0xff]  ;;  %v428_v46 = vld [vmem:[#allocation6 + $0x690] sm:$0xff]  ;;  %v4120_v48 = vpack.c.bf16 %v438_v45, %v431_v43  ;;  %v243_v17 = vld [vmem:[#allocation6 + $0xc8] sm:$0xff]  ;;  %v4128_v22 = vpack.c.bf16 %v244_v10, %v237_v8 }
  0xa8   :  { %4021 = vmatprep.subr.bf16.mxu1 %v4020_v32  ;;  %v4048_v31 = vpack.c.bf16 %v408_v29, %v401_v28  ;;  %v400_v32 = vld [vmem:[#allocation6 + $0x5b0] sm:$0xff]  ;;  %v4058_v49 = vpack.c.bf16 %v435_v47, %v428_v46  ;;  %v251_v21 = vld [vmem:[#allocation6 + $0x108] sm:$0xff]  ;;  %v250_v29 = vld [vmem:[#allocation6 + $0x100] sm:$0xff] }
  0xa9   :  { %v4050_v36 = vpack.c.bf16 %v407_v33, %v400_v32  ;;  %v236_v16 = vld [vmem:[#allocation6 + $0x90] sm:$0xff]  ;;  %v371_v26 = vld [vmem:[#allocation6 + $0x4c8] sm:$0xff]  ;;  %v265_v35 = vld [vmem:[#allocation6 + $0x178] sm:$0xff] }
  0xaa   :  { %4111 = vmatpush1.bf16.msra.mxu0 %v4110_v55  ;;  %v336_v55 = vld [vmem:[#allocation6 + $0x3b0] sm:$0xff]  ;;  %v4130_v27 = vpack.c.bf16 %v243_v17, %v236_v16  ;;  %v259_v34 = vld [vmem:[#allocation6 + $0x148] sm:$0xff]  ;;  %v266_v45 = vld [vmem:[#allocation6 + $0x180] sm:$0xff] }
  0xab   :  { %4023 = vmatpush1.bf16.msra.mxu1 %v4022_v40  ;;  %4113 = vmatprep.subr.bf16.mxu0 %v4112_v58  ;;  %v4054_v40 = vpack.c.bf16 %v421_v39, %v414_v38  ;;  %v4188_v58 = vpack.c.bf16 %v343_v57, %v336_v55  ;;  %v252_v33 = vld [vmem:[#allocation6 + $0x110] sm:$0xff]  ;;  %v385_v38 = vld [vmem:[#allocation6 + $0x538] sm:$0xff]  ;;  %v279_v47 = vld [vmem:[#allocation6 + $0x1e8] sm:$0xff] }
  0xac   :  { %4025 = vmatprep.subr.bf16.mxu1 %v4024_v44  ;;  %v4056_v44 = vpack.c.bf16 %v436_v42, %v429_v41  ;;  %v264_v41 = vld [vmem:[#allocation6 + $0x170] sm:$0xff]  ;;  %v271_v42 = vld [vmem:[#allocation6 + $0x1a8] sm:$0xff]  ;;  %v273_v46 = vld [vmem:[#allocation6 + $0x1b8] sm:$0xff] }
  0xad   :  { %v280_v57 = vld [vmem:[#allocation6 + $0x1f0] sm:$0xff]  ;;  %v293_v59 = vld [vmem:[#allocation6 + $0x258] sm:$0xff]  ;;  %v306_v17 = vld [vmem:[#allocation6 + $0x2c0] sm:$0xff] }
  0xae   :  { %4115 = vmatpush1.bf16.msra.mxu0 %v4114_v3  ;;  %v140_v3 = vrot.slane %v135_v62, %v5794_v63  ;;  %v301_v10 = vld [vmem:[#allocation6 + $0x298] sm:$0xff] }
  0xaf   :  { %4027 = vmatpush1.bf16.msra.mxu1 %v4026_v52  ;;  %4117 = vmatprep.subr.bf16.mxu0 %v4116_v6  ;;  %v4122_v52 = vpack.c.bf16 %v437_v51, %v430_v50  ;;  %v231_v6 = vld [vmem:[#allocation6 + $0x68] sm:$0xff]  ;;  %v4138_v51 = vpack.c.bf16 %v271_v42, %v264_v41  ;;  %v334_v42 = vld [vmem:[#allocation6 + $0x3a0] sm:$0xff] }
  0xb0   :  { %4029 = vmatprep.subr.bf16.mxu1 %v4028_v56  ;;  %v4124_v56 = vpack.c.bf16 %v230_v54, %v223_v53  ;;  %v4190_v15 = vpack.c.bf16 %v231_v6, %v224_v5  ;;  %v399_v50 = vld [vmem:[#allocation6 + $0x5a8] sm:$0xff]  ;;  %v278_v53 = vld [vmem:[#allocation6 + $0x1e0] sm:$0xff]  ;;  %v285_v54 = vld [vmem:[#allocation6 + $0x218] sm:$0xff] }
  0xb1   :  { %v292_v5 = vld [vmem:[#allocation6 + $0x250] sm:$0xff]  ;;  %v299_v6 = vld [vmem:[#allocation6 + $0x288] sm:$0xff] }
  0xb2   :  { %4119 = vmatpush1.bf16.msra.mxu0 %v4118_v12  ;;  %v357_v12 = vld [vmem:[#allocation6 + $0x458] sm:$0xff] }
  0xb3   :  { %4031 = vmatpush1.bf16.msra.mxu1 %v4030_v1  ;;  %4121 = vmatprep.subr.bf16.mxu0 %v4120_v48  ;;  %v144_v1 = vrot.slane %v135_v62, %v5791_v61  ;;  %v286_v48 = vld [vmem:[#allocation6 + $0x220] sm:$0xff]  ;;  %v300_v62 = vld [vmem:[#allocation6 + $0x290] sm:$0xff] }
  0xb4   :  { %4033 = vmatprep.subr.bf16.mxu1 %v4032_v4  ;;  %v229_v4 = vld [vmem:[#allocation6 + $0x58] sm:$0xff]  ;;  %v4140_v55 = vpack.c.bf16 %v286_v48, %v279_v47  ;;  %v762_v47 = vld [vmem:[#allocation9] sm:$0xff]  ;;  %v773_v48 = vld [vmem:[#allocation9 + $0x58] sm:$0xff] }
  0xb5   :  { %v4126_v14 = vpack.c.bf16 %v229_v4, %v222_v2  ;;  %v413_v2 = vld [vmem:[#allocation6 + $0x618] sm:$0xff] }
  0xb6   :  { %4123 = vmatpush1.bf16.msra.mxu0 %v4122_v52  ;;  %v4202_v52 = vpack.c.bf16 %v273_v46, %v266_v45  ;;  %v349_v45 = vld [vmem:[#allocation6 + $0x418] sm:$0xff] }
  0xb7   :  { %4035 = vmatpush1.bf16.msra.mxu1 %v4034_v11  ;;  %4189 = vmatprep.subr.bf16.mxu0 %v4188_v58  ;;  %v350_v11 = vld [vmem:[#allocation6 + $0x420] sm:$0xff]  ;;  %v287_v58 = vld [vmem:[#allocation6 + $0x228] sm:$0xff] }
  0xb8   :  { %4037 = vmatprep.subr.bf16.mxu1 %v4036_v13  ;;  %v4192_v23 = vpack.c.bf16 %v357_v12, %v350_v11  ;;  %v4206_v4 = vpack.c.bf16 %v287_v58, %v280_v57  ;;  %v307_v11 = vld [vmem:[#allocation6 + $0x2c8] sm:$0xff]  ;;  %v314_v12 = vld [vmem:[#allocation6 + $0x300] sm:$0xff] }
  0xb9   :  { %v363_v57 = vld [vmem:[#allocation6 + $0x488] sm:$0xff] }
  0xbb   :  { %4039 = vmatpush1.bf16.msra.mxu1 %v4038_v18 }
  0xbc   :  { %4041 = vmatprep.subr.bf16.mxu1 %v4040_v19  ;;  %v238_v19 = vld [vmem:[#allocation6 + $0xa0] sm:$0xff] }
  0xbd   :  { %v4194_v28 = vpack.c.bf16 %v245_v20, %v238_v19  ;;  %v313_v19 = vld [vmem:[#allocation6 + $0x2f8] sm:$0xff]  ;;  %v4148_v20 = vpack.c.bf16 %v314_v12, %v307_v11  ;;  %v806_v11 = vld [vmem:[#allocation9 + $0x160] sm:$0xff]  ;;  %v817_v12 = vld [vmem:[#allocation9 + $0x1b8] sm:$0xff] }
  0xbf   :  { %4043 = vmatpush1.bf16.msra.mxu1 %v4042_v24  ;;  %v258_v24 = vld [vmem:[#allocation6 + $0x140] sm:$0xff] }
  0xc0   :  { %4045 = vmatprep.subr.bf16.mxu1 %v4044_v25  ;;  %v364_v25 = vld [vmem:[#allocation6 + $0x490] sm:$0xff] }
  0xc1   :  { %v4196_v32 = vpack.c.bf16 %v371_v26, %v364_v25  ;;  %v328_v25 = vld [vmem:[#allocation6 + $0x370] sm:$0xff]  ;;  %v434_v26 = vld [vmem:[#allocation6 + $0x6c0] sm:$0xff] }
  0xc3   :  { %4047 = vmatpush1.bf16.msra.mxu1 %v4046_v30  ;;  %v257_v30 = vld [vmem:[#allocation6 + $0x138] sm:$0xff] }
  0xc4   :  { %4049 = vmatprep.subr.bf16.mxu1 %v4048_v31  ;;  %v4132_v31 = vpack.c.bf16 %v258_v24, %v251_v21  ;;  %v4134_v39 = vpack.c.bf16 %v257_v30, %v250_v29  ;;  %v321_v24 = vld [vmem:[#allocation6 + $0x338] sm:$0xff]  ;;  %v320_v30 = vld [vmem:[#allocation6 + $0x330] sm:$0xff] }
  0xc7   :  { %4051 = vmatpush1.bf16.msra.mxu1 %v4050_v36  ;;  %v272_v36 = vld [vmem:[#allocation6 + $0x1b0] sm:$0xff] }
  0xc8   :  { %4053 = vmatprep.subr.bf16.mxu1 %v4052_v37  ;;  %v378_v37 = vld [vmem:[#allocation6 + $0x500] sm:$0xff]  ;;  %v4136_v43 = vpack.c.bf16 %v272_v36, %v265_v35  ;;  %v329_v35 = vld [vmem:[#allocation6 + $0x378] sm:$0xff]  ;;  %v335_v36 = vld [vmem:[#allocation6 + $0x3a8] sm:$0xff] }
  0xcb   :  { %4055 = vmatpush1.bf16.msra.mxu1 %v4054_v40  ;;  %v4198_v40 = vpack.c.bf16 %v259_v34, %v252_v33  ;;  %v322_v34 = vld [vmem:[#allocation6 + $0x340] sm:$0xff] }
  0xcc   :  { %4057 = vmatprep.subr.bf16.mxu1 %v4056_v44  ;;  %v4200_v44 = vpack.c.bf16 %v385_v38, %v378_v37  ;;  %v342_v37 = vld [vmem:[#allocation6 + $0x3e0] sm:$0xff]  ;;  %v763_v38 = vld [vmem:[#allocation9 + $0x8] sm:$0xff]  ;;  %v4218_v41 = vpack.c.bf16 %v329_v35, %v322_v34  ;;  %v405_v34 = vld [vmem:[#allocation6 + $0x5d8] sm:$0xff] }
  0xcf   :  { %4059 = vmatpush1.bf16.msra.mxu1 %v4058_v49  ;;  %v392_v49 = vld [vmem:[#allocation6 + $0x570] sm:$0xff] }
  0xd0   :  { %4125 = vmatprep.subr.bf16.mxu1 %v4124_v56  ;;  %v4204_v56 = vpack.c.bf16 %v399_v50, %v392_v49  ;;  %v356_v49 = vld [vmem:[#allocation6 + $0x450] sm:$0xff]  ;;  %v785_v50 = vld [vmem:[#allocation9 + $0xb8] sm:$0xff] }
 0x165   :  { %v213_v7 = vpop.f32.mrb[0].mxu1 }
 0x166   :  { %v215_v9 = vpop.f32.mrb[1].mxu1  ;;  %v5798_v18 = vadd.f32 %v213_v7, %v140_v3  ;;  %v4142_v3 = vpack.c.bf16 %v285_v54, %v278_v53  ;;  %v4144_v7 = vpack.c.bf16 %v300_v62, %v293_v59  ;;  %v348_v53 = vld [vmem:[#allocation6 + $0x410] sm:$0xff]  ;;  %v355_v54 = vld [vmem:[#allocation6 + $0x448] sm:$0xff]  ;;  %v784_v59 = vld [vmem:[#allocation9 + $0xb0] sm:$0xff] }
 0x167   :  { %v216_v13 = vadd.f32 %v215_v9, %v144_v1  ;;  %v406_v1 = vld [vmem:[#allocation6 + $0x5e0] sm:$0xff]  ;;  %v795_v62 = vld [vmem:[#allocation9 + $0x108] sm:$0xff] }
 0x168   :  { %v4208_v8 = vpack.c.bf16 %v413_v2, %v406_v1  ;;  %v294_v9 = vld [vmem:[#allocation6 + $0x260] sm:$0xff]  ;;  %v807_v2 = vld [vmem:[#allocation9 + $0x168] sm:$0xff] }
 0x169   :  { %543 = vmatprep.mubr.f32.mxu1 %v216_v13  ;;  %614 = vmatprep.mubr.f32.mxu0 %v216_v13  ;;  %v4210_v16 = vpack.c.bf16 %v301_v10, %v294_v9  ;;  %v370_v1 = vld [vmem:[#allocation6 + $0x4c0] sm:$0xff]  ;;  %v377_v9 = vld [vmem:[#allocation6 + $0x4f8] sm:$0xff] }
 0x16a   :  { %544 = vmatmul.mubr.f32.vlgmr.msra.gmra.mrb[2].mxu1 %v5798_v18  ;;  %615 = vmatmul.mubr.f32.vlgmr.msra.gmra.mrb[0].mxu0 %v5798_v18 }
 0x16b   :  { %4127 = vmatpush1.bf16.msra.mxu1 %v4126_v14  ;;  %4191 = vmatpush3.bf16.msra.mxu0 %v4190_v15  ;;  %v427_v14 = vld [vmem:[#allocation6 + $0x688] sm:$0xff]  ;;  %v4146_v15 = vpack.c.bf16 %v299_v6, %v292_v5  ;;  %v362_v5 = vld [vmem:[#allocation6 + $0x480] sm:$0xff]  ;;  %v369_v6 = vld [vmem:[#allocation6 + $0x4b8] sm:$0xff] }
 0x16c   :  { %685 = vmatprep.mubr.f32.mxu1 %v216_v13  ;;  %756 = vmatprep.mubr.f32.mxu0 %v216_v13  ;;  %v420_v13 = vld [vmem:[#allocation6 + $0x650] sm:$0xff] }
 0x16d   :  { %4129 = vmatprep.subr.bf16.mxu1 %v4128_v22  ;;  %4193 = vmatprep.subr.bf16.mxu0 %v4192_v23  ;;  %v4212_v21 = vpack.c.bf16 %v427_v14, %v420_v13  ;;  %v308_v22 = vld [vmem:[#allocation6 + $0x2d0] sm:$0xff]  ;;  %v315_v23 = vld [vmem:[#allocation6 + $0x308] sm:$0xff]  ;;  %v829_v14 = vld [vmem:[#allocation9 + $0x218] sm:$0xff] }
 0x16e   :  { %v4214_v29 = vpack.c.bf16 %v315_v23, %v308_v22  ;;  %v384_v13 = vld [vmem:[#allocation6 + $0x530] sm:$0xff]  ;;  %v391_v22 = vld [vmem:[#allocation6 + $0x568] sm:$0xff] }
 0x16f   :  { %4131 = vmatpush1.bf16.msra.mxu1 %v4130_v27  ;;  %4195 = vmatpush3.bf16.msra.mxu0 %v4194_v28  ;;  %v441_v27 = vld [vmem:[#allocation6 + $0x6f8] sm:$0xff]  ;;  %v4150_v28 = vpack.c.bf16 %v313_v19, %v306_v17  ;;  %v376_v17 = vld [vmem:[#allocation6 + $0x4f0] sm:$0xff]  ;;  %v383_v19 = vld [vmem:[#allocation6 + $0x528] sm:$0xff] }
 0x170   :  { %4133 = vmatprep.subr.bf16.mxu1 %v4132_v31  ;;  %4197 = vmatprep.subr.bf16.mxu0 %v4196_v32  ;;  %v327_v31 = vld [vmem:[#allocation6 + $0x368] sm:$0xff]  ;;  %v4152_v32 = vpack.c.bf16 %v328_v25, %v321_v24  ;;  %v4216_v33 = vpack.c.bf16 %v441_v27, %v434_v26  ;;  %v828_v24 = vld [vmem:[#allocation9 + $0x210] sm:$0xff]  ;;  %v839_v25 = vld [vmem:[#allocation9 + $0x268] sm:$0xff] }
 0x171   :  { %v398_v26 = vld [vmem:[#allocation6 + $0x5a0] sm:$0xff]  ;;  %v851_v27 = vld [vmem:[#allocation9 + $0x2c8] sm:$0xff] }
 0x173   :  { %4135 = vmatpush1.bf16.msra.mxu1 %v4134_v39  ;;  %4199 = vmatpush3.bf16.msra.mxu0 %v4198_v40  ;;  %v774_v39 = vld [vmem:[#allocation9 + $0x60] sm:$0xff]  ;;  %v4154_v40 = vpack.c.bf16 %v327_v31, %v320_v30  ;;  %v390_v30 = vld [vmem:[#allocation6 + $0x560] sm:$0xff]  ;;  %v397_v31 = vld [vmem:[#allocation6 + $0x598] sm:$0xff] }
 0x174   :  { %4137 = vmatprep.subr.bf16.mxu1 %v4136_v43  ;;  %4201 = vmatprep.subr.bf16.mxu0 %v4200_v44  ;;  %v341_v43 = vld [vmem:[#allocation6 + $0x3d8] sm:$0xff]  ;;  %v4156_v44 = vpack.c.bf16 %v342_v37, %v335_v36  ;;  %v4220_v46 = vpack.c.bf16 %v774_v39, %v763_v38  ;;  %v850_v36 = vld [vmem:[#allocation9 + $0x2c0] sm:$0xff]  ;;  %v861_v37 = vld [vmem:[#allocation9 + $0x318] sm:$0xff] }
 0x175   :  { %v412_v38 = vld [vmem:[#allocation6 + $0x610] sm:$0xff]  ;;  %v873_v39 = vld [vmem:[#allocation9 + $0x378] sm:$0xff] }
 0x177   :  { %4139 = vmatpush1.bf16.msra.mxu1 %v4138_v51  ;;  %4203 = vmatpush3.bf16.msra.mxu0 %v4202_v52  ;;  %v796_v51 = vld [vmem:[#allocation9 + $0x110] sm:$0xff]  ;;  %v4158_v52 = vpack.c.bf16 %v341_v43, %v334_v42  ;;  %v404_v42 = vld [vmem:[#allocation6 + $0x5d0] sm:$0xff]  ;;  %v411_v43 = vld [vmem:[#allocation6 + $0x608] sm:$0xff] }
 0x178   :  { %4141 = vmatprep.subr.bf16.mxu1 %v4140_v55  ;;  %4205 = vmatprep.subr.bf16.mxu0 %v4204_v56  ;;  %v4222_v55 = vpack.c.bf16 %v773_v48, %v762_v47  ;;  %v4160_v56 = vpack.c.bf16 %v356_v49, %v349_v45  ;;  %v4224_v58 = vpack.c.bf16 %v796_v51, %v785_v50  ;;  %v872_v48 = vld [vmem:[#allocation9 + $0x370] sm:$0xff]  ;;  %v883_v49 = vld [vmem:[#allocation9 + $0x3c8] sm:$0xff]  ;;  %v426_v50 = vld [vmem:[#allocation6 + $0x680] sm:$0xff] }
 0x179   :  { %v4176_v45 = vpack.c.bf16 %v412_v38, %v405_v34  ;;  %v895_v51 = vld [vmem:[#allocation9 + $0x428] sm:$0xff] }
 0x17a   :  { %v971_v38 = vld [vmem:[#allocation9 + $0x688] sm:$0xff] }
 0x17b   :  { %4143 = vmatpush1.bf16.msra.mxu1 %v4142_v3  ;;  %4207 = vmatpush3.bf16.msra.mxu0 %v4206_v4  ;;  %v818_v3 = vld [vmem:[#allocation9 + $0x1c0] sm:$0xff]  ;;  %v4162_v4 = vpack.c.bf16 %v355_v54, %v348_v53  ;;  %v4178_v53 = vpack.c.bf16 %v411_v43, %v404_v42  ;;  %v418_v54 = vld [vmem:[#allocation6 + $0x640] sm:$0xff]  ;;  %v808_v43 = vld [vmem:[#allocation9 + $0x170] sm:$0xff] }
 0x17c   :  { %4145 = vmatprep.subr.bf16.mxu1 %v4144_v7  ;;  %4209 = vmatprep.subr.bf16.mxu0 %v4208_v8  ;;  %v4226_v7 = vpack.c.bf16 %v795_v62, %v784_v59  ;;  %v4164_v8 = vpack.c.bf16 %v370_v1, %v363_v57  ;;  %v4228_v10 = vpack.c.bf16 %v818_v3, %v807_v2  ;;  %v894_v62 = vld [vmem:[#allocation9 + $0x420] sm:$0xff]  ;;  %v905_v1 = vld [vmem:[#allocation9 + $0x478] sm:$0xff]  ;;  %v440_v2 = vld [vmem:[#allocation6 + $0x6f0] sm:$0xff] }
 0x17d   :  { %v917_v3 = vld [vmem:[#allocation9 + $0x4d8] sm:$0xff] }
 0x17f   :  { %4147 = vmatpush1.bf16.msra.mxu1 %v4146_v15  ;;  %4211 = vmatpush3.bf16.msra.mxu0 %v4210_v16  ;;  %v840_v15 = vld [vmem:[#allocation9 + $0x270] sm:$0xff]  ;;  %v4166_v16 = vpack.c.bf16 %v369_v6, %v362_v5  ;;  %v432_v6 = vld [vmem:[#allocation6 + $0x6b0] sm:$0xff] }
 0x180   :  { %4149 = vmatprep.subr.bf16.mxu1 %v4148_v20  ;;  %4213 = vmatprep.subr.bf16.mxu0 %v4212_v21  ;;  %v4230_v20 = vpack.c.bf16 %v817_v12, %v806_v11  ;;  %v4168_v21 = vpack.c.bf16 %v384_v13, %v377_v9  ;;  %v4232_v23 = vpack.c.bf16 %v840_v15, %v829_v14  ;;  %v916_v12 = vld [vmem:[#allocation9 + $0x4d0] sm:$0xff]  ;;  %v927_v13 = vld [vmem:[#allocation9 + $0x528] sm:$0xff] }
 0x181   :  { %v776_v14 = vld [vmem:[#allocation9 + $0x70] sm:$0xff]  ;;  %v939_v15 = vld [vmem:[#allocation9 + $0x588] sm:$0xff] }
 0x183   :  { %4151 = vmatpush1.bf16.msra.mxu1 %v4150_v28  ;;  %4215 = vmatpush3.bf16.msra.mxu0 %v4214_v29  ;;  %v862_v28 = vld [vmem:[#allocation9 + $0x320] sm:$0xff]  ;;  %v4170_v29 = vpack.c.bf16 %v383_v19, %v376_v17  ;;  %v764_v19 = vld [vmem:[#allocation9 + $0x10] sm:$0xff] }
 0x184   :  { %4153 = vmatprep.subr.bf16.mxu1 %v4152_v32  ;;  %4217 = vmatprep.subr.bf16.mxu0 %v4216_v33  ;;  %v4234_v32 = vpack.c.bf16 %v839_v25, %v828_v24  ;;  %v4172_v33 = vpack.c.bf16 %v398_v26, %v391_v22  ;;  %v4236_v35 = vpack.c.bf16 %v862_v28, %v851_v27  ;;  %v938_v25 = vld [vmem:[#allocation9 + $0x580] sm:$0xff]  ;;  %v949_v26 = vld [vmem:[#allocation9 + $0x5d8] sm:$0xff] }
 0x185   :  { %v798_v27 = vld [vmem:[#allocation9 + $0x120] sm:$0xff]  ;;  %v961_v28 = vld [vmem:[#allocation9 + $0x638] sm:$0xff] }
 0x187   :  { %4155 = vmatpush1.bf16.msra.mxu1 %v4154_v40  ;;  %4219 = vmatpush3.bf16.msra.mxu0 %v4218_v41  ;;  %v884_v40 = vld [vmem:[#allocation9 + $0x3d0] sm:$0xff]  ;;  %v4174_v41 = vpack.c.bf16 %v397_v31, %v390_v30  ;;  %v786_v31 = vld [vmem:[#allocation9 + $0xc0] sm:$0xff] }
 0x188   :  { %4157 = vmatprep.subr.bf16.mxu1 %v4156_v44  ;;  %4221 = vmatprep.subr.bf16.mxu0 %v4220_v46  ;;  %v4238_v44 = vpack.c.bf16 %v861_v37, %v850_v36  ;;  %v419_v46 = vld [vmem:[#allocation6 + $0x648] sm:$0xff]  ;;  %v4240_v47 = vpack.c.bf16 %v884_v40, %v873_v39  ;;  %v960_v37 = vld [vmem:[#allocation9 + $0x630] sm:$0xff]  ;;  %v983_v40 = vld [vmem:[#allocation9 + $0x6e8] sm:$0xff] }
 0x189   :  { %v4180_v57 = vpack.c.bf16 %v426_v50, %v419_v46  ;;  %v820_v39 = vld [vmem:[#allocation9 + $0x1d0] sm:$0xff]  ;;  %v993_v50 = vld [vmem:[#allocation9 + $0x738] sm:$0xff] }
 0x18a   :  { %757 = vmatmul.mubr.f32.vlgmr.msra.gmra.mrb[2].mxu0 %v5798_v18 }
 0x18b   :  { %4159 = vmatpush1.bf16.msra.mxu1 %v4158_v52  ;;  %4223 = vmatpush1.bf16.msra.mxu0 %v4222_v55  ;;  %v906_v52 = vld [vmem:[#allocation9 + $0x480] sm:$0xff]  ;;  %v425_v55 = vld [vmem:[#allocation6 + $0x678] sm:$0xff] }
 0x18c   :  { %4161 = vmatprep.subr.bf16.mxu1 %v4160_v56  ;;  %4225 = vmatprep.subr.bf16.mxu0 %v4224_v58  ;;  %v4242_v56 = vpack.c.bf16 %v883_v49, %v872_v48  ;;  %v433_v58 = vld [vmem:[#allocation6 + $0x6b8] sm:$0xff]  ;;  %v4244_v59 = vpack.c.bf16 %v906_v52, %v895_v51  ;;  %v4182_v5 = vpack.c.bf16 %v425_v55, %v418_v54  ;;  %v982_v49 = vld [vmem:[#allocation9 + $0x6e0] sm:$0xff]  ;;  %v1005_v52 = vld [vmem:[#allocation9 + $0x798] sm:$0xff] }
 0x18d   :  { %v4184_v9 = vpack.c.bf16 %v440_v2, %v433_v58  ;;  %v842_v51 = vld [vmem:[#allocation9 + $0x280] sm:$0xff]  ;;  %v853_v58 = vld [vmem:[#allocation9 + $0x2d8] sm:$0xff]  ;;  %v864_v2 = vld [vmem:[#allocation9 + $0x330] sm:$0xff] }
 0x18e   :  { %v830_v55 = vld [vmem:[#allocation9 + $0x220] sm:$0xff] }
 0x18f   :  { %4163 = vmatpush1.bf16.msra.mxu1 %v4162_v4  ;;  %4227 = vmatpush1.bf16.msra.mxu0 %v4226_v7  ;;  %v928_v4 = vld [vmem:[#allocation9 + $0x530] sm:$0xff]  ;;  %v439_v7 = vld [vmem:[#allocation6 + $0x6e8] sm:$0xff] }
 0x190   :  { %4165 = vmatprep.subr.bf16.mxu1 %v4164_v8  ;;  %4229 = vmatprep.subr.bf16.mxu0 %v4228_v10  ;;  %v4246_v8 = vpack.c.bf16 %v905_v1, %v894_v62  ;;  %v765_v10 = vld [vmem:[#allocation9 + $0x18] sm:$0xff]  ;;  %v4248_v11 = vpack.c.bf16 %v928_v4, %v917_v3  ;;  %v4186_v17 = vpack.c.bf16 %v439_v7, %v432_v6  ;;  %v1004_v62 = vld [vmem:[#allocation9 + $0x790] sm:$0xff]  ;;  %v1015_v1 = vld [vmem:[#allocation9 + $0x7e8] sm:$0xff] }
 0x191   :  { %v4444_v22 = vpack.c.bf16 %v776_v14, %v765_v10  ;;  %v1027_v3 = vld [vmem:[#allocation9 + $0x848] sm:$0xff]  ;;  %v1038_v4 = vld [vmem:[#allocation9 + $0x8a0] sm:$0xff]  ;;  %v852_v6 = vld [vmem:[#allocation9 + $0x2d0] sm:$0xff] }
 0x192   :  { %v863_v7 = vld [vmem:[#allocation9 + $0x328] sm:$0xff]  ;;  %v886_v14 = vld [vmem:[#allocation9 + $0x3e0] sm:$0xff] }
 0x193   :  { %4167 = vmatpush1.bf16.msra.mxu1 %v4166_v16  ;;  %4231 = vmatpush1.bf16.msra.mxu0 %v4230_v20  ;;  %v950_v16 = vld [vmem:[#allocation9 + $0x5e0] sm:$0xff]  ;;  %v775_v20 = vld [vmem:[#allocation9 + $0x68] sm:$0xff] }
 0x194   :  { %4169 = vmatprep.subr.bf16.mxu1 %v4168_v21  ;;  %4233 = vmatprep.subr.bf16.mxu0 %v4232_v23  ;;  %v4250_v21 = vpack.c.bf16 %v927_v13, %v916_v12  ;;  %v787_v23 = vld [vmem:[#allocation9 + $0xc8] sm:$0xff]  ;;  %v4252_v24 = vpack.c.bf16 %v950_v16, %v939_v15  ;;  %v4446_v30 = vpack.c.bf16 %v775_v20, %v764_v19  ;;  %v1026_v12 = vld [vmem:[#allocation9 + $0x840] sm:$0xff]  ;;  %v1037_v13 = vld [vmem:[#allocation9 + $0x898] sm:$0xff] }
 0x195   :  { %v4448_v34 = vpack.c.bf16 %v798_v27, %v787_v23  ;;  %v875_v10 = vld [vmem:[#allocation9 + $0x388] sm:$0xff]  ;;  %v1049_v15 = vld [vmem:[#allocation9 + $0x8f8] sm:$0xff]  ;;  %v1060_v16 = vld [vmem:[#allocation9 + $0x950] sm:$0xff] }
 0x196   :  { %v874_v19 = vld [vmem:[#allocation9 + $0x380] sm:$0xff]  ;;  %v885_v20 = vld [vmem:[#allocation9 + $0x3d8] sm:$0xff]  ;;  %v908_v27 = vld [vmem:[#allocation9 + $0x490] sm:$0xff] }
 0x197   :  { %4171 = vmatpush1.bf16.msra.mxu1 %v4170_v29  ;;  %4235 = vmatpush1.bf16.msra.mxu0 %v4234_v32  ;;  %v972_v29 = vld [vmem:[#allocation9 + $0x690] sm:$0xff]  ;;  %v797_v32 = vld [vmem:[#allocation9 + $0x118] sm:$0xff] }
 0x198   :  { %4173 = vmatprep.subr.bf16.mxu1 %v4172_v33  ;;  %4237 = vmatprep.subr.bf16.mxu0 %v4236_v35  ;;  %v4254_v33 = vpack.c.bf16 %v949_v26, %v938_v25  ;;  %v809_v35 = vld [vmem:[#allocation9 + $0x178] sm:$0xff]  ;;  %v4256_v36 = vpack.c.bf16 %v972_v29, %v961_v28  ;;  %v4450_v42 = vpack.c.bf16 %v797_v32, %v786_v31  ;;  %v1048_v25 = vld [vmem:[#allocation9 + $0x8f0] sm:$0xff]  ;;  %v1059_v26 = vld [vmem:[#allocation9 + $0x948] sm:$0xff] }
 0x199   :  { %v4452_v46 = vpack.c.bf16 %v820_v39, %v809_v35  ;;  %v897_v23 = vld [vmem:[#allocation9 + $0x438] sm:$0xff]  ;;  %v1071_v28 = vld [vmem:[#allocation9 + $0x9a8] sm:$0xff]  ;;  %v1082_v29 = vld [vmem:[#allocation9 + $0xa00] sm:$0xff] }
 0x19a   :  { %v896_v31 = vld [vmem:[#allocation9 + $0x430] sm:$0xff]  ;;  %v907_v32 = vld [vmem:[#allocation9 + $0x488] sm:$0xff]  ;;  %v930_v39 = vld [vmem:[#allocation9 + $0x540] sm:$0xff] }
 0x19b   :  { %4175 = vmatpush1.bf16.msra.mxu1 %v4174_v41  ;;  %4239 = vmatpush1.bf16.msra.mxu0 %v4238_v44  ;;  %v994_v41 = vld [vmem:[#allocation9 + $0x740] sm:$0xff]  ;;  %v819_v44 = vld [vmem:[#allocation9 + $0x1c8] sm:$0xff] }
 0x19c   :  { %4177 = vmatprep.subr.bf16.mxu1 %v4176_v45  ;;  %4241 = vmatprep.subr.bf16.mxu0 %v4240_v47  ;;  %v4258_v45 = vpack.c.bf16 %v971_v38, %v960_v37  ;;  %v831_v47 = vld [vmem:[#allocation9 + $0x228] sm:$0xff]  ;;  %v4260_v48 = vpack.c.bf16 %v994_v41, %v983_v40  ;;  %v4454_v54 = vpack.c.bf16 %v819_v44, %v808_v43  ;;  %v1070_v37 = vld [vmem:[#allocation9 + $0x9a0] sm:$0xff]  ;;  %v1081_v38 = vld [vmem:[#allocation9 + $0x9f8] sm:$0xff] }
 0x19d   :  { %v919_v35 = vld [vmem:[#allocation9 + $0x4e8] sm:$0xff]  ;;  %v1093_v40 = vld [vmem:[#allocation9 + $0xa58] sm:$0xff]  ;;  %v1104_v41 = vld [vmem:[#allocation9 + $0xab0] sm:$0xff] }
 0x19e   :  { %v918_v43 = vld [vmem:[#allocation9 + $0x4e0] sm:$0xff]  ;;  %v929_v44 = vld [vmem:[#allocation9 + $0x538] sm:$0xff] }
 0x19f   :  { %4179 = vmatpush1.bf16.msra.mxu1 %v4178_v53  ;;  %4243 = vmatpush1.bf16.msra.mxu0 %v4242_v56  ;;  %v1016_v53 = vld [vmem:[#allocation9 + $0x7f0] sm:$0xff]  ;;  %v4262_v56 = vpack.c.bf16 %v993_v50, %v982_v49  ;;  %v1103_v50 = vld [vmem:[#allocation9 + $0xaa8] sm:$0xff] }
 0x1a0   :  { %4181 = vmatprep.subr.bf16.mxu1 %v4180_v57  ;;  %4245 = vmatprep.subr.bf16.mxu0 %v4244_v59  ;;  %v4456_v57 = vpack.c.bf16 %v842_v51, %v831_v47  ;;  %v4264_v59 = vpack.c.bf16 %v1016_v53, %v1005_v52  ;;  %v941_v47 = vld [vmem:[#allocation9 + $0x598] sm:$0xff]  ;;  %v1092_v49 = vld [vmem:[#allocation9 + $0xa50] sm:$0xff]  ;;  %v1115_v52 = vld [vmem:[#allocation9 + $0xb08] sm:$0xff] }
 0x1a1   :  { %v952_v51 = vld [vmem:[#allocation9 + $0x5f0] sm:$0xff]  ;;  %v1126_v53 = vld [vmem:[#allocation9 + $0xb60] sm:$0xff] }
 0x1a3   :  { %4183 = vmatpush1.bf16.msra.mxu1 %v4182_v5  ;;  %4247 = vmatpush1.bf16.msra.mxu0 %v4246_v8  ;;  %v4266_v8 = vpack.c.bf16 %v1015_v1, %v1004_v62  ;;  %v974_v62 = vld [vmem:[#allocation9 + $0x6a0] sm:$0xff] }
 0x1a4   :  { %4185 = vmatprep.subr.bf16.mxu1 %v4184_v9  ;;  %4249 = vmatprep.subr.bf16.mxu0 %v4248_v11  ;;  %v4460_v9 = vpack.c.bf16 %v864_v2, %v853_v58  ;;  %v4268_v11 = vpack.c.bf16 %v1038_v4, %v1027_v3  ;;  %v4284_v58 = vpack.c.bf16 %v1126_v53, %v1115_v52  ;;  %v962_v3 = vld [vmem:[#allocation9 + $0x640] sm:$0xff]  ;;  %v973_v4 = vld [vmem:[#allocation9 + $0x698] sm:$0xff]  ;;  %v1116_v52 = vld [vmem:[#allocation9 + $0xb10] sm:$0xff] }
 0x1a5   :  { %v1127_v53 = vld [vmem:[#allocation9 + $0xb68] sm:$0xff] }
 0x1a7   :  { %4187 = vmatpush1.bf16.msra.mxu1 %v4186_v17  ;;  %4251 = vmatpush1.bf16.msra.mxu0 %v4250_v21  ;;  %v4462_v17 = vpack.c.bf16 %v863_v7, %v852_v6  ;;  %v4270_v21 = vpack.c.bf16 %v1037_v13, %v1026_v12  ;;  %v996_v6 = vld [vmem:[#allocation9 + $0x750] sm:$0xff]  ;;  %v4482_v7 = vpack.c.bf16 %v973_v4, %v962_v3  ;;  %v1018_v12 = vld [vmem:[#allocation9 + $0x800] sm:$0xff] }
 0x1a8   :  { %4445 = vmatprep.subr.bf16.mxu1 %v4444_v22  ;;  %4253 = vmatprep.subr.bf16.mxu0 %v4252_v24  ;;  %v4464_v22 = vpack.c.bf16 %v886_v14, %v875_v10  ;;  %v4272_v24 = vpack.c.bf16 %v1060_v16, %v1049_v15  ;;  %v995_v10 = vld [vmem:[#allocation9 + $0x748] sm:$0xff]  ;;  %v1006_v15 = vld [vmem:[#allocation9 + $0x7a0] sm:$0xff]  ;;  %v1017_v16 = vld [vmem:[#allocation9 + $0x7f8] sm:$0xff]  ;;  %v4510_v4 = vpack.c.bf16 %v1127_v53, %v1116_v52 }
 0x1a9   :  { %v1225_v52 = vld [vmem:[#allocation9 + $0xe78] sm:$0xff]  ;;  %v1236_v53 = vld [vmem:[#allocation9 + $0xed0] sm:$0xff] }
 0x1aa   :  { %686 = vmatmul.mubr.f32.vlgmr.msra.gmra.mrb[4].mxu1 %v5798_v18  ;;  %v841_v18 = vld [vmem:[#allocation9 + $0x278] sm:$0xff] }
 0x1ab   :  { %4447 = vmatpush1.bf16.msra.mxu1 %v4446_v30  ;;  %4255 = vmatpush1.bf16.msra.mxu0 %v4254_v33  ;;  %v4458_v5 = vpack.c.bf16 %v841_v18, %v830_v55  ;;  %v4466_v30 = vpack.c.bf16 %v885_v20, %v874_v19  ;;  %v4274_v33 = vpack.c.bf16 %v1059_v26, %v1048_v25  ;;  %v1040_v19 = vld [vmem:[#allocation9 + $0x8b0] sm:$0xff]  ;;  %v1062_v25 = vld [vmem:[#allocation9 + $0x960] sm:$0xff] }
 0x1ac   :  { %4449 = vmatprep.subr.bf16.mxu1 %v4448_v34  ;;  %4257 = vmatprep.subr.bf16.mxu0 %v4256_v36  ;;  %v4468_v34 = vpack.c.bf16 %v908_v27, %v897_v23  ;;  %v4276_v36 = vpack.c.bf16 %v1082_v29, %v1071_v28  ;;  %v4282_v55 = vpack.c.bf16 %v1103_v50, %v1092_v49  ;;  %v1039_v23 = vld [vmem:[#allocation9 + $0x8a8] sm:$0xff]  ;;  %v1050_v28 = vld [vmem:[#allocation9 + $0x900] sm:$0xff]  ;;  %v1061_v29 = vld [vmem:[#allocation9 + $0x958] sm:$0xff] }
 0x1ad   :  { %v4476_v18 = vpack.c.bf16 %v952_v51, %v941_v47  ;;  %v4490_v20 = vpack.c.bf16 %v1017_v16, %v1006_v15  ;;  %v458_v47 = vsub.s32 3, %v5788_v60  ;;  %v1114_v49 = vld [vmem:[#allocation9 + $0xb00] sm:$0xff]  ;;  %v1125_v51 = vld [vmem:[#allocation9 + $0xb58] sm:$0xff]  ;;  %v1172_v15 = vld [vmem:[#allocation9 + $0xcd0] sm:$0xff] }
 0x1ae   :  { %v4286_v3 = vpack.c.bf16 %v1125_v51, %v1114_v49  ;;  %v1215_v51 = vld [vmem:[#allocation9 + $0xe28] sm:$0xff] }
 0x1af   :  { %4451 = vmatpush1.bf16.msra.mxu1 %v4450_v42  ;;  %4259 = vmatpush1.bf16.msra.mxu0 %v4258_v45  ;;  %v4470_v42 = vpack.c.bf16 %v907_v32, %v896_v31  ;;  %v4278_v45 = vpack.c.bf16 %v1081_v38, %v1070_v37  ;;  %v1084_v31 = vld [vmem:[#allocation9 + $0xa10] sm:$0xff]  ;;  %v4498_v32 = vpack.c.bf16 %v1061_v29, %v1050_v28  ;;  %v1106_v37 = vld [vmem:[#allocation9 + $0xac0] sm:$0xff]  ;;  %v1183_v28 = vld [vmem:[#allocation9 + $0xd28] sm:$0xff] }
 0x1b0   :  { %4453 = vmatprep.subr.bf16.mxu1 %v4452_v46  ;;  %4261 = vmatprep.subr.bf16.mxu0 %v4260_v48  ;;  %v4472_v46 = vpack.c.bf16 %v930_v39, %v919_v35  ;;  %v4280_v48 = vpack.c.bf16 %v1104_v41, %v1093_v40  ;;  %v1083_v35 = vld [vmem:[#allocation9 + $0xa08] sm:$0xff]  ;;  %v1094_v40 = vld [vmem:[#allocation9 + $0xa60] sm:$0xff]  ;;  %v1105_v41 = vld [vmem:[#allocation9 + $0xab8] sm:$0xff] }
 0x1b1   :  { %v1194_v29 = vld [vmem:[#allocation9 + $0xd80] sm:$0xff] }
 0x1b3   :  { %4455 = vmatpush1.bf16.msra.mxu1 %v4454_v54  ;;  %4263 = vmatpush1.bf16.msra.mxu0 %v4262_v56  ;;  %v4474_v54 = vpack.c.bf16 %v929_v44, %v918_v43  ;;  %v940_v56 = vld [vmem:[#allocation9 + $0x590] sm:$0xff]  ;;  %v4506_v44 = vpack.c.bf16 %v1105_v41, %v1094_v40  ;;  %v1205_v40 = vld [vmem:[#allocation9 + $0xdd8] sm:$0xff] }
 0x1b4   :  { %4457 = vmatprep.subr.bf16.mxu1 %v4456_v57  ;;  %4265 = vmatprep.subr.bf16.mxu0 %v4264_v59  ;;  %v951_v57 = vld [vmem:[#allocation9 + $0x5e8] sm:$0xff]  ;;  %v1128_v43 = vld [vmem:[#allocation9 + $0xb70] sm:$0xff] }
 0x1b5   :  { %v963_v59 = vld [vmem:[#allocation9 + $0x648] sm:$0xff]  ;;  %v4478_v1 = vpack.c.bf16 %v951_v57, %v940_v56  ;;  %v1216_v41 = vld [vmem:[#allocation9 + $0xe30] sm:$0xff] }
 0x1b6   :  { %v4480_v2 = vpack.c.bf16 %v974_v62, %v963_v59  ;;  %v1148_v59 = vld [vmem:[#allocation9 + $0xc10] sm:$0xff]  ;;  %v1139_v62 = vld [vmem:[#allocation9 + $0xbc8] sm:$0xff]  ;;  %v4524_v49 = vpack.c.bf16 %v1216_v41, %v1205_v40 }
 0x1b7   :  { %4459 = vmatpush1.bf16.msra.mxu1 %v4458_v5  ;;  %4267 = vmatpush1.bf16.msra.mxu0 %v4266_v8  ;;  %v985_v5 = vld [vmem:[#allocation9 + $0x6f8] sm:$0xff] }
 0x1b8   :  { %4461 = vmatprep.subr.bf16.mxu1 %v4460_v9  ;;  %4269 = vmatprep.subr.bf16.mxu0 %v4268_v11  ;;  %v4484_v8 = vpack.c.bf16 %v996_v6, %v985_v5  ;;  %v984_v9 = vld [vmem:[#allocation9 + $0x6f0] sm:$0xff]  ;;  %v1007_v11 = vld [vmem:[#allocation9 + $0x7a8] sm:$0xff] }
 0x1b9   :  { %v4486_v13 = vpack.c.bf16 %v995_v10, %v984_v9  ;;  %v4488_v14 = vpack.c.bf16 %v1018_v12, %v1007_v11  ;;  %v1136_v5 = vld [vmem:[#allocation9 + $0xbb0] sm:$0xff]  ;;  %v1147_v6 = vld [vmem:[#allocation9 + $0xc08] sm:$0xff]  ;;  %v1149_v9 = vld [vmem:[#allocation9 + $0xc18] sm:$0xff] }
 0x1ba   :  { %v1159_v10 = vld [vmem:[#allocation9 + $0xc68] sm:$0xff] }
 0x1bb   :  { %4463 = vmatpush1.bf16.msra.mxu1 %v4462_v17  ;;  %4271 = vmatpush1.bf16.msra.mxu0 %v4270_v21  ;;  %v1029_v17 = vld [vmem:[#allocation9 + $0x858] sm:$0xff] }
 0x1bc   :  { %4465 = vmatprep.subr.bf16.mxu1 %v4464_v22  ;;  %4273 = vmatprep.subr.bf16.mxu0 %v4272_v24  ;;  %v4492_v21 = vpack.c.bf16 %v1040_v19, %v1029_v17  ;;  %v1028_v22 = vld [vmem:[#allocation9 + $0x850] sm:$0xff]  ;;  %v1051_v24 = vld [vmem:[#allocation9 + $0x908] sm:$0xff]  ;;  %v4290_v17 = vpack.c.bf16 %v1147_v6, %v1136_v5  ;;  %v1258_v6 = vld [vmem:[#allocation9 + $0xf80] sm:$0xff] }
 0x1bd   :  { %v4494_v26 = vpack.c.bf16 %v1039_v23, %v1028_v22  ;;  %v4496_v27 = vpack.c.bf16 %v1062_v25, %v1051_v24  ;;  %v1160_v24 = vld [vmem:[#allocation9 + $0xc70] sm:$0xff]  ;;  %v1171_v25 = vld [vmem:[#allocation9 + $0xcc8] sm:$0xff] }
 0x1be   :  { %v1247_v5 = vld [vmem:[#allocation9 + $0xf28] sm:$0xff] }
 0x1bf   :  { %4467 = vmatpush1.bf16.msra.mxu1 %v4466_v30  ;;  %4275 = vmatpush1.bf16.msra.mxu0 %v4274_v33  ;;  %v1073_v30 = vld [vmem:[#allocation9 + $0x9b8] sm:$0xff] }
 0x1c0   :  { %4469 = vmatprep.subr.bf16.mxu1 %v4468_v34  ;;  %4277 = vmatprep.subr.bf16.mxu0 %v4276_v36  ;;  %v4500_v33 = vpack.c.bf16 %v1084_v31, %v1073_v30  ;;  %v1072_v34 = vld [vmem:[#allocation9 + $0x9b0] sm:$0xff]  ;;  %v1095_v36 = vld [vmem:[#allocation9 + $0xa68] sm:$0xff]  ;;  %v4518_v31 = vpack.c.bf16 %v1171_v25, %v1160_v24 }
 0x1c1   :  { %v4502_v38 = vpack.c.bf16 %v1083_v35, %v1072_v34  ;;  %v4504_v39 = vpack.c.bf16 %v1106_v37, %v1095_v36  ;;  %v4520_v35 = vpack.c.bf16 %v1194_v29, %v1183_v28  ;;  %v1182_v36 = vld [vmem:[#allocation9 + $0xd20] sm:$0xff]  ;;  %v1193_v37 = vld [vmem:[#allocation9 + $0xd78] sm:$0xff] }
 0x1c3   :  { %4471 = vmatpush1.bf16.msra.mxu1 %v4470_v42  ;;  %4279 = vmatpush1.bf16.msra.mxu0 %v4278_v45  ;;  %v1117_v42 = vld [vmem:[#allocation9 + $0xb18] sm:$0xff] }
 0x1c4   :  { %4473 = vmatprep.subr.bf16.mxu1 %v4472_v46  ;;  %4281 = vmatprep.subr.bf16.mxu0 %v4280_v48  ;;  %v4508_v45 = vpack.c.bf16 %v1128_v43, %v1117_v42  ;;  %v5804_v46 = vld [vmem:[#allocation7] sm:$0xff]  ;;  %v4522_v43 = vpack.c.bf16 %v1193_v37, %v1182_v36 }
 0x1c5   :  { %v451_v48 = vrot.slane %v5804_v46, %v5791_v61  ;;  %v447_v50 = vrot.slane %v5804_v46, %v5794_v63  ;;  %v459_v57 = vrot.slane %v5804_v46, %v458_v47 }
 0x1c7   :  { %4475 = vmatpush1.bf16.msra.mxu1 %v4474_v54  ;;  %4283 = vmatpush1.bf16.msra.mxu0 %v4282_v55 }
 0x1c8   :  { %4477 = vmatprep.subr.bf16.mxu1 %v4476_v18  ;;  %4285 = vmatprep.subr.bf16.mxu0 %v4284_v58  ;;  %v1137_v18 = vld [vmem:[#allocation9 + $0xbb8] sm:$0xff] }
 0x1c9   :  { %v4288_v11 = vpack.c.bf16 %v1148_v59, %v1137_v18  ;;  %v1238_v18 = vld [vmem:[#allocation9 + $0xee0] sm:$0xff]  ;;  %v1235_v59 = vld [vmem:[#allocation9 + $0xec8] sm:$0xff] }
 0x1cb   :  { %4479 = vmatpush1.bf16.msra.mxu1 %v4478_v1  ;;  %v1150_v1 = vld [vmem:[#allocation9 + $0xc20] sm:$0xff] }
 0x1cc   :  { %4481 = vmatprep.subr.bf16.mxu1 %v4480_v2  ;;  %v4512_v12 = vpack.c.bf16 %v1150_v1, %v1139_v62  ;;  %v4304_v62 = vpack.c.bf16 %v1236_v53, %v1225_v52 }
 0x1cf   :  { %4483 = vmatpush1.bf16.msra.mxu1 %v4482_v7 }
 0x1d0   :  { %4485 = vmatprep.subr.bf16.mxu1 %v4484_v8  ;;  %v1138_v8 = vld [vmem:[#allocation9 + $0xbc0] sm:$0xff] }
 0x1d1   :  { %v4514_v19 = vpack.c.bf16 %v1149_v9, %v1138_v8  ;;  %v1249_v8 = vld [vmem:[#allocation9 + $0xf38] sm:$0xff]  ;;  %v1260_v9 = vld [vmem:[#allocation9 + $0xf90] sm:$0xff] }
 0x1d3   :  { %4487 = vmatpush1.bf16.msra.mxu1 %v4486_v13  ;;  %v1170_v13 = vld [vmem:[#allocation9 + $0xcc0] sm:$0xff] }
 0x1d4   :  { %4489 = vmatprep.subr.bf16.mxu1 %v4488_v14  ;;  %v1161_v14 = vld [vmem:[#allocation9 + $0xc78] sm:$0xff]  ;;  %v4292_v22 = vpack.c.bf16 %v1170_v13, %v1159_v10 }
 0x1d5   :  { %v4516_v23 = vpack.c.bf16 %v1172_v15, %v1161_v14  ;;  %v1257_v13 = vld [vmem:[#allocation9 + $0xf78] sm:$0xff]  ;;  %v4308_v14 = vpack.c.bf16 %v1258_v6, %v1247_v5  ;;  %v4532_v15 = vpack.c.bf16 %v1260_v9, %v1249_v8  ;;  %v1348_v5 = vld [vmem:[#allocation9 + $0x1250] sm:$0xff]  ;;  %v1334_v9 = vld [vmem:[#allocation9 + $0x11e0] sm:$0xff] }
 0x1d7   :  { %4491 = vmatpush1.bf16.msra.mxu1 %v4490_v20  ;;  %v1158_v20 = vld [vmem:[#allocation9 + $0xc60] sm:$0xff] }
 0x1d8   :  { %4493 = vmatprep.subr.bf16.mxu1 %v4492_v21  ;;  %v1169_v21 = vld [vmem:[#allocation9 + $0xcb8] sm:$0xff] }
 0x1d9   :  { %v4294_v30 = vpack.c.bf16 %v1169_v21, %v1158_v20  ;;  %v1269_v20 = vld [vmem:[#allocation9 + $0xfd8] sm:$0xff]  ;;  %v1280_v21 = vld [vmem:[#allocation9 + $0x1030] sm:$0xff] }
 0x1da   :  { %v4312_v28 = vpack.c.bf16 %v1280_v21, %v1269_v20  ;;  %v1370_v20 = vld [vmem:[#allocation9 + $0x1300] sm:$0xff] }
 0x1db   :  { %4495 = vmatpush1.bf16.msra.mxu1 %v4494_v26  ;;  %v1181_v26 = vld [vmem:[#allocation9 + $0xd18] sm:$0xff] }
 0x1dc   :  { %4497 = vmatprep.subr.bf16.mxu1 %v4496_v27  ;;  %v1192_v27 = vld [vmem:[#allocation9 + $0xd70] sm:$0xff] }
 0x1dd   :  { %v4296_v34 = vpack.c.bf16 %v1192_v27, %v1181_v26  ;;  %v1268_v26 = vld [vmem:[#allocation9 + $0xfd0] sm:$0xff]  ;;  %v1279_v27 = vld [vmem:[#allocation9 + $0x1028] sm:$0xff] }
 0x1de   :  { %v4314_v36 = vpack.c.bf16 %v1279_v27, %v1268_v26  ;;  %v1358_v27 = vld [vmem:[#allocation9 + $0x12a0] sm:$0xff] }
 0x1df   :  { %4499 = vmatpush1.bf16.msra.mxu1 %v4498_v32  ;;  %v1180_v32 = vld [vmem:[#allocation9 + $0xd10] sm:$0xff] }
 0x1e0   :  { %4501 = vmatprep.subr.bf16.mxu1 %v4500_v33  ;;  %v1191_v33 = vld [vmem:[#allocation9 + $0xd68] sm:$0xff] }
 0x1e1   :  { %v4298_v42 = vpack.c.bf16 %v1191_v33, %v1180_v32  ;;  %v1291_v32 = vld [vmem:[#allocation9 + $0x1088] sm:$0xff]  ;;  %v1302_v33 = vld [vmem:[#allocation9 + $0x10e0] sm:$0xff] }
 0x1e2   :  { %v4316_v40 = vpack.c.bf16 %v1302_v33, %v1291_v32  ;;  %v1392_v32 = vld [vmem:[#allocation9 + $0x13b0] sm:$0xff] }
 0x1e3   :  { %4503 = vmatpush1.bf16.msra.mxu1 %v4502_v38  ;;  %v1203_v38 = vld [vmem:[#allocation9 + $0xdc8] sm:$0xff] }
 0x1e4   :  { %4505 = vmatprep.subr.bf16.mxu1 %v4504_v39  ;;  %v1214_v39 = vld [vmem:[#allocation9 + $0xe20] sm:$0xff] }
 0x1e7   :  { %4507 = vmatpush1.bf16.msra.mxu1 %v4506_v44  ;;  %v1202_v44 = vld [vmem:[#allocation9 + $0xdc0] sm:$0xff] }
 0x1e8   :  { %4509 = vmatprep.subr.bf16.mxu1 %v4508_v45  ;;  %v1213_v45 = vld [vmem:[#allocation9 + $0xe18] sm:$0xff] }
 0x23d   :  { %v545_v54 = vpop.f32.mrb[2].mxu1  ;;  %v5811_v55 = vpop.f32.mrb[0].mxu0 }
 0x23e   :  { %v547_v56 = vpop.f32.mrb[3].mxu1  ;;  %v618_v58 = vpop.f32.mrb[1].mxu0  ;;  %v5818_v7 = vadd.f32 %v545_v54, %v447_v50  ;;  %v1204_v50 = vld [vmem:[#allocation9 + $0xdd0] sm:$0xff]  ;;  %v1227_v54 = vld [vmem:[#allocation9 + $0xe88] sm:$0xff] }
 0x23f   :  { %v5816_v2 = vadd.f32 %v547_v56, %v451_v48  ;;  %v5822_v16 = vadd.f32 %v618_v58, %v459_v57  ;;  %v4300_v48 = vpack.c.bf16 %v1214_v39, %v1203_v38  ;;  %v4302_v56 = vpack.c.bf16 %v1213_v45, %v1202_v44  ;;  %v1224_v58 = vld [vmem:[#allocation9 + $0xe70] sm:$0xff]  ;;  %v1290_v38 = vld [vmem:[#allocation9 + $0x1080] sm:$0xff]  ;;  %v1301_v39 = vld [vmem:[#allocation9 + $0x10d8] sm:$0xff] }
 0x240   :  { %v4526_v57 = vpack.c.bf16 %v1215_v51, %v1204_v50  ;;  %v4528_v1 = vpack.c.bf16 %v1238_v18, %v1227_v54  ;;  %v4306_v10 = vpack.c.bf16 %v1235_v59, %v1224_v58  ;;  %v1313_v44 = vld [vmem:[#allocation9 + $0x1138] sm:$0xff]  ;;  %v1326_v50 = vld [vmem:[#allocation9 + $0x11a0] sm:$0xff]  ;;  %v4318_v53 = vpack.c.bf16 %v1301_v39, %v1290_v38  ;;  %v1312_v18 = vld [vmem:[#allocation9 + $0x1130] sm:$0xff] }
 0x241   :  { %2117 = vmatprep.mubr.f32.mxu0 %v5816_v2  ;;  %2401 = vmatprep.mubr.f32.mxu1 %v5816_v2  ;;  %v1314_v59 = vld [vmem:[#allocation9 + $0x1140] sm:$0xff]  ;;  %v1380_v39 = vld [vmem:[#allocation9 + $0x1350] sm:$0xff] }
 0x242   :  { %2118 = vmatmul.mubr.f32.vlgmr.msra.gmra.mrb[4].mxu0 %v5818_v7  ;;  %2402 = vmatmul.mubr.f32.vlgmr.msra.gmra.mrb[6].mxu1 %v5818_v7 }
 0x243   :  { %4287 = vmatpush1.bf16.msra.mxu0 %v4286_v3  ;;  %4511 = vmatpush1.bf16.msra.mxu1 %v4510_v4  ;;  %v1226_v3 = vld [vmem:[#allocation9 + $0xe80] sm:$0xff]  ;;  %v1237_v4 = vld [vmem:[#allocation9 + $0xed8] sm:$0xff] }
 0x244   :  { %2188 = vmatprep.mubr.f32.mxu0 %v5822_v16  ;;  %2472 = vmatprep.mubr.f32.mxu1 %v5822_v16 }
 0x245   :  { %4289 = vmatprep.subr.bf16.mxu0 %v4288_v11  ;;  %4513 = vmatprep.subr.bf16.mxu1 %v4512_v12  ;;  %v4530_v11 = vpack.c.bf16 %v1237_v4, %v1226_v3  ;;  %v1246_v12 = vld [vmem:[#allocation9 + $0xf20] sm:$0xff]  ;;  %v1337_v4 = vld [vmem:[#allocation9 + $0x11f8] sm:$0xff] }
 0x246   :  { %v4310_v24 = vpack.c.bf16 %v1257_v13, %v1246_v12  ;;  %v1346_v3 = vld [vmem:[#allocation9 + $0x1240] sm:$0xff]  ;;  %v4548_v12 = vpack.c.bf16 %v1348_v5, %v1337_v4  ;;  %v1336_v13 = vld [vmem:[#allocation9 + $0x11f0] sm:$0xff]  ;;  %v1433_v4 = vld [vmem:[#allocation9 + $0x14f8] sm:$0xff] }
 0x247   :  { %4291 = vmatpush1.bf16.msra.mxu0 %v4290_v17  ;;  %4515 = vmatpush1.bf16.msra.mxu1 %v4514_v19  ;;  %v1248_v17 = vld [vmem:[#allocation9 + $0xf30] sm:$0xff]  ;;  %v1259_v19 = vld [vmem:[#allocation9 + $0xf88] sm:$0xff] }
 0x248   :  { %4293 = vmatprep.subr.bf16.mxu0 %v4292_v22  ;;  %4517 = vmatprep.subr.bf16.mxu1 %v4516_v23  ;;  %v1271_v22 = vld [vmem:[#allocation9 + $0xfe8] sm:$0xff]  ;;  %v1282_v23 = vld [vmem:[#allocation9 + $0x1040] sm:$0xff]  ;;  %v4534_v25 = vpack.c.bf16 %v1259_v19, %v1248_v17  ;;  %v1368_v17 = vld [vmem:[#allocation9 + $0x12f0] sm:$0xff] }
 0x249   :  { %v4536_v29 = vpack.c.bf16 %v1282_v23, %v1271_v22  ;;  %v1359_v19 = vld [vmem:[#allocation9 + $0x12a8] sm:$0xff]  ;;  %v1356_v23 = vld [vmem:[#allocation9 + $0x1290] sm:$0xff] }
 0x24a   :  { %v4552_v26 = vpack.c.bf16 %v1370_v20, %v1359_v19  ;;  %v1455_v19 = vld [vmem:[#allocation9 + $0x15a8] sm:$0xff]  ;;  %v5831_v20 = vsub.s32 2, %v5788_v60 }
 0x24b   :  { %4295 = vmatpush1.bf16.msra.mxu0 %v4294_v30  ;;  %4519 = vmatpush1.bf16.msra.mxu1 %v4518_v31  ;;  %v1270_v30 = vld [vmem:[#allocation9 + $0xfe0] sm:$0xff]  ;;  %v1281_v31 = vld [vmem:[#allocation9 + $0x1038] sm:$0xff] }
 0x24c   :  { %4297 = vmatprep.subr.bf16.mxu0 %v4296_v34  ;;  %4521 = vmatprep.subr.bf16.mxu1 %v4520_v35  ;;  %v1293_v34 = vld [vmem:[#allocation9 + $0x1098] sm:$0xff]  ;;  %v1304_v35 = vld [vmem:[#allocation9 + $0x10f0] sm:$0xff]  ;;  %v4538_v37 = vpack.c.bf16 %v1281_v31, %v1270_v30  ;;  %v1390_v30 = vld [vmem:[#allocation9 + $0x13a0] sm:$0xff] }
 0x24d   :  { %v4540_v41 = vpack.c.bf16 %v1304_v35, %v1293_v34  ;;  %v1381_v31 = vld [vmem:[#allocation9 + $0x1358] sm:$0xff]  ;;  %v1378_v35 = vld [vmem:[#allocation9 + $0x1340] sm:$0xff] }
 0x24e   :  { %v4556_v38 = vpack.c.bf16 %v1392_v32, %v1381_v31  ;;  %v455_v32 = vrot.slane %v5804_v46, %v5831_v20 }
 0x24f   :  { %4299 = vmatpush1.bf16.msra.mxu0 %v4298_v42  ;;  %4523 = vmatpush1.bf16.msra.mxu1 %v4522_v43  ;;  %v1292_v42 = vld [vmem:[#allocation9 + $0x1090] sm:$0xff]  ;;  %v1303_v43 = vld [vmem:[#allocation9 + $0x10e8] sm:$0xff] }
 0x250   :  { %4301 = vmatprep.subr.bf16.mxu0 %v4300_v48  ;;  %4525 = vmatprep.subr.bf16.mxu1 %v4524_v49  ;;  %v1324_v48 = vld [vmem:[#allocation9 + $0x1190] sm:$0xff]  ;;  %v1315_v49 = vld [vmem:[#allocation9 + $0x1148] sm:$0xff]  ;;  %v4542_v54 = vpack.c.bf16 %v1303_v43, %v1292_v42 }
 0x251   :  { %v4544_v58 = vpack.c.bf16 %v1326_v50, %v1315_v49  ;;  %v1412_v42 = vld [vmem:[#allocation9 + $0x1450] sm:$0xff]  ;;  %v1403_v43 = vld [vmem:[#allocation9 + $0x1408] sm:$0xff] }
 0x252   :  { %v1400_v49 = vld [vmem:[#allocation9 + $0x13f0] sm:$0xff]  ;;  %v1411_v50 = vld [vmem:[#allocation9 + $0x1448] sm:$0xff] }
 0x253   :  { %4303 = vmatpush1.bf16.msra.mxu0 %v4302_v56  ;;  %4527 = vmatpush1.bf16.msra.mxu1 %v4526_v57  ;;  %v1323_v56 = vld [vmem:[#allocation9 + $0x1188] sm:$0xff]  ;;  %v4320_v57 = vpack.c.bf16 %v1324_v48, %v1313_v44  ;;  %v1414_v44 = vld [vmem:[#allocation9 + $0x1460] sm:$0xff] }
 0x254   :  { %4305 = vmatprep.subr.bf16.mxu0 %v4304_v62  ;;  %4529 = vmatprep.subr.bf16.mxu1 %v4528_v1  ;;  %v1325_v62 = vld [vmem:[#allocation9 + $0x1198] sm:$0xff]  ;;  %v1335_v1 = vld [vmem:[#allocation9 + $0x11e8] sm:$0xff]  ;;  %v4322_v6 = vpack.c.bf16 %v1323_v56, %v1312_v18 }
 0x255   :  { %v4546_v8 = vpack.c.bf16 %v1325_v62, %v1314_v59  ;;  %v1413_v18 = vld [vmem:[#allocation9 + $0x1458] sm:$0xff]  ;;  %v1423_v56 = vld [vmem:[#allocation9 + $0x14a8] sm:$0xff]  ;;  %v1436_v59 = vld [vmem:[#allocation9 + $0x1510] sm:$0xff]  ;;  %v4338_v62 = vpack.c.bf16 %v1411_v50, %v1400_v49  ;;  %v5842_v49 = vadd.f32 %v5811_v55, %v455_v32 }
 0x256   :  { %v1524_v55 = vld [vmem:[#allocation9 + $0x17d0] sm:$0xff] }
 0x257   :  { %4307 = vmatpush1.bf16.msra.mxu0 %v4306_v10  ;;  %4531 = vmatpush1.bf16.msra.mxu1 %v4530_v11  ;;  %v1345_v10 = vld [vmem:[#allocation9 + $0x1238] sm:$0xff]  ;;  %v4324_v11 = vpack.c.bf16 %v1346_v3, %v1335_v1  ;;  %v1422_v3 = vld [vmem:[#allocation9 + $0x14a0] sm:$0xff] }
 0x258   :  { %4309 = vmatprep.subr.bf16.mxu0 %v4308_v14  ;;  %4533 = vmatprep.subr.bf16.mxu1 %v4532_v15  ;;  %v1347_v14 = vld [vmem:[#allocation9 + $0x1248] sm:$0xff]  ;;  %v1357_v15 = vld [vmem:[#allocation9 + $0x1298] sm:$0xff]  ;;  %v4326_v21 = vpack.c.bf16 %v1345_v10, %v1334_v9 }
 0x259   :  { %v4550_v22 = vpack.c.bf16 %v1347_v14, %v1336_v13  ;;  %v1435_v9 = vld [vmem:[#allocation9 + $0x1508] sm:$0xff]  ;;  %v1445_v10 = vld [vmem:[#allocation9 + $0x1558] sm:$0xff]  ;;  %v1458_v13 = vld [vmem:[#allocation9 + $0x15c0] sm:$0xff]  ;;  %v4342_v14 = vpack.c.bf16 %v1433_v4, %v1422_v3 }
 0x25b   :  { %4311 = vmatpush1.bf16.msra.mxu0 %v4310_v24  ;;  %4535 = vmatpush1.bf16.msra.mxu1 %v4534_v25  ;;  %v1367_v24 = vld [vmem:[#allocation9 + $0x12e8] sm:$0xff]  ;;  %v4328_v25 = vpack.c.bf16 %v1368_v17, %v1357_v15  ;;  %v1444_v17 = vld [vmem:[#allocation9 + $0x1550] sm:$0xff] }
 0x25c   :  { %4313 = vmatprep.subr.bf16.mxu0 %v4312_v28  ;;  %4537 = vmatprep.subr.bf16.mxu1 %v4536_v29  ;;  %v1369_v28 = vld [vmem:[#allocation9 + $0x12f8] sm:$0xff]  ;;  %v1379_v29 = vld [vmem:[#allocation9 + $0x1348] sm:$0xff]  ;;  %v4330_v33 = vpack.c.bf16 %v1367_v24, %v1356_v23  ;;  %v1446_v23 = vld [vmem:[#allocation9 + $0x1560] sm:$0xff] }
 0x25d   :  { %v3804_v45 = vpop.f32.mrb[2].mxu0  ;;  %v4554_v34 = vpack.c.bf16 %v1369_v28, %v1358_v27  ;;  %v1457_v24 = vld [vmem:[#allocation9 + $0x15b8] sm:$0xff]  ;;  %v1478_v27 = vld [vmem:[#allocation9 + $0x1660] sm:$0xff] }
 0x25e   :  { %v3805_v51 = vpop.f32.mrb[3].mxu0  ;;  %v1469_v28 = vld [vmem:[#allocation9 + $0x1618] sm:$0xff]  ;;  %v4570_v31 = vpack.c.bf16 %v1457_v24, %v1446_v23  ;;  %v1534_v23 = vld [vmem:[#allocation9 + $0x1820] sm:$0xff] }
 0x25f   :  { %v5828_v52 = vadd.f32 %v3805_v51, %v3804_v45  ;;  %4315 = vmatpush1.bf16.msra.mxu0 %v4314_v36  ;;  %4539 = vmatpush1.bf16.msra.mxu1 %v4538_v37  ;;  %v1389_v36 = vld [vmem:[#allocation9 + $0x1398] sm:$0xff]  ;;  %v4332_v37 = vpack.c.bf16 %v1390_v30, %v1379_v29  ;;  %v1480_v29 = vld [vmem:[#allocation9 + $0x1670] sm:$0xff]  ;;  %v4346_v30 = vpack.c.bf16 %v1455_v19, %v1444_v17 }
 0x260   :  { %4317 = vmatprep.subr.bf16.mxu0 %v4316_v40  ;;  %4541 = vmatprep.subr.bf16.mxu1 %v4540_v41  ;;  %v1391_v40 = vld [vmem:[#allocation9 + $0x13a8] sm:$0xff]  ;;  %v1401_v41 = vld [vmem:[#allocation9 + $0x13f8] sm:$0xff]  ;;  %v4334_v45 = vpack.c.bf16 %v1389_v36, %v1378_v35  ;;  %v1466_v35 = vld [vmem:[#allocation9 + $0x1600] sm:$0xff] }
 0x261   :  { %v4558_v48 = vpack.c.bf16 %v1391_v40, %v1380_v39  ;;  %v4336_v51 = vpack.c.bf16 %v1412_v42, %v1401_v41  ;;  %v1477_v36 = vld [vmem:[#allocation9 + $0x1658] sm:$0xff]  ;;  %v1468_v39 = vld [vmem:[#allocation9 + $0x1610] sm:$0xff]  ;;  %v1479_v40 = vld [vmem:[#allocation9 + $0x1668] sm:$0xff] }
 0x262   :  { %v1489_v41 = vld [vmem:[#allocation9 + $0x16b8] sm:$0xff]  ;;  %v4574_v50 = vpack.c.bf16 %v1479_v40, %v1468_v39  ;;  %v1567_v39 = vld [vmem:[#allocation9 + $0x1928] sm:$0xff] }
 0x263   :  { %4319 = vmatpush1.bf16.msra.mxu0 %v4318_v53  ;;  %4543 = vmatpush1.bf16.msra.mxu1 %v4542_v54  ;;  %v4560_v53 = vpack.c.bf16 %v1414_v44, %v1403_v43  ;;  %v1402_v54 = vld [vmem:[#allocation9 + $0x1400] sm:$0xff]  ;;  %v1500_v43 = vld [vmem:[#allocation9 + $0x1710] sm:$0xff]  ;;  %v1491_v44 = vld [vmem:[#allocation9 + $0x16c8] sm:$0xff] }
 0x264   :  { %4321 = vmatprep.subr.bf16.mxu0 %v4320_v57  ;;  %4545 = vmatprep.subr.bf16.mxu1 %v4544_v58  ;;  %v1434_v57 = vld [vmem:[#allocation9 + $0x1500] sm:$0xff]  ;;  %v1425_v58 = vld [vmem:[#allocation9 + $0x14b8] sm:$0xff]  ;;  %v4562_v1 = vpack.c.bf16 %v1413_v18, %v1402_v54  ;;  %v4352_v18 = vpack.c.bf16 %v1500_v43, %v1489_v41  ;;  %v1588_v41 = vld [vmem:[#allocation9 + $0x19d0] sm:$0xff] }
 0x265   :  { %v4340_v5 = vpack.c.bf16 %v1434_v57, %v1423_v56  ;;  %v1490_v54 = vld [vmem:[#allocation9 + $0x16c0] sm:$0xff]  ;;  %v1501_v57 = vld [vmem:[#allocation9 + $0x1718] sm:$0xff] }
 0x266   :  { %v4578_v3 = vpack.c.bf16 %v1501_v57, %v1490_v54  ;;  %v1577_v40 = vld [vmem:[#allocation9 + $0x1978] sm:$0xff]  ;;  %v1590_v43 = vld [vmem:[#allocation9 + $0x19e0] sm:$0xff] }
 0x267   :  { %4323 = vmatpush1.bf16.msra.mxu0 %v4322_v6  ;;  %4547 = vmatpush1.bf16.msra.mxu1 %v4546_v8  ;;  %v4564_v6 = vpack.c.bf16 %v1436_v59, %v1425_v58  ;;  %v1424_v8 = vld [vmem:[#allocation9 + $0x14b0] sm:$0xff]  ;;  %v1511_v58 = vld [vmem:[#allocation9 + $0x1768] sm:$0xff]  ;;  %v1522_v59 = vld [vmem:[#allocation9 + $0x17c0] sm:$0xff] }
 0x268   :  { %4325 = vmatprep.subr.bf16.mxu0 %v4324_v11  ;;  %4549 = vmatprep.subr.bf16.mxu1 %v4548_v12  ;;  %v1456_v11 = vld [vmem:[#allocation9 + $0x15b0] sm:$0xff]  ;;  %v1447_v12 = vld [vmem:[#allocation9 + $0x1568] sm:$0xff]  ;;  %v4566_v15 = vpack.c.bf16 %v1435_v9, %v1424_v8  ;;  %v4356_v4 = vpack.c.bf16 %v1522_v59, %v1511_v58  ;;  %v1610_v57 = vld [vmem:[#allocation9 + $0x1a80] sm:$0xff] }
 0x269   :  { %v1512_v8 = vld [vmem:[#allocation9 + $0x1770] sm:$0xff]  ;;  %v1601_v58 = vld [vmem:[#allocation9 + $0x1a38] sm:$0xff] }
 0x26a   :  { %v1612_v59 = vld [vmem:[#allocation9 + $0x1a90] sm:$0xff] }
 0x26b   :  { %4327 = vmatpush1.bf16.msra.mxu0 %v4326_v21  ;;  %4551 = vmatpush1.bf16.msra.mxu1 %v4550_v22  ;;  %v4344_v21 = vpack.c.bf16 %v1456_v11, %v1445_v10  ;;  %v4568_v22 = vpack.c.bf16 %v1458_v13, %v1447_v12  ;;  %v1523_v10 = vld [vmem:[#allocation9 + $0x17c8] sm:$0xff]  ;;  %v1533_v11 = vld [vmem:[#allocation9 + $0x1818] sm:$0xff]  ;;  %v1544_v12 = vld [vmem:[#allocation9 + $0x1870] sm:$0xff] }
 0x26c   :  { %4329 = vmatprep.subr.bf16.mxu0 %v4328_v25  ;;  %4553 = vmatprep.subr.bf16.mxu1 %v4552_v26  ;;  %v1467_v25 = vld [vmem:[#allocation9 + $0x1608] sm:$0xff]  ;;  %v466_v26 = vsub.s32 5, %v5788_v60  ;;  %v4582_v17 = vpack.c.bf16 %v1523_v10, %v1512_v8  ;;  %v4360_v19 = vpack.c.bf16 %v1544_v12, %v1533_v11  ;;  %v1632_v10 = vld [vmem:[#allocation9 + $0x1b30] sm:$0xff]  ;;  %v1634_v12 = vld [vmem:[#allocation9 + $0x1b40] sm:$0xff] }
 0x26d   :  { %v1535_v13 = vld [vmem:[#allocation9 + $0x1828] sm:$0xff] }
 0x26e   :  { %v1611_v8 = vld [vmem:[#allocation9 + $0x1a88] sm:$0xff] }
 0x26f   :  { %4331 = vmatpush1.bf16.msra.mxu0 %v4330_v33  ;;  %4555 = vmatpush1.bf16.msra.mxu1 %v4554_v34  ;;  %v4348_v33 = vpack.c.bf16 %v1478_v27, %v1467_v25  ;;  %v4572_v34 = vpack.c.bf16 %v1480_v29, %v1469_v28  ;;  %v1545_v25 = vld [vmem:[#allocation9 + $0x1878] sm:$0xff]  ;;  %v1555_v27 = vld [vmem:[#allocation9 + $0x18c8] sm:$0xff]  ;;  %v1566_v28 = vld [vmem:[#allocation9 + $0x1920] sm:$0xff] }
 0x270   :  { %4333 = vmatprep.subr.bf16.mxu0 %v4332_v37  ;;  %4557 = vmatprep.subr.bf16.mxu1 %v4556_v38  ;;  %v467_v38 = vrot.slane %v5804_v46, %v466_v26  ;;  %v1557_v29 = vld [vmem:[#allocation9 + $0x18d8] sm:$0xff]  ;;  %v4586_v32 = vpack.c.bf16 %v1545_v25, %v1534_v23  ;;  %v1623_v11 = vld [vmem:[#allocation9 + $0x1ae8] sm:$0xff]  ;;  %v1654_v25 = vld [vmem:[#allocation9 + $0x1be0] sm:$0xff] }
 0x271   :  { %v1633_v23 = vld [vmem:[#allocation9 + $0x1b38] sm:$0xff] }
 0x273   :  { %4335 = vmatpush1.bf16.msra.mxu0 %v4334_v45  ;;  %4559 = vmatpush1.bf16.msra.mxu1 %v4558_v48  ;;  %v1502_v45 = vld [vmem:[#allocation9 + $0x1720] sm:$0xff]  ;;  %v4350_v48 = vpack.c.bf16 %v1477_v36, %v1466_v35  ;;  %v1565_v35 = vld [vmem:[#allocation9 + $0x1918] sm:$0xff]  ;;  %v1556_v36 = vld [vmem:[#allocation9 + $0x18d0] sm:$0xff] }
 0x274   :  { %4337 = vmatprep.subr.bf16.mxu0 %v4336_v51  ;;  %4561 = vmatprep.subr.bf16.mxu1 %v4560_v53  ;;  %v1488_v51 = vld [vmem:[#allocation9 + $0x16b0] sm:$0xff]  ;;  %v1499_v53 = vld [vmem:[#allocation9 + $0x1708] sm:$0xff]  ;;  %v4576_v56 = vpack.c.bf16 %v1502_v45, %v1491_v44  ;;  %v4590_v45 = vpack.c.bf16 %v1567_v39, %v1556_v36 }
 0x275   :  { %v1655_v36 = vld [vmem:[#allocation9 + $0x1be8] sm:$0xff]  ;;  %v1676_v39 = vld [vmem:[#allocation9 + $0x1c90] sm:$0xff] }
 0x277   :  { %4339 = vmatpush1.bf16.msra.mxu0 %v4338_v62  ;;  %4563 = vmatpush1.bf16.msra.mxu1 %v4562_v1  ;;  %v1513_v62 = vld [vmem:[#allocation9 + $0x1778] sm:$0xff]  ;;  %v4354_v1 = vpack.c.bf16 %v1499_v53, %v1488_v51  ;;  %v1587_v51 = vld [vmem:[#allocation9 + $0x19c8] sm:$0xff]  ;;  %v1578_v53 = vld [vmem:[#allocation9 + $0x1980] sm:$0xff] }
 0x278   :  { %4341 = vmatprep.subr.bf16.mxu0 %v4340_v5  ;;  %4565 = vmatprep.subr.bf16.mxu1 %v4564_v6  ;;  %v1510_v5 = vld [vmem:[#allocation9 + $0x1760] sm:$0xff]  ;;  %v1521_v6 = vld [vmem:[#allocation9 + $0x17b8] sm:$0xff]  ;;  %v4580_v9 = vpack.c.bf16 %v1524_v55, %v1513_v62 }
 0x27b   :  { %4343 = vmatpush1.bf16.msra.mxu0 %v4342_v14  ;;  %4567 = vmatpush1.bf16.msra.mxu1 %v4566_v15  ;;  %v1546_v14 = vld [vmem:[#allocation9 + $0x1880] sm:$0xff]  ;;  %v4358_v15 = vpack.c.bf16 %v1521_v6, %v1510_v5  ;;  %v1600_v5 = vld [vmem:[#allocation9 + $0x1a30] sm:$0xff]  ;;  %v4596_v6 = vpack.c.bf16 %v1612_v59, %v1601_v58 }
 0x27c   :  { %4345 = vmatprep.subr.bf16.mxu0 %v4344_v21  ;;  %4569 = vmatprep.subr.bf16.mxu1 %v4568_v22  ;;  %v1532_v21 = vld [vmem:[#allocation9 + $0x1810] sm:$0xff]  ;;  %v1543_v22 = vld [vmem:[#allocation9 + $0x1868] sm:$0xff]  ;;  %v4584_v24 = vpack.c.bf16 %v1546_v14, %v1535_v13  ;;  %v4598_v14 = vpack.c.bf16 %v1611_v8, %v1600_v5 }
 0x27d   :  { %v5836_v37 = vpop.f32.mrb[4].mxu1  ;;  %v1699_v5 = vld [vmem:[#allocation9 + $0x1d48] sm:$0xff]  ;;  %v1720_v8 = vld [vmem:[#allocation9 + $0x1df0] sm:$0xff] }
 0x27e   :  { %v689_v42 = vpop.f32.mrb[5].mxu1 }
 0x27f   :  { %4347 = vmatpush1.bf16.msra.mxu0 %v4346_v30  ;;  %4571 = vmatpush1.bf16.msra.mxu1 %v4570_v31  ;;  %v5844_v46 = vadd.f32 %v689_v42, %v467_v38  ;;  %v1568_v30 = vld [vmem:[#allocation9 + $0x1930] sm:$0xff]  ;;  %v4362_v31 = vpack.c.bf16 %v1543_v22, %v1532_v21  ;;  %v1579_v42 = vld [vmem:[#allocation9 + $0x1988] sm:$0xff]  ;;  %v1622_v21 = vld [vmem:[#allocation9 + $0x1ae0] sm:$0xff]  ;;  %v4600_v22 = vpack.c.bf16 %v1634_v12, %v1623_v11 }
 0x280   :  { %4349 = vmatprep.subr.bf16.mxu0 %v4348_v33  ;;  %4573 = vmatprep.subr.bf16.mxu1 %v4572_v34  ;;  %v4364_v33 = vpack.c.bf16 %v1566_v28, %v1555_v27  ;;  %v1554_v34 = vld [vmem:[#allocation9 + $0x18c0] sm:$0xff]  ;;  %v4588_v38 = vpack.c.bf16 %v1568_v30, %v1557_v29  ;;  %v4592_v54 = vpack.c.bf16 %v1590_v43, %v1579_v42  ;;  %v1645_v27 = vld [vmem:[#allocation9 + $0x1b98] sm:$0xff]  ;;  %v1656_v28 = vld [vmem:[#allocation9 + $0x1bf0] sm:$0xff] }
 0x281   :  { %v4366_v44 = vpack.c.bf16 %v1565_v35, %v1554_v34  ;;  %v4602_v30 = vpack.c.bf16 %v1633_v23, %v1622_v21  ;;  %v1644_v34 = vld [vmem:[#allocation9 + $0x1b90] sm:$0xff]  ;;  %v4604_v35 = vpack.c.bf16 %v1656_v28, %v1645_v27  ;;  %v1721_v21 = vld [vmem:[#allocation9 + $0x1df8] sm:$0xff]  ;;  %v1742_v23 = vld [vmem:[#allocation9 + $0x1ea0] sm:$0xff] }
 0x282   :  { %2189 = vmatmul.mubr.f32.vlgmr.msra.gmra.mrb[4].mxu0 %v5842_v49  ;;  %2473 = vmatmul.mubr.f32.vlgmr.msra.gmra.mrb[6].mxu1 %v5842_v49  ;;  %v4606_v43 = vpack.c.bf16 %v1655_v36, %v1644_v34  ;;  %v1743_v34 = vld [vmem:[#allocation9 + $0x1ea8] sm:$0xff]  ;;  %v1764_v36 = vld [vmem:[#allocation9 + $0x1f50] sm:$0xff] }
 0x283   :  { %4351 = vmatpush1.bf16.msra.mxu0 %v4350_v48  ;;  %2259 = vmatprep.mubr.f32.mxu0 %v5844_v46  ;;  %v4368_v48 = vpack.c.bf16 %v1588_v41, %v1577_v40  ;;  %v1667_v40 = vld [vmem:[#allocation9 + $0x1c48] sm:$0xff]  ;;  %v1678_v41 = vld [vmem:[#allocation9 + $0x1ca0] sm:$0xff] }
 0x284   :  { %4575 = vmatpush1.bf16.msra.mxu1 %v4574_v50  ;;  %2543 = vmatprep.mubr.f32.mxu1 %v5844_v46  ;;  %v1576_v50 = vld [vmem:[#allocation9 + $0x1970] sm:$0xff] }
 0x285   :  { %4353 = vmatprep.subr.bf16.mxu0 %v4352_v18  ;;  %4577 = vmatprep.subr.bf16.mxu1 %v4576_v56  ;;  %v1589_v18 = vld [vmem:[#allocation9 + $0x19d8] sm:$0xff]  ;;  %v1599_v56 = vld [vmem:[#allocation9 + $0x1a28] sm:$0xff]  ;;  %v4370_v62 = vpack.c.bf16 %v1587_v51, %v1576_v50  ;;  %v1666_v50 = vld [vmem:[#allocation9 + $0x1c40] sm:$0xff]  ;;  %v4608_v51 = vpack.c.bf16 %v1678_v41, %v1667_v40 }
 0x286   :  { %v4594_v55 = vpack.c.bf16 %v1589_v18, %v1578_v53  ;;  %v1677_v53 = vld [vmem:[#allocation9 + $0x1c98] sm:$0xff]  ;;  %v1698_v18 = vld [vmem:[#allocation9 + $0x1d40] sm:$0xff] }
 0x287   :  { %4355 = vmatpush1.bf16.msra.mxu0 %v4354_v1  ;;  %v4372_v1 = vpack.c.bf16 %v1610_v57, %v1599_v56  ;;  %v1689_v56 = vld [vmem:[#allocation9 + $0x1cf8] sm:$0xff]  ;;  %v1700_v57 = vld [vmem:[#allocation9 + $0x1d50] sm:$0xff]  ;;  %v4610_v59 = vpack.c.bf16 %v1677_v53, %v1666_v50  ;;  %v1786_v53 = vld [vmem:[#allocation9 + $0x2000] sm:$0xff] }
 0x288   :  { %4579 = vmatpush1.bf16.msra.mxu1 %v4578_v3  ;;  %4357 = vmatprep.subr.bf16.mxu0 %v4356_v4  ;;  %v1598_v3 = vld [vmem:[#allocation9 + $0x1a20] sm:$0xff]  ;;  %v1609_v4 = vld [vmem:[#allocation9 + $0x1a78] sm:$0xff] }
 0x289   :  { %4581 = vmatprep.subr.bf16.mxu1 %v4580_v9  ;;  %v1621_v9 = vld [vmem:[#allocation9 + $0x1ad8] sm:$0xff]  ;;  %v4374_v13 = vpack.c.bf16 %v1609_v4, %v1598_v3  ;;  %v1688_v3 = vld [vmem:[#allocation9 + $0x1cf0] sm:$0xff]  ;;  %v4612_v4 = vpack.c.bf16 %v1700_v57, %v1689_v56 }
 0x28a   :  { %v4614_v12 = vpack.c.bf16 %v1699_v5, %v1688_v3  ;;  %v1765_v50 = vld [vmem:[#allocation9 + $0x1f58] sm:$0xff]  ;;  %v1787_v3 = vld [vmem:[#allocation9 + $0x2008] sm:$0xff]  ;;  %v1808_v5 = vld [vmem:[#allocation9 + $0x20b0] sm:$0xff] }
 0x28b   :  { %4359 = vmatpush1.bf16.msra.mxu0 %v4358_v15  ;;  %v4376_v15 = vpack.c.bf16 %v1632_v10, %v1621_v9  ;;  %v1711_v9 = vld [vmem:[#allocation9 + $0x1da8] sm:$0xff]  ;;  %v1722_v10 = vld [vmem:[#allocation9 + $0x1e00] sm:$0xff] }
 0x28c   :  { %4583 = vmatpush1.bf16.msra.mxu1 %v4582_v17  ;;  %4361 = vmatprep.subr.bf16.mxu0 %v4360_v19  ;;  %v1620_v17 = vld [vmem:[#allocation9 + $0x1ad0] sm:$0xff]  ;;  %v1631_v19 = vld [vmem:[#allocation9 + $0x1b28] sm:$0xff] }
 0x28d   :  { %4585 = vmatprep.subr.bf16.mxu1 %v4584_v24  ;;  %v1643_v24 = vld [vmem:[#allocation9 + $0x1b88] sm:$0xff]  ;;  %v4378_v29 = vpack.c.bf16 %v1631_v19, %v1620_v17  ;;  %v1710_v17 = vld [vmem:[#allocation9 + $0x1da0] sm:$0xff]  ;;  %v4616_v19 = vpack.c.bf16 %v1722_v10, %v1711_v9  ;;  %v462_v10 = vsub.s32 4, %v5788_v60 }
 0x28e   :  { %v4618_v28 = vpack.c.bf16 %v1721_v21, %v1710_v17  ;;  %v1819_v21 = vld [vmem:[#allocation9 + $0x2108] sm:$0xff] }
 0x28f   :  { %4363 = vmatpush1.bf16.msra.mxu0 %v4362_v31  ;;  %v4380_v31 = vpack.c.bf16 %v1654_v25, %v1643_v24  ;;  %v1733_v24 = vld [vmem:[#allocation9 + $0x1e58] sm:$0xff]  ;;  %v1744_v25 = vld [vmem:[#allocation9 + $0x1eb0] sm:$0xff] }
 0x290   :  { %4587 = vmatpush1.bf16.msra.mxu1 %v4586_v32  ;;  %4365 = vmatprep.subr.bf16.mxu0 %v4364_v33  ;;  %v1642_v32 = vld [vmem:[#allocation9 + $0x1b80] sm:$0xff]  ;;  %v1653_v33 = vld [vmem:[#allocation9 + $0x1bd8] sm:$0xff] }
 0x291   :  { %4589 = vmatprep.subr.bf16.mxu1 %v4588_v38  ;;  %v1665_v38 = vld [vmem:[#allocation9 + $0x1c38] sm:$0xff]  ;;  %v4382_v42 = vpack.c.bf16 %v1653_v33, %v1642_v32  ;;  %v1732_v32 = vld [vmem:[#allocation9 + $0x1e50] sm:$0xff]  ;;  %v4620_v33 = vpack.c.bf16 %v1744_v25, %v1733_v24 }
 0x292   :  { %v4622_v41 = vpack.c.bf16 %v1743_v34, %v1732_v32  ;;  %v1832_v24 = vld [vmem:[#allocation9 + $0x2170] sm:$0xff]  ;;  %v1829_v32 = vld [vmem:[#allocation9 + $0x2158] sm:$0xff] }
 0x293   :  { %4367 = vmatpush1.bf16.msra.mxu0 %v4366_v44  ;;  %v4384_v44 = vpack.c.bf16 %v1676_v39, %v1665_v38  ;;  %v1755_v38 = vld [vmem:[#allocation9 + $0x1f08] sm:$0xff]  ;;  %v1766_v39 = vld [vmem:[#allocation9 + $0x1f60] sm:$0xff] }
 0x294   :  { %4591 = vmatpush1.bf16.msra.mxu1 %v4590_v45  ;;  %4369 = vmatprep.subr.bf16.mxu0 %v4368_v48  ;;  %v1664_v45 = vld [vmem:[#allocation9 + $0x1c30] sm:$0xff]  ;;  %v1675_v48 = vld [vmem:[#allocation9 + $0x1c88] sm:$0xff] }
 0x295   :  { %4593 = vmatprep.subr.bf16.mxu1 %v4592_v54  ;;  %v1687_v54 = vld [vmem:[#allocation9 + $0x1ce8] sm:$0xff]  ;;  %v4386_v58 = vpack.c.bf16 %v1675_v48, %v1664_v45  ;;  %v1754_v45 = vld [vmem:[#allocation9 + $0x1f00] sm:$0xff]  ;;  %v4624_v48 = vpack.c.bf16 %v1766_v39, %v1755_v38  ;;  %v1852_v38 = vld [vmem:[#allocation9 + $0x2210] sm:$0xff] }
 0x296   :  { %v4626_v57 = vpack.c.bf16 %v1765_v50, %v1754_v45  ;;  %v1843_v39 = vld [vmem:[#allocation9 + $0x21c8] sm:$0xff]  ;;  %v1840_v45 = vld [vmem:[#allocation9 + $0x21b0] sm:$0xff]  ;;  %v1842_v50 = vld [vmem:[#allocation9 + $0x21c0] sm:$0xff] }
 0x297   :  { %4371 = vmatpush1.bf16.msra.mxu0 %v4370_v62  ;;  %v4388_v62 = vpack.c.bf16 %v1698_v18, %v1687_v54  ;;  %v1777_v54 = vld [vmem:[#allocation9 + $0x1fb8] sm:$0xff]  ;;  %v1788_v18 = vld [vmem:[#allocation9 + $0x2010] sm:$0xff] }
 0x298   :  { %4595 = vmatpush1.bf16.msra.mxu1 %v4594_v55  ;;  %4373 = vmatprep.subr.bf16.mxu0 %v4372_v1  ;;  %v1686_v55 = vld [vmem:[#allocation9 + $0x1ce0] sm:$0xff]  ;;  %v1697_v1 = vld [vmem:[#allocation9 + $0x1d38] sm:$0xff] }
 0x299   :  { %4597 = vmatprep.subr.bf16.mxu1 %v4596_v6  ;;  %v1709_v6 = vld [vmem:[#allocation9 + $0x1d98] sm:$0xff]  ;;  %v4390_v11 = vpack.c.bf16 %v1697_v1, %v1686_v55  ;;  %v1776_v55 = vld [vmem:[#allocation9 + $0x1fb0] sm:$0xff]  ;;  %v4628_v1 = vpack.c.bf16 %v1788_v18, %v1777_v54  ;;  %v1863_v54 = vld [vmem:[#allocation9 + $0x2268] sm:$0xff] }
 0x29a   :  { %v1874_v18 = vld [vmem:[#allocation9 + $0x22c0] sm:$0xff] }
 0x29b   :  { %4375 = vmatpush1.bf16.msra.mxu0 %v4374_v13  ;;  %v4392_v13 = vpack.c.bf16 %v1720_v8, %v1709_v6  ;;  %v1799_v6 = vld [vmem:[#allocation9 + $0x2068] sm:$0xff]  ;;  %v1810_v8 = vld [vmem:[#allocation9 + $0x20c0] sm:$0xff] }
 0x29c   :  { %4599 = vmatpush1.bf16.msra.mxu1 %v4598_v14  ;;  %4377 = vmatprep.subr.bf16.mxu0 %v4376_v15  ;;  %v1708_v14 = vld [vmem:[#allocation9 + $0x1d90] sm:$0xff]  ;;  %v1719_v15 = vld [vmem:[#allocation9 + $0x1de8] sm:$0xff]  ;;  %v4632_v17 = vpack.c.bf16 %v1810_v8, %v1799_v6 }
 0x29d   :  { %4601 = vmatprep.subr.bf16.mxu1 %v4600_v22  ;;  %v1731_v22 = vld [vmem:[#allocation9 + $0x1e48] sm:$0xff]  ;;  %v4394_v27 = vpack.c.bf16 %v1719_v15, %v1708_v14  ;;  %v1798_v15 = vld [vmem:[#allocation9 + $0x2060] sm:$0xff]  ;;  %v1896_v6 = vld [vmem:[#allocation9 + $0x2370] sm:$0xff] }
 0x29e   :  { %v1807_v14 = vld [vmem:[#allocation9 + $0x20a8] sm:$0xff] }
 0x29f   :  { %4379 = vmatpush1.bf16.msra.mxu0 %v4378_v29  ;;  %v4396_v29 = vpack.c.bf16 %v1742_v23, %v1731_v22  ;;  %v1830_v22 = vld [vmem:[#allocation9 + $0x2160] sm:$0xff]  ;;  %v1821_v23 = vld [vmem:[#allocation9 + $0x2118] sm:$0xff]  ;;  %v1887_v8 = vld [vmem:[#allocation9 + $0x2328] sm:$0xff] }
 0x2a0   :  { %4603 = vmatpush1.bf16.msra.mxu1 %v4602_v30  ;;  %4381 = vmatprep.subr.bf16.mxu0 %v4380_v31  ;;  %v1730_v30 = vld [vmem:[#allocation9 + $0x1e40] sm:$0xff]  ;;  %v1741_v31 = vld [vmem:[#allocation9 + $0x1e98] sm:$0xff]  ;;  %v4636_v34 = vpack.c.bf16 %v1832_v24, %v1821_v23 }
 0x2a1   :  { %4605 = vmatprep.subr.bf16.mxu1 %v4604_v35  ;;  %v1753_v35 = vld [vmem:[#allocation9 + $0x1ef8] sm:$0xff]  ;;  %v4398_v40 = vpack.c.bf16 %v1741_v31, %v1730_v30  ;;  %v4412_v30 = vpack.c.bf16 %v1830_v22, %v1819_v21  ;;  %v1818_v31 = vld [vmem:[#allocation9 + $0x2100] sm:$0xff]  ;;  %v1907_v22 = vld [vmem:[#allocation9 + $0x23c8] sm:$0xff] }
 0x2a2   :  { %v1897_v21 = vld [vmem:[#allocation9 + $0x2378] sm:$0xff]  ;;  %v1918_v23 = vld [vmem:[#allocation9 + $0x2420] sm:$0xff] }
 0x2a3   :  { %4383 = vmatpush1.bf16.msra.mxu0 %v4382_v42  ;;  %v4400_v42 = vpack.c.bf16 %v1764_v36, %v1753_v35  ;;  %v1831_v35 = vld [vmem:[#allocation9 + $0x2168] sm:$0xff]  ;;  %v1841_v36 = vld [vmem:[#allocation9 + $0x21b8] sm:$0xff] }
 0x2a4   :  { %4607 = vmatpush1.bf16.msra.mxu1 %v4606_v43  ;;  %4385 = vmatprep.subr.bf16.mxu0 %v4384_v44  ;;  %v1752_v43 = vld [vmem:[#allocation9 + $0x1ef0] sm:$0xff]  ;;  %v1763_v44 = vld [vmem:[#allocation9 + $0x1f48] sm:$0xff]  ;;  %v1909_v24 = vld [vmem:[#allocation9 + $0x23d8] sm:$0xff] }
 0x2a5   :  { %4609 = vmatprep.subr.bf16.mxu1 %v4608_v51  ;;  %v1775_v51 = vld [vmem:[#allocation9 + $0x1fa8] sm:$0xff]  ;;  %v4402_v56 = vpack.c.bf16 %v1763_v44, %v1752_v43  ;;  %v4416_v44 = vpack.c.bf16 %v1852_v38, %v1841_v36  ;;  %v1929_v36 = vld [vmem:[#allocation9 + $0x2478] sm:$0xff]  ;;  %v1940_v38 = vld [vmem:[#allocation9 + $0x24d0] sm:$0xff] }
 0x2a7   :  { %4387 = vmatpush1.bf16.msra.mxu0 %v4386_v58  ;;  %v4404_v58 = vpack.c.bf16 %v1786_v53, %v1775_v51  ;;  %v1853_v53 = vld [vmem:[#allocation9 + $0x2218] sm:$0xff] }
 0x2a8   :  { %4611 = vmatpush1.bf16.msra.mxu1 %v4610_v59  ;;  %4389 = vmatprep.subr.bf16.mxu0 %v4388_v62  ;;  %v1774_v59 = vld [vmem:[#allocation9 + $0x1fa0] sm:$0xff]  ;;  %v1785_v62 = vld [vmem:[#allocation9 + $0x1ff8] sm:$0xff] }
 0x2a9   :  { %4613 = vmatprep.subr.bf16.mxu1 %v4612_v4  ;;  %v1797_v4 = vld [vmem:[#allocation9 + $0x2058] sm:$0xff]  ;;  %v4406_v9 = vpack.c.bf16 %v1785_v62, %v1774_v59  ;;  %v4420_v59 = vpack.c.bf16 %v1874_v18, %v1863_v54  ;;  %v1862_v62 = vld [vmem:[#allocation9 + $0x2260] sm:$0xff]  ;;  %v1951_v54 = vld [vmem:[#allocation9 + $0x2528] sm:$0xff] }
 0x2aa   :  { %v1962_v18 = vld [vmem:[#allocation9 + $0x2580] sm:$0xff] }
 0x2ab   :  { %4391 = vmatpush1.bf16.msra.mxu0 %v4390_v11  ;;  %v4630_v11 = vpack.c.bf16 %v1787_v3, %v1776_v55  ;;  %v1873_v55 = vld [vmem:[#allocation9 + $0x22b8] sm:$0xff] }
 0x2ac   :  { %4615 = vmatpush1.bf16.msra.mxu1 %v4614_v12  ;;  %4393 = vmatprep.subr.bf16.mxu0 %v4392_v13  ;;  %v4408_v12 = vpack.c.bf16 %v1808_v5, %v1797_v4  ;;  %v1796_v13 = vld [vmem:[#allocation9 + $0x2050] sm:$0xff]  ;;  %v1875_v4 = vld [vmem:[#allocation9 + $0x22c8] sm:$0xff]  ;;  %v1885_v5 = vld [vmem:[#allocation9 + $0x2318] sm:$0xff] }
 0x2ad   :  { %4617 = vmatprep.subr.bf16.mxu1 %v4616_v19  ;;  %v1809_v19 = vld [vmem:[#allocation9 + $0x20b8] sm:$0xff]  ;;  %v4410_v25 = vpack.c.bf16 %v1807_v14, %v1796_v13  ;;  %v4424_v13 = vpack.c.bf16 %v1896_v6, %v1885_v5  ;;  %v1884_v14 = vld [vmem:[#allocation9 + $0x2310] sm:$0xff] }
 0x2ae   :  { %v1973_v5 = vld [vmem:[#allocation9 + $0x25d8] sm:$0xff]  ;;  %v1984_v6 = vld [vmem:[#allocation9 + $0x2630] sm:$0xff] }
 0x2af   :  { %4395 = vmatpush1.bf16.msra.mxu0 %v4394_v27  ;;  %v5851_v27 = vld [vmem:[#allocation7] sm:$0xff] }
 0x2b0   :  { %4619 = vmatpush1.bf16.msra.mxu1 %v4618_v28  ;;  %4397 = vmatprep.subr.bf16.mxu0 %v4396_v29  ;;  %v463_v28 = vrot.slane %v5851_v27, %v462_v10  ;;  %v4634_v29 = vpack.c.bf16 %v1809_v19, %v1798_v15  ;;  %v1895_v15 = vld [vmem:[#allocation9 + $0x2368] sm:$0xff] }
 0x2b1   :  { %4621 = vmatprep.subr.bf16.mxu1 %v4620_v33  ;;  %v1820_v33 = vld [vmem:[#allocation9 + $0x2110] sm:$0xff] }
 0x2b2   :  { %v4638_v43 = vpack.c.bf16 %v1831_v35, %v1820_v33  ;;  %v1908_v33 = vld [vmem:[#allocation9 + $0x23d0] sm:$0xff]  ;;  %v1919_v35 = vld [vmem:[#allocation9 + $0x2428] sm:$0xff] }
 0x2b3   :  { %4399 = vmatpush1.bf16.msra.mxu0 %v4398_v40  ;;  %v1854_v40 = vld [vmem:[#allocation9 + $0x2220] sm:$0xff] }
 0x2b4   :  { %4623 = vmatpush1.bf16.msra.mxu1 %v4622_v41  ;;  %4401 = vmatprep.subr.bf16.mxu0 %v4400_v42  ;;  %v4414_v41 = vpack.c.bf16 %v1829_v32, %v1818_v31  ;;  %v5857_v42 = vadd.f32 %v5836_v37, %v463_v28  ;;  %v4640_v51 = vpack.c.bf16 %v1854_v40, %v1843_v39  ;;  %v1906_v31 = vld [vmem:[#allocation9 + $0x23c0] sm:$0xff]  ;;  %v1917_v32 = vld [vmem:[#allocation9 + $0x2418] sm:$0xff]  ;;  %v1931_v39 = vld [vmem:[#allocation9 + $0x2488] sm:$0xff] }
 0x2b5   :  { %4625 = vmatprep.subr.bf16.mxu1 %v4624_v48  ;;  %v1851_v48 = vld [vmem:[#allocation9 + $0x2208] sm:$0xff]  ;;  %v4426_v28 = vpack.c.bf16 %v1895_v15, %v1884_v14  ;;  %v1942_v40 = vld [vmem:[#allocation9 + $0x24e0] sm:$0xff]  ;;  %v4440_v14 = vpack.c.bf16 %v1984_v6, %v1973_v5  ;;  %v1972_v15 = vld [vmem:[#allocation9 + $0x25d0] sm:$0xff] }
 0x2b6   :  { %v4418_v37 = vpack.c.bf16 %v1851_v48, %v1840_v45  ;;  %v1928_v45 = vld [vmem:[#allocation9 + $0x2470] sm:$0xff]  ;;  %v1939_v48 = vld [vmem:[#allocation9 + $0x24c8] sm:$0xff]  ;;  %v833_v6 = vld [vmem:[#allocation9 + $0x238] sm:$0xff] }
 0x2b7   :  { %4403 = vmatpush1.bf16.msra.mxu0 %v4402_v56  ;;  %v1865_v56 = vld [vmem:[#allocation9 + $0x2278] sm:$0xff]  ;;  %v823_v5 = vld [vmem:[#allocation9 + $0x1e8] sm:$0xff] }
 0x2b8   :  { %4627 = vmatpush1.bf16.msra.mxu1 %v4626_v57  ;;  %4405 = vmatprep.subr.bf16.mxu0 %v4404_v58  ;;  %v1876_v57 = vld [vmem:[#allocation9 + $0x22d0] sm:$0xff]  ;;  %v4642_v58 = vpack.c.bf16 %v1853_v53, %v1842_v50  ;;  %v1930_v50 = vld [vmem:[#allocation9 + $0x2480] sm:$0xff]  ;;  %v1941_v53 = vld [vmem:[#allocation9 + $0x24d8] sm:$0xff] }
 0x2b9   :  { %4629 = vmatprep.subr.bf16.mxu1 %v4628_v1  ;;  %v1864_v1 = vld [vmem:[#allocation9 + $0x2270] sm:$0xff]  ;;  %v4644_v3 = vpack.c.bf16 %v1876_v57, %v1865_v56  ;;  %v1953_v56 = vld [vmem:[#allocation9 + $0x2538] sm:$0xff] }
 0x2ba   :  { %v1964_v57 = vld [vmem:[#allocation9 + $0x2590] sm:$0xff] }
 0x2bb   :  { %4407 = vmatpush1.bf16.msra.mxu0 %v4406_v9  ;;  %v1898_v9 = vld [vmem:[#allocation9 + $0x2380] sm:$0xff] }
 0x2bc   :  { %4631 = vmatpush1.bf16.msra.mxu1 %v4630_v11  ;;  %4409 = vmatprep.subr.bf16.mxu0 %v4408_v12  ;;  %v4422_v11 = vpack.c.bf16 %v1873_v55, %v1862_v62  ;;  %v4646_v12 = vpack.c.bf16 %v1875_v4, %v1864_v1  ;;  %v4648_v19 = vpack.c.bf16 %v1898_v9, %v1887_v8  ;;  %v1950_v62 = vld [vmem:[#allocation9 + $0x2520] sm:$0xff]  ;;  %v1961_v55 = vld [vmem:[#allocation9 + $0x2578] sm:$0xff]  ;;  %v1952_v1 = vld [vmem:[#allocation9 + $0x2530] sm:$0xff] }
 0x2bd   :  { %4633 = vmatprep.subr.bf16.mxu1 %v4632_v17  ;;  %v1886_v17 = vld [vmem:[#allocation9 + $0x2320] sm:$0xff]  ;;  %v1963_v4 = vld [vmem:[#allocation9 + $0x2588] sm:$0xff] }
 0x2be   :  { %v1975_v8 = vld [vmem:[#allocation9 + $0x25e8] sm:$0xff]  ;;  %v1986_v9 = vld [vmem:[#allocation9 + $0x2640] sm:$0xff] }
 0x2bf   :  { %4411 = vmatpush1.bf16.msra.mxu0 %v4410_v25  ;;  %v1920_v25 = vld [vmem:[#allocation9 + $0x2430] sm:$0xff] }
 0x2c0   :  { %4635 = vmatpush1.bf16.msra.mxu1 %v4634_v29  ;;  %4413 = vmatprep.subr.bf16.mxu0 %v4412_v30  ;;  %v4650_v29 = vpack.c.bf16 %v1897_v21, %v1886_v17  ;;  %v4428_v30 = vpack.c.bf16 %v1918_v23, %v1907_v22  ;;  %v1983_v17 = vld [vmem:[#allocation9 + $0x2628] sm:$0xff]  ;;  %v4664_v21 = vpack.c.bf16 %v1986_v9, %v1975_v8  ;;  %v1985_v22 = vld [vmem:[#allocation9 + $0x2638] sm:$0xff]  ;;  %v844_v8 = vld [vmem:[#allocation9 + $0x290] sm:$0xff] }
 0x2c1   :  { %4637 = vmatprep.subr.bf16.mxu1 %v4636_v34  ;;  %v4652_v34 = vpack.c.bf16 %v1920_v25, %v1909_v24  ;;  %v767_v23 = vld [vmem:[#allocation9 + $0x28] sm:$0xff]  ;;  %v778_v24 = vld [vmem:[#allocation9 + $0x80] sm:$0xff]  ;;  %v769_v25 = vld [vmem:[#allocation9 + $0x38] sm:$0xff] }
 0x2c2   :  { %2260 = vmatmul.mubr.f32.vlgmr.msra.gmra.mrb[4].mxu0 %v5857_v42  ;;  %v835_v9 = vld [vmem:[#allocation9 + $0x248] sm:$0xff] }
 0x2c3   :  { %2544 = vmatmul.mubr.f32.vlgmr.msra.gmra.mrb[6].mxu1 %v5857_v42  ;;  %4415 = vmatpush1.bf16.msra.mxu0 %v4414_v41  ;;  %v4430_v41 = vpack.c.bf16 %v1917_v32, %v1906_v31  ;;  %v4668_v32 = vpack.c.bf16 %v778_v24, %v767_v23  ;;  %v845_v23 = vld [vmem:[#allocation9 + $0x298] sm:$0xff]  ;;  %v855_v24 = vld [vmem:[#allocation9 + $0x2e8] sm:$0xff] }
 0x2c4   :  { %4639 = vmatpush1.bf16.msra.mxu1 %v4638_v43  ;;  %4417 = vmatprep.subr.bf16.mxu0 %v4416_v44  ;;  %v4654_v43 = vpack.c.bf16 %v1919_v35, %v1908_v33  ;;  %v4432_v44 = vpack.c.bf16 %v1940_v38, %v1929_v36  ;;  %v766_v33 = vld [vmem:[#allocation9 + $0x20] sm:$0xff]  ;;  %v768_v36 = vld [vmem:[#allocation9 + $0x30] sm:$0xff]  ;;  %v779_v38 = vld [vmem:[#allocation9 + $0x88] sm:$0xff] }
 0x2c5   :  { %4641 = vmatprep.subr.bf16.mxu1 %v4640_v51  ;;  %2330 = vmatprep.mubr.f32.mxu0 %v5669_v0  ;;  %v4656_v51 = vpack.c.bf16 %v1942_v40, %v1931_v39  ;;  %v789_v39 = vld [vmem:[#allocation9 + $0xd8] sm:$0xff]  ;;  %v800_v40 = vld [vmem:[#allocation9 + $0x130] sm:$0xff] }
 0x2c6   :  { %2614 = vmatprep.mubr.f32.mxu1 %v5669_v0 }
 0x2c7   :  { %4419 = vmatpush1.bf16.msra.mxu0 %v4418_v37  ;;  %v4434_v37 = vpack.c.bf16 %v1939_v48, %v1928_v45  ;;  %v788_v48 = vld [vmem:[#allocation9 + $0xd0] sm:$0xff] }
 0x2c8   :  { %4643 = vmatpush1.bf16.msra.mxu1 %v4642_v58  ;;  %4421 = vmatprep.subr.bf16.mxu0 %v4420_v59  ;;  %v4658_v58 = vpack.c.bf16 %v1941_v53, %v1930_v50  ;;  %v4436_v59 = vpack.c.bf16 %v1962_v18, %v1951_v54  ;;  %v799_v50 = vld [vmem:[#allocation9 + $0x128] sm:$0xff]  ;;  %v4672_v53 = vpack.c.bf16 %v800_v40, %v789_v39  ;;  %v801_v54 = vld [vmem:[#allocation9 + $0x138] sm:$0xff]  ;;  %v888_v40 = vld [vmem:[#allocation9 + $0x3f0] sm:$0xff] }
 0x2c9   :  { %4645 = vmatprep.subr.bf16.mxu1 %v4644_v3  ;;  %v4660_v3 = vpack.c.bf16 %v1964_v57, %v1953_v56  ;;  %v811_v18 = vld [vmem:[#allocation9 + $0x188] sm:$0xff]  ;;  %v822_v56 = vld [vmem:[#allocation9 + $0x1e0] sm:$0xff]  ;;  %v877_v39 = vld [vmem:[#allocation9 + $0x398] sm:$0xff] }
 0x2cb   :  { %4423 = vmatpush1.bf16.msra.mxu0 %v4422_v11  ;;  %v4438_v11 = vpack.c.bf16 %v1961_v55, %v1950_v62  ;;  %v4676_v62 = vpack.c.bf16 %v822_v56, %v811_v18  ;;  %v810_v55 = vld [vmem:[#allocation9 + $0x180] sm:$0xff]  ;;  %v889_v18 = vld [vmem:[#allocation9 + $0x3f8] sm:$0xff]  ;;  %v899_v56 = vld [vmem:[#allocation9 + $0x448] sm:$0xff] }
 0x2cc   :  { %4647 = vmatpush1.bf16.msra.mxu1 %v4646_v12  ;;  %4425 = vmatprep.subr.bf16.mxu0 %v4424_v13  ;;  %v470_v12 = vsub.s32 6, %v5788_v60  ;;  %v4662_v13 = vpack.c.bf16 %v1963_v4, %v1952_v1  ;;  %v821_v1 = vld [vmem:[#allocation9 + $0x1d8] sm:$0xff] }
 0x2cd   :  { %4649 = vmatprep.subr.bf16.mxu1 %v4648_v19  ;;  %v1974_v19 = vld [vmem:[#allocation9 + $0x25e0] sm:$0xff] }
 0x2ce   :  { %v4666_v31 = vpack.c.bf16 %v1985_v22, %v1974_v19  ;;  %v843_v19 = vld [vmem:[#allocation9 + $0x288] sm:$0xff] }
 0x2cf   :  { %4427 = vmatpush1.bf16.msra.mxu0 %v4426_v28  ;;  %v780_v28 = vld [vmem:[#allocation9 + $0x90] sm:$0xff] }
 0x2d0   :  { %4651 = vmatpush1.bf16.msra.mxu1 %v4650_v29  ;;  %4429 = vmatprep.subr.bf16.mxu0 %v4428_v30  ;;  %v4442_v29 = vpack.c.bf16 %v1983_v17, %v1972_v15  ;;  %v471_v30 = vrot.slane %v5851_v27, %v470_v12  ;;  %v4892_v35 = vpack.c.bf16 %v780_v28, %v769_v25  ;;  %v832_v17 = vld [vmem:[#allocation9 + $0x230] sm:$0xff]  ;;  %v866_v25 = vld [vmem:[#allocation9 + $0x340] sm:$0xff]  ;;  %v857_v28 = vld [vmem:[#allocation9 + $0x2f8] sm:$0xff] }
 0x2d1   :  { %4653 = vmatprep.subr.bf16.mxu1 %v4652_v34  ;;  %v777_v34 = vld [vmem:[#allocation9 + $0x78] sm:$0xff]  ;;  %v4894_v27 = vpack.c.bf16 %v779_v38, %v768_v36  ;;  %v4680_v15 = vpack.c.bf16 %v844_v8, %v833_v6  ;;  %v867_v38 = vld [vmem:[#allocation9 + $0x348] sm:$0xff]  ;;  %v932_v8 = vld [vmem:[#allocation9 + $0x550] sm:$0xff] }
 0x2d2   :  { %v5868_v45 = vadd.f32 %v5828_v52, %v471_v30  ;;  %v4674_v52 = vpack.c.bf16 %v799_v50, %v788_v48  ;;  %v4682_v30 = vpack.c.bf16 %v843_v19, %v832_v17  ;;  %v4688_v48 = vpack.c.bf16 %v888_v40, %v877_v39  ;;  %v876_v50 = vld [vmem:[#allocation9 + $0x390] sm:$0xff]  ;;  %v921_v6 = vld [vmem:[#allocation9 + $0x4f8] sm:$0xff]  ;;  %v931_v19 = vld [vmem:[#allocation9 + $0x548] sm:$0xff] }
 0x2d3   :  { %4431 = vmatpush1.bf16.msra.mxu0 %v4430_v41  ;;  %v4670_v41 = vpack.c.bf16 %v777_v34, %v766_v33  ;;  %v854_v33 = vld [vmem:[#allocation9 + $0x2e0] sm:$0xff]  ;;  %v865_v34 = vld [vmem:[#allocation9 + $0x338] sm:$0xff]  ;;  %v920_v17 = vld [vmem:[#allocation9 + $0x4f0] sm:$0xff] }
 0x2d4   :  { %4655 = vmatpush1.bf16.msra.mxu1 %v4654_v43  ;;  %4433 = vmatprep.subr.bf16.mxu0 %v4432_v44  ;;  %v791_v43 = vld [vmem:[#allocation9 + $0xe8] sm:$0xff]  ;;  %v802_v44 = vld [vmem:[#allocation9 + $0x140] sm:$0xff]  ;;  %v965_v39 = vld [vmem:[#allocation9 + $0x658] sm:$0xff] }
 0x2d5   :  { %4657 = vmatprep.subr.bf16.mxu1 %v4656_v51  ;;  %v790_v51 = vld [vmem:[#allocation9 + $0xe0] sm:$0xff]  ;;  %v4896_v57 = vpack.c.bf16 %v802_v44, %v791_v43  ;;  %v4686_v44 = vpack.c.bf16 %v865_v34, %v854_v33  ;;  %v953_v34 = vld [vmem:[#allocation9 + $0x5f8] sm:$0xff]  ;;  %v976_v40 = vld [vmem:[#allocation9 + $0x6b0] sm:$0xff] }
 0x2d6   :  { %v890_v43 = vld [vmem:[#allocation9 + $0x400] sm:$0xff] }
 0x2d7   :  { %4435 = vmatpush1.bf16.msra.mxu0 %v4434_v37  ;;  %v813_v37 = vld [vmem:[#allocation9 + $0x198] sm:$0xff]  ;;  %v942_v33 = vld [vmem:[#allocation9 + $0x5a0] sm:$0xff] }
 0x2d8   :  { %4659 = vmatpush1.bf16.msra.mxu1 %v4658_v58  ;;  %4437 = vmatprep.subr.bf16.mxu0 %v4436_v59  ;;  %v824_v58 = vld [vmem:[#allocation9 + $0x1f0] sm:$0xff]  ;;  %v4898_v59 = vpack.c.bf16 %v801_v54, %v790_v51  ;;  %v887_v51 = vld [vmem:[#allocation9 + $0x3e8] sm:$0xff] }
 0x2d9   :  { %4661 = vmatprep.subr.bf16.mxu1 %v4660_v3  ;;  %v812_v3 = vld [vmem:[#allocation9 + $0x190] sm:$0xff]  ;;  %v4900_v4 = vpack.c.bf16 %v824_v58, %v813_v37  ;;  %v901_v37 = vld [vmem:[#allocation9 + $0x458] sm:$0xff] }
 0x2da   :  { %v912_v58 = vld [vmem:[#allocation9 + $0x4b0] sm:$0xff] }
 0x2db   :  { %4439 = vmatpush1.bf16.msra.mxu0 %v4438_v11  ;;  %v846_v11 = vld [vmem:[#allocation9 + $0x2a0] sm:$0xff] }
 0x2dc   :  { %4663 = vmatpush1.bf16.msra.mxu1 %v4662_v13  ;;  %4441 = vmatprep.subr.bf16.mxu0 %v4440_v14  ;;  %v4678_v13 = vpack.c.bf16 %v821_v1, %v810_v55  ;;  %v4902_v14 = vpack.c.bf16 %v823_v5, %v812_v3  ;;  %v4904_v22 = vpack.c.bf16 %v846_v11, %v835_v9  ;;  %v898_v55 = vld [vmem:[#allocation9 + $0x440] sm:$0xff]  ;;  %v909_v1 = vld [vmem:[#allocation9 + $0x498] sm:$0xff]  ;;  %v900_v3 = vld [vmem:[#allocation9 + $0x450] sm:$0xff] }
 0x2dd   :  { %4665 = vmatprep.subr.bf16.mxu1 %v4664_v21  ;;  %v834_v21 = vld [vmem:[#allocation9 + $0x240] sm:$0xff]  ;;  %v911_v5 = vld [vmem:[#allocation9 + $0x4a8] sm:$0xff] }
 0x2de   :  { %v923_v9 = vld [vmem:[#allocation9 + $0x508] sm:$0xff]  ;;  %v934_v11 = vld [vmem:[#allocation9 + $0x560] sm:$0xff] }
 0x2df   :  { %4443 = vmatpush1.bf16.msra.mxu0 %v4442_v29  ;;  %v868_v29 = vld [vmem:[#allocation9 + $0x350] sm:$0xff] }
 0x2e0   :  { %4667 = vmatpush1.bf16.msra.mxu1 %v4666_v31  ;;  %4669 = vmatprep.subr.bf16.mxu0 %v4668_v32  ;;  %v4906_v31 = vpack.c.bf16 %v845_v23, %v834_v21  ;;  %v4684_v32 = vpack.c.bf16 %v866_v25, %v855_v24  ;;  %v4908_v36 = vpack.c.bf16 %v868_v29, %v857_v28  ;;  %v922_v21 = vld [vmem:[#allocation9 + $0x500] sm:$0xff]  ;;  %v933_v23 = vld [vmem:[#allocation9 + $0x558] sm:$0xff]  ;;  %v943_v24 = vld [vmem:[#allocation9 + $0x5a8] sm:$0xff] }
 0x2e1   :  { %4893 = vmatprep.subr.bf16.mxu1 %v4892_v35  ;;  %v856_v35 = vld [vmem:[#allocation9 + $0x2f0] sm:$0xff]  ;;  %v954_v25 = vld [vmem:[#allocation9 + $0x600] sm:$0xff]  ;;  %v945_v28 = vld [vmem:[#allocation9 + $0x5b8] sm:$0xff] }
 0x2e2   :  { %2331 = vmatmul.mubr.f32.vlgmr.msra.gmra.mrb[4].mxu0 %v5868_v45  ;;  %v956_v29 = vld [vmem:[#allocation9 + $0x610] sm:$0xff] }
 0x2e3   :  { %2615 = vmatmul.mubr.f32.vlgmr.msra.gmra.mrb[6].mxu1 %v5868_v45  ;;  %4671 = vmatpush1.bf16.msra.mxu0 %v4670_v41  ;;  %v879_v41 = vld [vmem:[#allocation9 + $0x3a8] sm:$0xff] }
 0x2e4   :  { %2685 = vmatprep.mubr.f32.mxu0 %v5816_v2  ;;  %4895 = vmatpush1.bf16.msra.mxu1 %v4894_v27  ;;  %v4910_v27 = vpack.c.bf16 %v867_v38, %v856_v35  ;;  %v4912_v54 = vpack.c.bf16 %v890_v43, %v879_v41  ;;  %v944_v35 = vld [vmem:[#allocation9 + $0x5b0] sm:$0xff]  ;;  %v955_v38 = vld [vmem:[#allocation9 + $0x608] sm:$0xff]  ;;  %v978_v43 = vld [vmem:[#allocation9 + $0x6c0] sm:$0xff] }
 0x2e5   :  { %2969 = vmatprep.mubr.f32.mxu1 %v5816_v2  ;;  %4673 = vmatprep.subr.bf16.mxu0 %v4672_v53  ;;  %v878_v53 = vld [vmem:[#allocation9 + $0x3a0] sm:$0xff]  ;;  %v967_v41 = vld [vmem:[#allocation9 + $0x668] sm:$0xff] }
 0x2e6   :  { %4897 = vmatprep.subr.bf16.mxu1 %v4896_v57  ;;  %v910_v57 = vld [vmem:[#allocation9 + $0x4a0] sm:$0xff] }
 0x2e7   :  { %4675 = vmatpush1.bf16.msra.mxu0 %v4674_v52  ;;  %v4690_v52 = vpack.c.bf16 %v887_v51, %v876_v50  ;;  %v964_v50 = vld [vmem:[#allocation9 + $0x650] sm:$0xff]  ;;  %v975_v51 = vld [vmem:[#allocation9 + $0x6a8] sm:$0xff] }
 0x2e8   :  { %4899 = vmatpush1.bf16.msra.mxu1 %v4898_v59  ;;  %4677 = vmatprep.subr.bf16.mxu0 %v4676_v62  ;;  %v4914_v59 = vpack.c.bf16 %v889_v18, %v878_v53  ;;  %v4692_v62 = vpack.c.bf16 %v910_v57, %v899_v56  ;;  %v966_v53 = vld [vmem:[#allocation9 + $0x660] sm:$0xff]  ;;  %v977_v18 = vld [vmem:[#allocation9 + $0x6b8] sm:$0xff]  ;;  %v987_v56 = vld [vmem:[#allocation9 + $0x708] sm:$0xff] }
 0x2e9   :  { %4901 = vmatprep.subr.bf16.mxu1 %v4900_v4  ;;  %v4916_v4 = vpack.c.bf16 %v912_v58, %v901_v37  ;;  %v998_v57 = vld [vmem:[#allocation9 + $0x760] sm:$0xff]  ;;  %v989_v37 = vld [vmem:[#allocation9 + $0x718] sm:$0xff]  ;;  %v1000_v58 = vld [vmem:[#allocation9 + $0x770] sm:$0xff] }
 0x2eb   :  { %4679 = vmatpush1.bf16.msra.mxu0 %v4678_v13  ;;  %v4694_v13 = vpack.c.bf16 %v909_v1, %v898_v55  ;;  %v986_v55 = vld [vmem:[#allocation9 + $0x700] sm:$0xff]  ;;  %v997_v1 = vld [vmem:[#allocation9 + $0x758] sm:$0xff] }
 0x2ec   :  { %4903 = vmatpush1.bf16.msra.mxu1 %v4902_v14  ;;  %4681 = vmatprep.subr.bf16.mxu0 %v4680_v15  ;;  %v4918_v14 = vpack.c.bf16 %v911_v5, %v900_v3  ;;  %v4696_v15 = vpack.c.bf16 %v932_v8, %v921_v6  ;;  %v988_v3 = vld [vmem:[#allocation9 + $0x710] sm:$0xff]  ;;  %v999_v5 = vld [vmem:[#allocation9 + $0x768] sm:$0xff]  ;;  %v1009_v6 = vld [vmem:[#allocation9 + $0x7b8] sm:$0xff] }
 0x2ed   :  { %4905 = vmatprep.subr.bf16.mxu1 %v4904_v22  ;;  %v4920_v22 = vpack.c.bf16 %v934_v11, %v923_v9  ;;  %v1020_v8 = vld [vmem:[#allocation9 + $0x810] sm:$0xff]  ;;  %v1011_v9 = vld [vmem:[#allocation9 + $0x7c8] sm:$0xff]  ;;  %v1022_v11 = vld [vmem:[#allocation9 + $0x820] sm:$0xff] }
 0x2ef   :  { %4683 = vmatpush1.bf16.msra.mxu0 %v4682_v30  ;;  %v4698_v30 = vpack.c.bf16 %v931_v19, %v920_v17  ;;  %v1008_v17 = vld [vmem:[#allocation9 + $0x7b0] sm:$0xff]  ;;  %v1019_v19 = vld [vmem:[#allocation9 + $0x808] sm:$0xff] }
 0x2f0   :  { %4907 = vmatpush1.bf16.msra.mxu1 %v4906_v31  ;;  %4685 = vmatprep.subr.bf16.mxu0 %v4684_v32  ;;  %v4922_v31 = vpack.c.bf16 %v933_v23, %v922_v21  ;;  %v4700_v32 = vpack.c.bf16 %v954_v25, %v943_v24  ;;  %v1010_v21 = vld [vmem:[#allocation9 + $0x7c0] sm:$0xff]  ;;  %v1021_v23 = vld [vmem:[#allocation9 + $0x818] sm:$0xff]  ;;  %v1031_v24 = vld [vmem:[#allocation9 + $0x868] sm:$0xff] }
 0x2f1   :  { %4909 = vmatprep.subr.bf16.mxu1 %v4908_v36  ;;  %v4924_v36 = vpack.c.bf16 %v956_v29, %v945_v28  ;;  %v1042_v25 = vld [vmem:[#allocation9 + $0x8c0] sm:$0xff]  ;;  %v1033_v28 = vld [vmem:[#allocation9 + $0x878] sm:$0xff]  ;;  %v1044_v29 = vld [vmem:[#allocation9 + $0x8d0] sm:$0xff] }
 0x2f3   :  { %4687 = vmatpush1.bf16.msra.mxu0 %v4686_v44  ;;  %v4702_v44 = vpack.c.bf16 %v953_v34, %v942_v33  ;;  %v1030_v33 = vld [vmem:[#allocation9 + $0x860] sm:$0xff]  ;;  %v1041_v34 = vld [vmem:[#allocation9 + $0x8b8] sm:$0xff] }
 0x2f4   :  { %4911 = vmatpush1.bf16.msra.mxu1 %v4910_v27  ;;  %4689 = vmatprep.subr.bf16.mxu0 %v4688_v48  ;;  %v4926_v27 = vpack.c.bf16 %v955_v38, %v944_v35  ;;  %v4704_v48 = vpack.c.bf16 %v976_v40, %v965_v39  ;;  %v1032_v35 = vld [vmem:[#allocation9 + $0x870] sm:$0xff]  ;;  %v1043_v38 = vld [vmem:[#allocation9 + $0x8c8] sm:$0xff]  ;;  %v1053_v39 = vld [vmem:[#allocation9 + $0x918] sm:$0xff] }
 0x2f5   :  { %4913 = vmatprep.subr.bf16.mxu1 %v4912_v54  ;;  %v4928_v54 = vpack.c.bf16 %v978_v43, %v967_v41  ;;  %v1064_v40 = vld [vmem:[#allocation9 + $0x970] sm:$0xff]  ;;  %v1055_v41 = vld [vmem:[#allocation9 + $0x928] sm:$0xff]  ;;  %v1066_v43 = vld [vmem:[#allocation9 + $0x980] sm:$0xff] }
 0x2f7   :  { %4691 = vmatpush1.bf16.msra.mxu0 %v4690_v52  ;;  %v4706_v52 = vpack.c.bf16 %v975_v51, %v964_v50  ;;  %v1052_v50 = vld [vmem:[#allocation9 + $0x910] sm:$0xff]  ;;  %v1063_v51 = vld [vmem:[#allocation9 + $0x968] sm:$0xff] }
 0x2f8   :  { %4915 = vmatpush1.bf16.msra.mxu1 %v4914_v59  ;;  %4693 = vmatprep.subr.bf16.mxu0 %v4692_v62  ;;  %v4930_v59 = vpack.c.bf16 %v977_v18, %v966_v53  ;;  %v4708_v62 = vpack.c.bf16 %v998_v57, %v987_v56  ;;  %v1054_v53 = vld [vmem:[#allocation9 + $0x920] sm:$0xff]  ;;  %v1065_v18 = vld [vmem:[#allocation9 + $0x978] sm:$0xff]  ;;  %v1075_v56 = vld [vmem:[#allocation9 + $0x9c8] sm:$0xff] }
 0x2f9   :  { %4917 = vmatprep.subr.bf16.mxu1 %v4916_v4  ;;  %v4932_v4 = vpack.c.bf16 %v1000_v58, %v989_v37  ;;  %v1086_v57 = vld [vmem:[#allocation9 + $0xa20] sm:$0xff]  ;;  %v1077_v37 = vld [vmem:[#allocation9 + $0x9d8] sm:$0xff]  ;;  %v1088_v58 = vld [vmem:[#allocation9 + $0xa30] sm:$0xff] }
 0x2fb   :  { %4695 = vmatpush1.bf16.msra.mxu0 %v4694_v13  ;;  %v4710_v13 = vpack.c.bf16 %v997_v1, %v986_v55  ;;  %v1074_v55 = vld [vmem:[#allocation9 + $0x9c0] sm:$0xff]  ;;  %v1085_v1 = vld [vmem:[#allocation9 + $0xa18] sm:$0xff] }
 0x2fc   :  { %4919 = vmatpush1.bf16.msra.mxu1 %v4918_v14  ;;  %4697 = vmatprep.subr.bf16.mxu0 %v4696_v15  ;;  %v4934_v14 = vpack.c.bf16 %v999_v5, %v988_v3  ;;  %v4712_v15 = vpack.c.bf16 %v1020_v8, %v1009_v6  ;;  %v1076_v3 = vld [vmem:[#allocation9 + $0x9d0] sm:$0xff]  ;;  %v1087_v5 = vld [vmem:[#allocation9 + $0xa28] sm:$0xff]  ;;  %v1097_v6 = vld [vmem:[#allocation9 + $0xa78] sm:$0xff] }
 0x2fd   :  { %4921 = vmatprep.subr.bf16.mxu1 %v4920_v22  ;;  %v4936_v22 = vpack.c.bf16 %v1022_v11, %v1011_v9  ;;  %v1108_v8 = vld [vmem:[#allocation9 + $0xad0] sm:$0xff]  ;;  %v1099_v9 = vld [vmem:[#allocation9 + $0xa88] sm:$0xff]  ;;  %v1110_v11 = vld [vmem:[#allocation9 + $0xae0] sm:$0xff] }
 0x2ff   :  { %4699 = vmatpush1.bf16.msra.mxu0 %v4698_v30  ;;  %v4714_v30 = vpack.c.bf16 %v1019_v19, %v1008_v17  ;;  %v1096_v17 = vld [vmem:[#allocation9 + $0xa70] sm:$0xff]  ;;  %v1107_v19 = vld [vmem:[#allocation9 + $0xac8] sm:$0xff] }
 0x300   :  { %4923 = vmatpush1.bf16.msra.mxu1 %v4922_v31  ;;  %4701 = vmatprep.subr.bf16.mxu0 %v4700_v32  ;;  %v4938_v31 = vpack.c.bf16 %v1021_v23, %v1010_v21  ;;  %v4716_v32 = vpack.c.bf16 %v1042_v25, %v1031_v24  ;;  %v1098_v21 = vld [vmem:[#allocation9 + $0xa80] sm:$0xff]  ;;  %v1109_v23 = vld [vmem:[#allocation9 + $0xad8] sm:$0xff]  ;;  %v1119_v24 = vld [vmem:[#allocation9 + $0xb28] sm:$0xff] }
 0x301   :  { %4925 = vmatprep.subr.bf16.mxu1 %v4924_v36  ;;  %v4940_v36 = vpack.c.bf16 %v1044_v29, %v1033_v28  ;;  %v1130_v25 = vld [vmem:[#allocation9 + $0xb80] sm:$0xff]  ;;  %v1121_v28 = vld [vmem:[#allocation9 + $0xb38] sm:$0xff]  ;;  %v1132_v29 = vld [vmem:[#allocation9 + $0xb90] sm:$0xff] }
 0x303   :  { %4703 = vmatpush1.bf16.msra.mxu0 %v4702_v44  ;;  %v4718_v44 = vpack.c.bf16 %v1041_v34, %v1030_v33  ;;  %v1118_v33 = vld [vmem:[#allocation9 + $0xb20] sm:$0xff]  ;;  %v1129_v34 = vld [vmem:[#allocation9 + $0xb78] sm:$0xff] }
 0x304   :  { %4927 = vmatpush1.bf16.msra.mxu1 %v4926_v27  ;;  %4705 = vmatprep.subr.bf16.mxu0 %v4704_v48  ;;  %v4942_v27 = vpack.c.bf16 %v1043_v38, %v1032_v35  ;;  %v4720_v48 = vpack.c.bf16 %v1064_v40, %v1053_v39  ;;  %v4956_v35 = vpack.c.bf16 %v1132_v29, %v1121_v28  ;;  %v1131_v38 = vld [vmem:[#allocation9 + $0xb88] sm:$0xff]  ;;  %v1141_v39 = vld [vmem:[#allocation9 + $0xbd8] sm:$0xff]  ;;  %v1152_v40 = vld [vmem:[#allocation9 + $0xc30] sm:$0xff] }
 0x305   :  { %4929 = vmatprep.subr.bf16.mxu1 %v4928_v54  ;;  %v4944_v54 = vpack.c.bf16 %v1066_v43, %v1055_v41  ;;  %v4734_v41 = vpack.c.bf16 %v1129_v34, %v1118_v33  ;;  %v1143_v43 = vld [vmem:[#allocation9 + $0xbe8] sm:$0xff]  ;;  %v1209_v28 = vld [vmem:[#allocation9 + $0xdf8] sm:$0xff]  ;;  %v1220_v29 = vld [vmem:[#allocation9 + $0xe50] sm:$0xff] }
 0x306   :  { %v1206_v33 = vld [vmem:[#allocation9 + $0xde0] sm:$0xff]  ;;  %v1217_v34 = vld [vmem:[#allocation9 + $0xe38] sm:$0xff] }
 0x307   :  { %4707 = vmatpush1.bf16.msra.mxu0 %v4706_v52  ;;  %v4722_v52 = vpack.c.bf16 %v1063_v51, %v1052_v50  ;;  %v1151_v50 = vld [vmem:[#allocation9 + $0xc28] sm:$0xff]  ;;  %v1142_v51 = vld [vmem:[#allocation9 + $0xbe0] sm:$0xff] }
 0x308   :  { %4931 = vmatpush1.bf16.msra.mxu1 %v4930_v59  ;;  %4709 = vmatprep.subr.bf16.mxu0 %v4708_v62  ;;  %v4946_v59 = vpack.c.bf16 %v1065_v18, %v1054_v53  ;;  %v4724_v62 = vpack.c.bf16 %v1086_v57, %v1075_v56  ;;  %v4736_v53 = vpack.c.bf16 %v1152_v40, %v1141_v39  ;;  %v1163_v18 = vld [vmem:[#allocation9 + $0xc88] sm:$0xff]  ;;  %v1174_v56 = vld [vmem:[#allocation9 + $0xce0] sm:$0xff]  ;;  %v1229_v39 = vld [vmem:[#allocation9 + $0xe98] sm:$0xff] }
 0x309   :  { %4933 = vmatprep.subr.bf16.mxu1 %v4932_v4  ;;  %v4948_v4 = vpack.c.bf16 %v1088_v58, %v1077_v37  ;;  %v1165_v37 = vld [vmem:[#allocation9 + $0xc98] sm:$0xff]  ;;  %v1176_v58 = vld [vmem:[#allocation9 + $0xcf0] sm:$0xff] }
 0x30a   :  { %v1240_v40 = vld [vmem:[#allocation9 + $0xef0] sm:$0xff] }
 0x30b   :  { %4711 = vmatpush1.bf16.msra.mxu0 %v4710_v13  ;;  %v4726_v13 = vpack.c.bf16 %v1085_v1, %v1074_v55  ;;  %v1162_v55 = vld [vmem:[#allocation9 + $0xc80] sm:$0xff]  ;;  %v1173_v1 = vld [vmem:[#allocation9 + $0xcd8] sm:$0xff] }
 0x30c   :  { %4935 = vmatpush1.bf16.msra.mxu1 %v4934_v14  ;;  %4713 = vmatprep.subr.bf16.mxu0 %v4712_v15  ;;  %v4950_v14 = vpack.c.bf16 %v1087_v5, %v1076_v3  ;;  %v4728_v15 = vpack.c.bf16 %v1108_v8, %v1097_v6  ;;  %v1164_v3 = vld [vmem:[#allocation9 + $0xc90] sm:$0xff]  ;;  %v1175_v5 = vld [vmem:[#allocation9 + $0xce8] sm:$0xff]  ;;  %v1185_v6 = vld [vmem:[#allocation9 + $0xd38] sm:$0xff] }
 0x30d   :  { %4937 = vmatprep.subr.bf16.mxu1 %v4936_v22  ;;  %v4952_v22 = vpack.c.bf16 %v1110_v11, %v1099_v9  ;;  %v1196_v8 = vld [vmem:[#allocation9 + $0xd90] sm:$0xff]  ;;  %v1187_v9 = vld [vmem:[#allocation9 + $0xd48] sm:$0xff]  ;;  %v1198_v11 = vld [vmem:[#allocation9 + $0xda0] sm:$0xff] }
 0x30f   :  { %4715 = vmatpush1.bf16.msra.mxu0 %v4714_v30  ;;  %v4730_v30 = vpack.c.bf16 %v1107_v19, %v1096_v17  ;;  %v1184_v17 = vld [vmem:[#allocation9 + $0xd30] sm:$0xff]  ;;  %v1195_v19 = vld [vmem:[#allocation9 + $0xd88] sm:$0xff] }
 0x310   :  { %4939 = vmatpush1.bf16.msra.mxu1 %v4938_v31  ;;  %4717 = vmatprep.subr.bf16.mxu0 %v4716_v32  ;;  %v4954_v31 = vpack.c.bf16 %v1109_v23, %v1098_v21  ;;  %v4732_v32 = vpack.c.bf16 %v1130_v25, %v1119_v24  ;;  %v1186_v21 = vld [vmem:[#allocation9 + $0xd40] sm:$0xff]  ;;  %v1197_v23 = vld [vmem:[#allocation9 + $0xd98] sm:$0xff]  ;;  %v1207_v24 = vld [vmem:[#allocation9 + $0xde8] sm:$0xff] }
 0x311   :  { %4941 = vmatprep.subr.bf16.mxu1 %v4940_v36  ;;  %v1120_v36 = vld [vmem:[#allocation9 + $0xb30] sm:$0xff]  ;;  %v1218_v25 = vld [vmem:[#allocation9 + $0xe40] sm:$0xff] }
 0x313   :  { %4719 = vmatpush1.bf16.msra.mxu0 %v4718_v44  ;;  %v1154_v44 = vld [vmem:[#allocation9 + $0xc40] sm:$0xff] }
 0x314   :  { %4943 = vmatpush1.bf16.msra.mxu1 %v4942_v27  ;;  %4721 = vmatprep.subr.bf16.mxu0 %v4720_v48  ;;  %v4958_v27 = vpack.c.bf16 %v1131_v38, %v1120_v36  ;;  %v1140_v48 = vld [vmem:[#allocation9 + $0xbd0] sm:$0xff]  ;;  %v4960_v57 = vpack.c.bf16 %v1154_v44, %v1143_v43  ;;  %v4972_v36 = vpack.c.bf16 %v1220_v29, %v1209_v28  ;;  %v1219_v38 = vld [vmem:[#allocation9 + $0xe48] sm:$0xff]  ;;  %v1242_v43 = vld [vmem:[#allocation9 + $0xf00] sm:$0xff] }
 0x315   :  { %4945 = vmatprep.subr.bf16.mxu1 %v4944_v54  ;;  %v1153_v54 = vld [vmem:[#allocation9 + $0xc38] sm:$0xff]  ;;  %v4750_v44 = vpack.c.bf16 %v1217_v34, %v1206_v33  ;;  %v1308_v29 = vld [vmem:[#allocation9 + $0x1110] sm:$0xff]  ;;  %v1294_v33 = vld [vmem:[#allocation9 + $0x10a0] sm:$0xff] }
 0x316   :  { %v1297_v28 = vld [vmem:[#allocation9 + $0x10b8] sm:$0xff] }
 0x317   :  { %4723 = vmatpush1.bf16.msra.mxu0 %v4722_v52  ;;  %v4738_v52 = vpack.c.bf16 %v1151_v50, %v1140_v48  ;;  %v4752_v48 = vpack.c.bf16 %v1240_v40, %v1229_v39  ;;  %v1228_v50 = vld [vmem:[#allocation9 + $0xe90] sm:$0xff]  ;;  %v1305_v34 = vld [vmem:[#allocation9 + $0x10f8] sm:$0xff] }
 0x318   :  { %4947 = vmatpush1.bf16.msra.mxu1 %v4946_v59  ;;  %4725 = vmatprep.subr.bf16.mxu0 %v4724_v62  ;;  %v4962_v59 = vpack.c.bf16 %v1153_v54, %v1142_v51  ;;  %v4740_v62 = vpack.c.bf16 %v1174_v56, %v1163_v18  ;;  %v1239_v51 = vld [vmem:[#allocation9 + $0xee8] sm:$0xff]  ;;  %v1241_v18 = vld [vmem:[#allocation9 + $0xef8] sm:$0xff]  ;;  %v1328_v40 = vld [vmem:[#allocation9 + $0x11b0] sm:$0xff] }
 0x319   :  { %4949 = vmatprep.subr.bf16.mxu1 %v4948_v4  ;;  %v4964_v4 = vpack.c.bf16 %v1176_v58, %v1165_v37  ;;  %v1251_v56 = vld [vmem:[#allocation9 + $0xf48] sm:$0xff]  ;;  %v1253_v37 = vld [vmem:[#allocation9 + $0xf58] sm:$0xff]  ;;  %v1264_v58 = vld [vmem:[#allocation9 + $0xfb0] sm:$0xff] }
 0x31a   :  { %v1317_v39 = vld [vmem:[#allocation9 + $0x1158] sm:$0xff] }
 0x31b   :  { %4727 = vmatpush1.bf16.msra.mxu0 %v4726_v13  ;;  %v4742_v13 = vpack.c.bf16 %v1173_v1, %v1162_v55  ;;  %v1250_v55 = vld [vmem:[#allocation9 + $0xf40] sm:$0xff]  ;;  %v1261_v1 = vld [vmem:[#allocation9 + $0xf98] sm:$0xff] }
 0x31c   :  { %4951 = vmatpush1.bf16.msra.mxu1 %v4950_v14  ;;  %4729 = vmatprep.subr.bf16.mxu0 %v4728_v15  ;;  %v4966_v14 = vpack.c.bf16 %v1175_v5, %v1164_v3  ;;  %v4744_v15 = vpack.c.bf16 %v1196_v8, %v1185_v6  ;;  %v1252_v3 = vld [vmem:[#allocation9 + $0xf50] sm:$0xff]  ;;  %v1263_v5 = vld [vmem:[#allocation9 + $0xfa8] sm:$0xff]  ;;  %v1273_v6 = vld [vmem:[#allocation9 + $0xff8] sm:$0xff] }
 0x31d   :  { %4953 = vmatprep.subr.bf16.mxu1 %v4952_v22  ;;  %v4968_v22 = vpack.c.bf16 %v1198_v11, %v1187_v9  ;;  %v1284_v8 = vld [vmem:[#allocation9 + $0x1050] sm:$0xff]  ;;  %v1275_v9 = vld [vmem:[#allocation9 + $0x1008] sm:$0xff]  ;;  %v1286_v11 = vld [vmem:[#allocation9 + $0x1060] sm:$0xff] }
 0x31f   :  { %4731 = vmatpush1.bf16.msra.mxu0 %v4730_v30  ;;  %v4746_v30 = vpack.c.bf16 %v1195_v19, %v1184_v17  ;;  %v1272_v17 = vld [vmem:[#allocation9 + $0xff0] sm:$0xff]  ;;  %v1283_v19 = vld [vmem:[#allocation9 + $0x1048] sm:$0xff] }
 0x320   :  { %4955 = vmatpush1.bf16.msra.mxu1 %v4954_v31  ;;  %4733 = vmatprep.subr.bf16.mxu0 %v4732_v32  ;;  %v4970_v31 = vpack.c.bf16 %v1197_v23, %v1186_v21  ;;  %v4748_v32 = vpack.c.bf16 %v1218_v25, %v1207_v24  ;;  %v1274_v21 = vld [vmem:[#allocation9 + $0x1000] sm:$0xff]  ;;  %v1285_v23 = vld [vmem:[#allocation9 + $0x1058] sm:$0xff]  ;;  %v1295_v24 = vld [vmem:[#allocation9 + $0x10a8] sm:$0xff] }
 0x321   :  { %4957 = vmatprep.subr.bf16.mxu1 %v4956_v35  ;;  %v1208_v35 = vld [vmem:[#allocation9 + $0xdf0] sm:$0xff]  ;;  %v1306_v25 = vld [vmem:[#allocation9 + $0x1100] sm:$0xff] }
 0x322   :  { %2686 = vmatmul.mubr.f32.vlgmr.msra.gmra.mrb[6].mxu0 %v5818_v7 }
 0x323   :  { %2970 = vmatmul.mubr.f32.vlgmr.msra.gmra.mrb[8].mxu1 %v5818_v7  ;;  %4735 = vmatpush1.bf16.msra.mxu0 %v4734_v41  ;;  %v1231_v41 = vld [vmem:[#allocation9 + $0xea8] sm:$0xff] }
 0x324   :  { %2756 = vmatprep.mubr.f32.mxu0 %v5822_v16  ;;  %4959 = vmatpush1.bf16.msra.mxu1 %v4958_v27  ;;  %v4974_v27 = vpack.c.bf16 %v1219_v38, %v1208_v35  ;;  %v4976_v54 = vpack.c.bf16 %v1242_v43, %v1231_v41  ;;  %v1296_v35 = vld [vmem:[#allocation9 + $0x10b0] sm:$0xff]  ;;  %v1307_v38 = vld [vmem:[#allocation9 + $0x1108] sm:$0xff]  ;;  %v1330_v43 = vld [vmem:[#allocation9 + $0x11c0] sm:$0xff] }
 0x325   :  { %3040 = vmatprep.mubr.f32.mxu1 %v5822_v16  ;;  %4737 = vmatprep.subr.bf16.mxu0 %v4736_v53  ;;  %v1230_v53 = vld [vmem:[#allocation9 + $0xea0] sm:$0xff]  ;;  %v1319_v41 = vld [vmem:[#allocation9 + $0x1168] sm:$0xff] }
 0x326   :  { %4961 = vmatprep.subr.bf16.mxu1 %v4960_v57  ;;  %v1262_v57 = vld [vmem:[#allocation9 + $0xfa0] sm:$0xff] }
 0x327   :  { %4739 = vmatpush1.bf16.msra.mxu0 %v4738_v52  ;;  %v4754_v52 = vpack.c.bf16 %v1239_v51, %v1228_v50  ;;  %v1316_v50 = vld [vmem:[#allocation9 + $0x1150] sm:$0xff]  ;;  %v1327_v51 = vld [vmem:[#allocation9 + $0x11a8] sm:$0xff] }
 0x328   :  { %4963 = vmatpush1.bf16.msra.mxu1 %v4962_v59  ;;  %4741 = vmatprep.subr.bf16.mxu0 %v4740_v62  ;;  %v4978_v59 = vpack.c.bf16 %v1241_v18, %v1230_v53  ;;  %v4756_v62 = vpack.c.bf16 %v1262_v57, %v1251_v56  ;;  %v1318_v53 = vld [vmem:[#allocation9 + $0x1160] sm:$0xff]  ;;  %v1329_v18 = vld [vmem:[#allocation9 + $0x11b8] sm:$0xff]  ;;  %v1339_v56 = vld [vmem:[#allocation9 + $0x1208] sm:$0xff] }
 0x329   :  { %4965 = vmatprep.subr.bf16.mxu1 %v4964_v4  ;;  %v4980_v4 = vpack.c.bf16 %v1264_v58, %v1253_v37  ;;  %v1350_v57 = vld [vmem:[#allocation9 + $0x1260] sm:$0xff]  ;;  %v1341_v37 = vld [vmem:[#allocation9 + $0x1218] sm:$0xff]  ;;  %v1352_v58 = vld [vmem:[#allocation9 + $0x1270] sm:$0xff] }
 0x32b   :  { %4743 = vmatpush1.bf16.msra.mxu0 %v4742_v13  ;;  %v4758_v13 = vpack.c.bf16 %v1261_v1, %v1250_v55  ;;  %v1338_v55 = vld [vmem:[#allocation9 + $0x1200] sm:$0xff]  ;;  %v1349_v1 = vld [vmem:[#allocation9 + $0x1258] sm:$0xff] }
 0x32c   :  { %4967 = vmatpush1.bf16.msra.mxu1 %v4966_v14  ;;  %4745 = vmatprep.subr.bf16.mxu0 %v4744_v15  ;;  %v4982_v14 = vpack.c.bf16 %v1263_v5, %v1252_v3  ;;  %v4760_v15 = vpack.c.bf16 %v1284_v8, %v1273_v6  ;;  %v1340_v3 = vld [vmem:[#allocation9 + $0x1210] sm:$0xff]  ;;  %v1351_v5 = vld [vmem:[#allocation9 + $0x1268] sm:$0xff]  ;;  %v1361_v6 = vld [vmem:[#allocation9 + $0x12b8] sm:$0xff] }
 0x32d   :  { %4969 = vmatprep.subr.bf16.mxu1 %v4968_v22  ;;  %v4984_v22 = vpack.c.bf16 %v1286_v11, %v1275_v9  ;;  %v1372_v8 = vld [vmem:[#allocation9 + $0x1310] sm:$0xff]  ;;  %v1363_v9 = vld [vmem:[#allocation9 + $0x12c8] sm:$0xff]  ;;  %v1374_v11 = vld [vmem:[#allocation9 + $0x1320] sm:$0xff] }
 0x32f   :  { %4747 = vmatpush1.bf16.msra.mxu0 %v4746_v30  ;;  %v4762_v30 = vpack.c.bf16 %v1283_v19, %v1272_v17  ;;  %v1360_v17 = vld [vmem:[#allocation9 + $0x12b0] sm:$0xff]  ;;  %v1371_v19 = vld [vmem:[#allocation9 + $0x1308] sm:$0xff] }
 0x330   :  { %4971 = vmatpush1.bf16.msra.mxu1 %v4970_v31  ;;  %4749 = vmatprep.subr.bf16.mxu0 %v4748_v32  ;;  %v4986_v31 = vpack.c.bf16 %v1285_v23, %v1274_v21  ;;  %v4764_v32 = vpack.c.bf16 %v1306_v25, %v1295_v24  ;;  %v1362_v21 = vld [vmem:[#allocation9 + $0x12c0] sm:$0xff]  ;;  %v1373_v23 = vld [vmem:[#allocation9 + $0x1318] sm:$0xff]  ;;  %v1383_v24 = vld [vmem:[#allocation9 + $0x1368] sm:$0xff] }
 0x331   :  { %4973 = vmatprep.subr.bf16.mxu1 %v4972_v36  ;;  %v4988_v36 = vpack.c.bf16 %v1308_v29, %v1297_v28  ;;  %v1394_v25 = vld [vmem:[#allocation9 + $0x13c0] sm:$0xff]  ;;  %v1385_v28 = vld [vmem:[#allocation9 + $0x1378] sm:$0xff]  ;;  %v1396_v29 = vld [vmem:[#allocation9 + $0x13d0] sm:$0xff] }
 0x333   :  { %4751 = vmatpush1.bf16.msra.mxu0 %v4750_v44  ;;  %v4766_v44 = vpack.c.bf16 %v1305_v34, %v1294_v33  ;;  %v1382_v33 = vld [vmem:[#allocation9 + $0x1360] sm:$0xff]  ;;  %v1393_v34 = vld [vmem:[#allocation9 + $0x13b8] sm:$0xff] }
 0x334   :  { %4975 = vmatpush1.bf16.msra.mxu1 %v4974_v27  ;;  %4753 = vmatprep.subr.bf16.mxu0 %v4752_v48  ;;  %v4990_v27 = vpack.c.bf16 %v1307_v38, %v1296_v35  ;;  %v4768_v48 = vpack.c.bf16 %v1328_v40, %v1317_v39  ;;  %v1384_v35 = vld [vmem:[#allocation9 + $0x1370] sm:$0xff]  ;;  %v1395_v38 = vld [vmem:[#allocation9 + $0x13c8] sm:$0xff]  ;;  %v1405_v39 = vld [vmem:[#allocation9 + $0x1418] sm:$0xff] }
 0x335   :  { %4977 = vmatprep.subr.bf16.mxu1 %v4976_v54  ;;  %v4992_v54 = vpack.c.bf16 %v1330_v43, %v1319_v41  ;;  %v1416_v40 = vld [vmem:[#allocation9 + $0x1470] sm:$0xff]  ;;  %v1407_v41 = vld [vmem:[#allocation9 + $0x1428] sm:$0xff]  ;;  %v1418_v43 = vld [vmem:[#allocation9 + $0x1480] sm:$0xff] }
 0x337   :  { %4755 = vmatpush1.bf16.msra.mxu0 %v4754_v52  ;;  %v4770_v52 = vpack.c.bf16 %v1327_v51, %v1316_v50  ;;  %v1404_v50 = vld [vmem:[#allocation9 + $0x1410] sm:$0xff]  ;;  %v1415_v51 = vld [vmem:[#allocation9 + $0x1468] sm:$0xff] }
 0x338   :  { %4979 = vmatpush1.bf16.msra.mxu1 %v4978_v59  ;;  %4757 = vmatprep.subr.bf16.mxu0 %v4756_v62  ;;  %v4994_v59 = vpack.c.bf16 %v1329_v18, %v1318_v53  ;;  %v4772_v62 = vpack.c.bf16 %v1350_v57, %v1339_v56  ;;  %v1406_v53 = vld [vmem:[#allocation9 + $0x1420] sm:$0xff]  ;;  %v1417_v18 = vld [vmem:[#allocation9 + $0x1478] sm:$0xff]  ;;  %v1427_v56 = vld [vmem:[#allocation9 + $0x14c8] sm:$0xff] }
 0x339   :  { %4981 = vmatprep.subr.bf16.mxu1 %v4980_v4  ;;  %v4996_v4 = vpack.c.bf16 %v1352_v58, %v1341_v37  ;;  %v1438_v57 = vld [vmem:[#allocation9 + $0x1520] sm:$0xff]  ;;  %v1429_v37 = vld [vmem:[#allocation9 + $0x14d8] sm:$0xff]  ;;  %v1440_v58 = vld [vmem:[#allocation9 + $0x1530] sm:$0xff] }
 0x33b   :  { %4759 = vmatpush1.bf16.msra.mxu0 %v4758_v13  ;;  %v4774_v13 = vpack.c.bf16 %v1349_v1, %v1338_v55  ;;  %v1426_v55 = vld [vmem:[#allocation9 + $0x14c0] sm:$0xff]  ;;  %v1437_v1 = vld [vmem:[#allocation9 + $0x1518] sm:$0xff] }
 0x33c   :  { %4983 = vmatpush1.bf16.msra.mxu1 %v4982_v14  ;;  %4761 = vmatprep.subr.bf16.mxu0 %v4760_v15  ;;  %v4998_v14 = vpack.c.bf16 %v1351_v5, %v1340_v3  ;;  %v4776_v15 = vpack.c.bf16 %v1372_v8, %v1361_v6  ;;  %v1428_v3 = vld [vmem:[#allocation9 + $0x14d0] sm:$0xff]  ;;  %v1439_v5 = vld [vmem:[#allocation9 + $0x1528] sm:$0xff]  ;;  %v1449_v6 = vld [vmem:[#allocation9 + $0x1578] sm:$0xff] }
 0x33d   :  { %4985 = vmatprep.subr.bf16.mxu1 %v4984_v22  ;;  %v5000_v22 = vpack.c.bf16 %v1374_v11, %v1363_v9  ;;  %v1460_v8 = vld [vmem:[#allocation9 + $0x15d0] sm:$0xff]  ;;  %v1451_v9 = vld [vmem:[#allocation9 + $0x1588] sm:$0xff]  ;;  %v1462_v11 = vld [vmem:[#allocation9 + $0x15e0] sm:$0xff] }
 0x33f   :  { %4763 = vmatpush1.bf16.msra.mxu0 %v4762_v30  ;;  %v4778_v30 = vpack.c.bf16 %v1371_v19, %v1360_v17  ;;  %v1448_v17 = vld [vmem:[#allocation9 + $0x1570] sm:$0xff]  ;;  %v1459_v19 = vld [vmem:[#allocation9 + $0x15c8] sm:$0xff] }
 0x340   :  { %4987 = vmatpush1.bf16.msra.mxu1 %v4986_v31  ;;  %4765 = vmatprep.subr.bf16.mxu0 %v4764_v32  ;;  %v5002_v31 = vpack.c.bf16 %v1373_v23, %v1362_v21  ;;  %v4780_v32 = vpack.c.bf16 %v1394_v25, %v1383_v24  ;;  %v1450_v21 = vld [vmem:[#allocation9 + $0x1580] sm:$0xff]  ;;  %v1461_v23 = vld [vmem:[#allocation9 + $0x15d8] sm:$0xff]  ;;  %v1471_v24 = vld [vmem:[#allocation9 + $0x1628] sm:$0xff] }
 0x341   :  { %4989 = vmatprep.subr.bf16.mxu1 %v4988_v36  ;;  %v5004_v36 = vpack.c.bf16 %v1396_v29, %v1385_v28  ;;  %v1482_v25 = vld [vmem:[#allocation9 + $0x1680] sm:$0xff]  ;;  %v1473_v28 = vld [vmem:[#allocation9 + $0x1638] sm:$0xff]  ;;  %v1484_v29 = vld [vmem:[#allocation9 + $0x1690] sm:$0xff] }
 0x343   :  { %4767 = vmatpush1.bf16.msra.mxu0 %v4766_v44  ;;  %v4782_v44 = vpack.c.bf16 %v1393_v34, %v1382_v33  ;;  %v1470_v33 = vld [vmem:[#allocation9 + $0x1620] sm:$0xff]  ;;  %v1481_v34 = vld [vmem:[#allocation9 + $0x1678] sm:$0xff] }
 0x344   :  { %4991 = vmatpush1.bf16.msra.mxu1 %v4990_v27  ;;  %4769 = vmatprep.subr.bf16.mxu0 %v4768_v48  ;;  %v5006_v27 = vpack.c.bf16 %v1395_v38, %v1384_v35  ;;  %v4784_v48 = vpack.c.bf16 %v1416_v40, %v1405_v39  ;;  %v5020_v35 = vpack.c.bf16 %v1484_v29, %v1473_v28  ;;  %v1483_v38 = vld [vmem:[#allocation9 + $0x1688] sm:$0xff]  ;;  %v1493_v39 = vld [vmem:[#allocation9 + $0x16d8] sm:$0xff]  ;;  %v1504_v40 = vld [vmem:[#allocation9 + $0x1730] sm:$0xff] }
 0x345   :  { %4993 = vmatprep.subr.bf16.mxu1 %v4992_v54  ;;  %v5008_v54 = vpack.c.bf16 %v1418_v43, %v1407_v41  ;;  %v4798_v41 = vpack.c.bf16 %v1481_v34, %v1470_v33  ;;  %v1495_v43 = vld [vmem:[#allocation9 + $0x16e8] sm:$0xff]  ;;  %v1561_v28 = vld [vmem:[#allocation9 + $0x18f8] sm:$0xff]  ;;  %v1572_v29 = vld [vmem:[#allocation9 + $0x1950] sm:$0xff] }
 0x346   :  { %v1558_v33 = vld [vmem:[#allocation9 + $0x18e0] sm:$0xff]  ;;  %v1569_v34 = vld [vmem:[#allocation9 + $0x1938] sm:$0xff] }
 0x347   :  { %4771 = vmatpush1.bf16.msra.mxu0 %v4770_v52  ;;  %v4786_v52 = vpack.c.bf16 %v1415_v51, %v1404_v50  ;;  %v1503_v50 = vld [vmem:[#allocation9 + $0x1728] sm:$0xff]  ;;  %v1494_v51 = vld [vmem:[#allocation9 + $0x16e0] sm:$0xff] }
 0x348   :  { %4995 = vmatpush1.bf16.msra.mxu1 %v4994_v59  ;;  %4773 = vmatprep.subr.bf16.mxu0 %v4772_v62  ;;  %v5010_v59 = vpack.c.bf16 %v1417_v18, %v1406_v53  ;;  %v4788_v62 = vpack.c.bf16 %v1438_v57, %v1427_v56  ;;  %v4800_v53 = vpack.c.bf16 %v1504_v40, %v1493_v39  ;;  %v1515_v18 = vld [vmem:[#allocation9 + $0x1788] sm:$0xff]  ;;  %v1526_v56 = vld [vmem:[#allocation9 + $0x17e0] sm:$0xff]  ;;  %v1581_v39 = vld [vmem:[#allocation9 + $0x1998] sm:$0xff] }
 0x349   :  { %4997 = vmatprep.subr.bf16.mxu1 %v4996_v4  ;;  %v5012_v4 = vpack.c.bf16 %v1440_v58, %v1429_v37  ;;  %v1517_v37 = vld [vmem:[#allocation9 + $0x1798] sm:$0xff]  ;;  %v1528_v58 = vld [vmem:[#allocation9 + $0x17f0] sm:$0xff] }
 0x34a   :  { %v1592_v40 = vld [vmem:[#allocation9 + $0x19f0] sm:$0xff] }
 0x34b   :  { %4775 = vmatpush1.bf16.msra.mxu0 %v4774_v13  ;;  %v4790_v13 = vpack.c.bf16 %v1437_v1, %v1426_v55  ;;  %v1514_v55 = vld [vmem:[#allocation9 + $0x1780] sm:$0xff]  ;;  %v1525_v1 = vld [vmem:[#allocation9 + $0x17d8] sm:$0xff] }
 0x34c   :  { %4999 = vmatpush1.bf16.msra.mxu1 %v4998_v14  ;;  %4777 = vmatprep.subr.bf16.mxu0 %v4776_v15  ;;  %v5014_v14 = vpack.c.bf16 %v1439_v5, %v1428_v3  ;;  %v4792_v15 = vpack.c.bf16 %v1460_v8, %v1449_v6  ;;  %v1516_v3 = vld [vmem:[#allocation9 + $0x1790] sm:$0xff]  ;;  %v1527_v5 = vld [vmem:[#allocation9 + $0x17e8] sm:$0xff]  ;;  %v1537_v6 = vld [vmem:[#allocation9 + $0x1838] sm:$0xff] }
 0x34d   :  { %5001 = vmatprep.subr.bf16.mxu1 %v5000_v22  ;;  %v5016_v22 = vpack.c.bf16 %v1462_v11, %v1451_v9  ;;  %v1548_v8 = vld [vmem:[#allocation9 + $0x1890] sm:$0xff]  ;;  %v1539_v9 = vld [vmem:[#allocation9 + $0x1848] sm:$0xff]  ;;  %v1550_v11 = vld [vmem:[#allocation9 + $0x18a0] sm:$0xff] }
 0x34f   :  { %4779 = vmatpush1.bf16.msra.mxu0 %v4778_v30  ;;  %v4794_v30 = vpack.c.bf16 %v1459_v19, %v1448_v17  ;;  %v1536_v17 = vld [vmem:[#allocation9 + $0x1830] sm:$0xff]  ;;  %v1547_v19 = vld [vmem:[#allocation9 + $0x1888] sm:$0xff] }
 0x350   :  { %5003 = vmatpush1.bf16.msra.mxu1 %v5002_v31  ;;  %4781 = vmatprep.subr.bf16.mxu0 %v4780_v32  ;;  %v5018_v31 = vpack.c.bf16 %v1461_v23, %v1450_v21  ;;  %v4796_v32 = vpack.c.bf16 %v1482_v25, %v1471_v24  ;;  %v1538_v21 = vld [vmem:[#allocation9 + $0x1840] sm:$0xff]  ;;  %v1549_v23 = vld [vmem:[#allocation9 + $0x1898] sm:$0xff]  ;;  %v1559_v24 = vld [vmem:[#allocation9 + $0x18e8] sm:$0xff] }
 0x351   :  { %5005 = vmatprep.subr.bf16.mxu1 %v5004_v36  ;;  %v1472_v36 = vld [vmem:[#allocation9 + $0x1630] sm:$0xff]  ;;  %v1570_v25 = vld [vmem:[#allocation9 + $0x1940] sm:$0xff] }
 0x353   :  { %4783 = vmatpush1.bf16.msra.mxu0 %v4782_v44  ;;  %v1506_v44 = vld [vmem:[#allocation9 + $0x1740] sm:$0xff] }
 0x354   :  { %5007 = vmatpush1.bf16.msra.mxu1 %v5006_v27  ;;  %4785 = vmatprep.subr.bf16.mxu0 %v4784_v48  ;;  %v5022_v27 = vpack.c.bf16 %v1483_v38, %v1472_v36  ;;  %v1492_v48 = vld [vmem:[#allocation9 + $0x16d0] sm:$0xff]  ;;  %v5024_v57 = vpack.c.bf16 %v1506_v44, %v1495_v43  ;;  %v5036_v36 = vpack.c.bf16 %v1572_v29, %v1561_v28  ;;  %v1571_v38 = vld [vmem:[#allocation9 + $0x1948] sm:$0xff]  ;;  %v1594_v43 = vld [vmem:[#allocation9 + $0x1a00] sm:$0xff] }
 0x355   :  { %5009 = vmatprep.subr.bf16.mxu1 %v5008_v54  ;;  %v1505_v54 = vld [vmem:[#allocation9 + $0x1738] sm:$0xff]  ;;  %v4814_v44 = vpack.c.bf16 %v1569_v34, %v1558_v33  ;;  %v1660_v29 = vld [vmem:[#allocation9 + $0x1c10] sm:$0xff]  ;;  %v1646_v33 = vld [vmem:[#allocation9 + $0x1ba0] sm:$0xff] }
 0x356   :  { %v1649_v28 = vld [vmem:[#allocation9 + $0x1bb8] sm:$0xff] }
 0x357   :  { %4787 = vmatpush1.bf16.msra.mxu0 %v4786_v52  ;;  %v4802_v52 = vpack.c.bf16 %v1503_v50, %v1492_v48  ;;  %v4816_v48 = vpack.c.bf16 %v1592_v40, %v1581_v39  ;;  %v1580_v50 = vld [vmem:[#allocation9 + $0x1990] sm:$0xff]  ;;  %v1657_v34 = vld [vmem:[#allocation9 + $0x1bf8] sm:$0xff] }
 0x358   :  { %5011 = vmatpush1.bf16.msra.mxu1 %v5010_v59  ;;  %4789 = vmatprep.subr.bf16.mxu0 %v4788_v62  ;;  %v5026_v59 = vpack.c.bf16 %v1505_v54, %v1494_v51  ;;  %v4804_v62 = vpack.c.bf16 %v1526_v56, %v1515_v18  ;;  %v1591_v51 = vld [vmem:[#allocation9 + $0x19e8] sm:$0xff]  ;;  %v1593_v18 = vld [vmem:[#allocation9 + $0x19f8] sm:$0xff]  ;;  %v1680_v40 = vld [vmem:[#allocation9 + $0x1cb0] sm:$0xff] }
 0x359   :  { %5013 = vmatprep.subr.bf16.mxu1 %v5012_v4  ;;  %v5028_v4 = vpack.c.bf16 %v1528_v58, %v1517_v37  ;;  %v1603_v56 = vld [vmem:[#allocation9 + $0x1a48] sm:$0xff]  ;;  %v1605_v37 = vld [vmem:[#allocation9 + $0x1a58] sm:$0xff]  ;;  %v1616_v58 = vld [vmem:[#allocation9 + $0x1ab0] sm:$0xff] }
 0x35a   :  { %v1669_v39 = vld [vmem:[#allocation9 + $0x1c58] sm:$0xff] }
 0x35b   :  { %4791 = vmatpush1.bf16.msra.mxu0 %v4790_v13  ;;  %v4806_v13 = vpack.c.bf16 %v1525_v1, %v1514_v55  ;;  %v1602_v55 = vld [vmem:[#allocation9 + $0x1a40] sm:$0xff]  ;;  %v1613_v1 = vld [vmem:[#allocation9 + $0x1a98] sm:$0xff] }
 0x35c   :  { %5015 = vmatpush1.bf16.msra.mxu1 %v5014_v14  ;;  %4793 = vmatprep.subr.bf16.mxu0 %v4792_v15  ;;  %v5030_v14 = vpack.c.bf16 %v1527_v5, %v1516_v3  ;;  %v4808_v15 = vpack.c.bf16 %v1548_v8, %v1537_v6  ;;  %v1604_v3 = vld [vmem:[#allocation9 + $0x1a50] sm:$0xff]  ;;  %v1615_v5 = vld [vmem:[#allocation9 + $0x1aa8] sm:$0xff]  ;;  %v1625_v6 = vld [vmem:[#allocation9 + $0x1af8] sm:$0xff] }
 0x35d   :  { %5017 = vmatprep.subr.bf16.mxu1 %v5016_v22  ;;  %v5032_v22 = vpack.c.bf16 %v1550_v11, %v1539_v9  ;;  %v1636_v8 = vld [vmem:[#allocation9 + $0x1b50] sm:$0xff]  ;;  %v1627_v9 = vld [vmem:[#allocation9 + $0x1b08] sm:$0xff]  ;;  %v1638_v11 = vld [vmem:[#allocation9 + $0x1b60] sm:$0xff] }
 0x35f   :  { %4795 = vmatpush1.bf16.msra.mxu0 %v4794_v30  ;;  %v4810_v30 = vpack.c.bf16 %v1547_v19, %v1536_v17  ;;  %v1624_v17 = vld [vmem:[#allocation9 + $0x1af0] sm:$0xff]  ;;  %v1635_v19 = vld [vmem:[#allocation9 + $0x1b48] sm:$0xff] }
 0x360   :  { %5019 = vmatpush1.bf16.msra.mxu1 %v5018_v31  ;;  %4797 = vmatprep.subr.bf16.mxu0 %v4796_v32  ;;  %v5034_v31 = vpack.c.bf16 %v1549_v23, %v1538_v21  ;;  %v4812_v32 = vpack.c.bf16 %v1570_v25, %v1559_v24  ;;  %v1626_v21 = vld [vmem:[#allocation9 + $0x1b00] sm:$0xff]  ;;  %v1637_v23 = vld [vmem:[#allocation9 + $0x1b58] sm:$0xff]  ;;  %v1647_v24 = vld [vmem:[#allocation9 + $0x1ba8] sm:$0xff] }
 0x361   :  { %5021 = vmatprep.subr.bf16.mxu1 %v5020_v35  ;;  %v1560_v35 = vld [vmem:[#allocation9 + $0x18f0] sm:$0xff]  ;;  %v1658_v25 = vld [vmem:[#allocation9 + $0x1c00] sm:$0xff] }
 0x362   :  { %2757 = vmatmul.mubr.f32.vlgmr.msra.gmra.mrb[6].mxu0 %v5842_v49 }
 0x363   :  { %3041 = vmatmul.mubr.f32.vlgmr.msra.gmra.mrb[8].mxu1 %v5842_v49  ;;  %4799 = vmatpush1.bf16.msra.mxu0 %v4798_v41  ;;  %v1583_v41 = vld [vmem:[#allocation9 + $0x19a8] sm:$0xff] }
 0x364   :  { %2827 = vmatprep.mubr.f32.mxu0 %v5844_v46  ;;  %5023 = vmatpush1.bf16.msra.mxu1 %v5022_v27  ;;  %v5038_v27 = vpack.c.bf16 %v1571_v38, %v1560_v35  ;;  %v5040_v54 = vpack.c.bf16 %v1594_v43, %v1583_v41  ;;  %v1648_v35 = vld [vmem:[#allocation9 + $0x1bb0] sm:$0xff]  ;;  %v1659_v38 = vld [vmem:[#allocation9 + $0x1c08] sm:$0xff]  ;;  %v1682_v43 = vld [vmem:[#allocation9 + $0x1cc0] sm:$0xff] }
 0x365   :  { %3111 = vmatprep.mubr.f32.mxu1 %v5844_v46  ;;  %4801 = vmatprep.subr.bf16.mxu0 %v4800_v53  ;;  %v1582_v53 = vld [vmem:[#allocation9 + $0x19a0] sm:$0xff]  ;;  %v1671_v41 = vld [vmem:[#allocation9 + $0x1c68] sm:$0xff] }
 0x366   :  { %5025 = vmatprep.subr.bf16.mxu1 %v5024_v57  ;;  %v1614_v57 = vld [vmem:[#allocation9 + $0x1aa0] sm:$0xff] }
 0x367   :  { %4803 = vmatpush1.bf16.msra.mxu0 %v4802_v52  ;;  %v4818_v52 = vpack.c.bf16 %v1591_v51, %v1580_v50  ;;  %v1668_v50 = vld [vmem:[#allocation9 + $0x1c50] sm:$0xff]  ;;  %v1679_v51 = vld [vmem:[#allocation9 + $0x1ca8] sm:$0xff] }
 0x368   :  { %5027 = vmatpush1.bf16.msra.mxu1 %v5026_v59  ;;  %4805 = vmatprep.subr.bf16.mxu0 %v4804_v62  ;;  %v5042_v59 = vpack.c.bf16 %v1593_v18, %v1582_v53  ;;  %v4820_v62 = vpack.c.bf16 %v1614_v57, %v1603_v56  ;;  %v1670_v53 = vld [vmem:[#allocation9 + $0x1c60] sm:$0xff]  ;;  %v1681_v18 = vld [vmem:[#allocation9 + $0x1cb8] sm:$0xff]  ;;  %v1691_v56 = vld [vmem:[#allocation9 + $0x1d08] sm:$0xff] }
 0x369   :  { %5029 = vmatprep.subr.bf16.mxu1 %v5028_v4  ;;  %v5044_v4 = vpack.c.bf16 %v1616_v58, %v1605_v37  ;;  %v1702_v57 = vld [vmem:[#allocation9 + $0x1d60] sm:$0xff]  ;;  %v1693_v37 = vld [vmem:[#allocation9 + $0x1d18] sm:$0xff]  ;;  %v1704_v58 = vld [vmem:[#allocation9 + $0x1d70] sm:$0xff] }
 0x36b   :  { %4807 = vmatpush1.bf16.msra.mxu0 %v4806_v13  ;;  %v4822_v13 = vpack.c.bf16 %v1613_v1, %v1602_v55  ;;  %v1690_v55 = vld [vmem:[#allocation9 + $0x1d00] sm:$0xff]  ;;  %v1701_v1 = vld [vmem:[#allocation9 + $0x1d58] sm:$0xff] }
 0x36c   :  { %5031 = vmatpush1.bf16.msra.mxu1 %v5030_v14  ;;  %4809 = vmatprep.subr.bf16.mxu0 %v4808_v15  ;;  %v5046_v14 = vpack.c.bf16 %v1615_v5, %v1604_v3  ;;  %v4824_v15 = vpack.c.bf16 %v1636_v8, %v1625_v6  ;;  %v1692_v3 = vld [vmem:[#allocation9 + $0x1d10] sm:$0xff]  ;;  %v1703_v5 = vld [vmem:[#allocation9 + $0x1d68] sm:$0xff]  ;;  %v1713_v6 = vld [vmem:[#allocation9 + $0x1db8] sm:$0xff] }
 0x36d   :  { %5033 = vmatprep.subr.bf16.mxu1 %v5032_v22  ;;  %v5048_v22 = vpack.c.bf16 %v1638_v11, %v1627_v9  ;;  %v1724_v8 = vld [vmem:[#allocation9 + $0x1e10] sm:$0xff]  ;;  %v1715_v9 = vld [vmem:[#allocation9 + $0x1dc8] sm:$0xff]  ;;  %v1726_v11 = vld [vmem:[#allocation9 + $0x1e20] sm:$0xff] }
 0x36f   :  { %4811 = vmatpush1.bf16.msra.mxu0 %v4810_v30  ;;  %v4826_v30 = vpack.c.bf16 %v1635_v19, %v1624_v17  ;;  %v1712_v17 = vld [vmem:[#allocation9 + $0x1db0] sm:$0xff]  ;;  %v1723_v19 = vld [vmem:[#allocation9 + $0x1e08] sm:$0xff] }
 0x370   :  { %5035 = vmatpush1.bf16.msra.mxu1 %v5034_v31  ;;  %4813 = vmatprep.subr.bf16.mxu0 %v4812_v32  ;;  %v5050_v31 = vpack.c.bf16 %v1637_v23, %v1626_v21  ;;  %v4828_v32 = vpack.c.bf16 %v1658_v25, %v1647_v24  ;;  %v1714_v21 = vld [vmem:[#allocation9 + $0x1dc0] sm:$0xff]  ;;  %v1725_v23 = vld [vmem:[#allocation9 + $0x1e18] sm:$0xff]  ;;  %v1735_v24 = vld [vmem:[#allocation9 + $0x1e68] sm:$0xff] }
 0x371   :  { %5037 = vmatprep.subr.bf16.mxu1 %v5036_v36  ;;  %v5052_v36 = vpack.c.bf16 %v1660_v29, %v1649_v28  ;;  %v1746_v25 = vld [vmem:[#allocation9 + $0x1ec0] sm:$0xff]  ;;  %v1737_v28 = vld [vmem:[#allocation9 + $0x1e78] sm:$0xff]  ;;  %v1748_v29 = vld [vmem:[#allocation9 + $0x1ed0] sm:$0xff] }
 0x373   :  { %4815 = vmatpush1.bf16.msra.mxu0 %v4814_v44  ;;  %v4830_v44 = vpack.c.bf16 %v1657_v34, %v1646_v33  ;;  %v1734_v33 = vld [vmem:[#allocation9 + $0x1e60] sm:$0xff]  ;;  %v1745_v34 = vld [vmem:[#allocation9 + $0x1eb8] sm:$0xff] }
 0x374   :  { %5039 = vmatpush1.bf16.msra.mxu1 %v5038_v27  ;;  %4817 = vmatprep.subr.bf16.mxu0 %v4816_v48  ;;  %v5054_v27 = vpack.c.bf16 %v1659_v38, %v1648_v35  ;;  %v4832_v48 = vpack.c.bf16 %v1680_v40, %v1669_v39  ;;  %v1736_v35 = vld [vmem:[#allocation9 + $0x1e70] sm:$0xff]  ;;  %v1747_v38 = vld [vmem:[#allocation9 + $0x1ec8] sm:$0xff]  ;;  %v1757_v39 = vld [vmem:[#allocation9 + $0x1f18] sm:$0xff] }
 0x375   :  { %5041 = vmatprep.subr.bf16.mxu1 %v5040_v54  ;;  %v5056_v54 = vpack.c.bf16 %v1682_v43, %v1671_v41  ;;  %v1768_v40 = vld [vmem:[#allocation9 + $0x1f70] sm:$0xff]  ;;  %v1759_v41 = vld [vmem:[#allocation9 + $0x1f28] sm:$0xff]  ;;  %v1770_v43 = vld [vmem:[#allocation9 + $0x1f80] sm:$0xff] }
 0x377   :  { %4819 = vmatpush1.bf16.msra.mxu0 %v4818_v52  ;;  %v4834_v52 = vpack.c.bf16 %v1679_v51, %v1668_v50  ;;  %v1756_v50 = vld [vmem:[#allocation9 + $0x1f10] sm:$0xff]  ;;  %v1767_v51 = vld [vmem:[#allocation9 + $0x1f68] sm:$0xff] }
 0x378   :  { %5043 = vmatpush1.bf16.msra.mxu1 %v5042_v59  ;;  %4821 = vmatprep.subr.bf16.mxu0 %v4820_v62  ;;  %v5058_v59 = vpack.c.bf16 %v1681_v18, %v1670_v53  ;;  %v4836_v62 = vpack.c.bf16 %v1702_v57, %v1691_v56  ;;  %v1758_v53 = vld [vmem:[#allocation9 + $0x1f20] sm:$0xff]  ;;  %v1769_v18 = vld [vmem:[#allocation9 + $0x1f78] sm:$0xff]  ;;  %v1779_v56 = vld [vmem:[#allocation9 + $0x1fc8] sm:$0xff] }
 0x379   :  { %5045 = vmatprep.subr.bf16.mxu1 %v5044_v4  ;;  %v5060_v4 = vpack.c.bf16 %v1704_v58, %v1693_v37  ;;  %v1790_v57 = vld [vmem:[#allocation9 + $0x2020] sm:$0xff]  ;;  %v1781_v37 = vld [vmem:[#allocation9 + $0x1fd8] sm:$0xff]  ;;  %v1792_v58 = vld [vmem:[#allocation9 + $0x2030] sm:$0xff] }
 0x37b   :  { %4823 = vmatpush1.bf16.msra.mxu0 %v4822_v13  ;;  %v4838_v13 = vpack.c.bf16 %v1701_v1, %v1690_v55  ;;  %v1778_v55 = vld [vmem:[#allocation9 + $0x1fc0] sm:$0xff]  ;;  %v1789_v1 = vld [vmem:[#allocation9 + $0x2018] sm:$0xff] }
 0x37c   :  { %5047 = vmatpush1.bf16.msra.mxu1 %v5046_v14  ;;  %4825 = vmatprep.subr.bf16.mxu0 %v4824_v15  ;;  %v5062_v14 = vpack.c.bf16 %v1703_v5, %v1692_v3  ;;  %v4840_v15 = vpack.c.bf16 %v1724_v8, %v1713_v6  ;;  %v1780_v3 = vld [vmem:[#allocation9 + $0x1fd0] sm:$0xff]  ;;  %v1791_v5 = vld [vmem:[#allocation9 + $0x2028] sm:$0xff]  ;;  %v1801_v6 = vld [vmem:[#allocation9 + $0x2078] sm:$0xff] }
 0x37d   :  { %5049 = vmatprep.subr.bf16.mxu1 %v5048_v22  ;;  %v5064_v22 = vpack.c.bf16 %v1726_v11, %v1715_v9  ;;  %v1812_v8 = vld [vmem:[#allocation9 + $0x20d0] sm:$0xff]  ;;  %v1803_v9 = vld [vmem:[#allocation9 + $0x2088] sm:$0xff]  ;;  %v1814_v11 = vld [vmem:[#allocation9 + $0x20e0] sm:$0xff] }
 0x37f   :  { %4827 = vmatpush1.bf16.msra.mxu0 %v4826_v30  ;;  %v4842_v30 = vpack.c.bf16 %v1723_v19, %v1712_v17  ;;  %v1800_v17 = vld [vmem:[#allocation9 + $0x2070] sm:$0xff]  ;;  %v1811_v19 = vld [vmem:[#allocation9 + $0x20c8] sm:$0xff] }
 0x380   :  { %5051 = vmatpush1.bf16.msra.mxu1 %v5050_v31  ;;  %4829 = vmatprep.subr.bf16.mxu0 %v4828_v32  ;;  %v5066_v31 = vpack.c.bf16 %v1725_v23, %v1714_v21  ;;  %v4844_v32 = vpack.c.bf16 %v1746_v25, %v1735_v24  ;;  %v1802_v21 = vld [vmem:[#allocation9 + $0x2080] sm:$0xff]  ;;  %v1813_v23 = vld [vmem:[#allocation9 + $0x20d8] sm:$0xff]  ;;  %v1823_v24 = vld [vmem:[#allocation9 + $0x2128] sm:$0xff] }
 0x381   :  { %5053 = vmatprep.subr.bf16.mxu1 %v5052_v36  ;;  %v5068_v36 = vpack.c.bf16 %v1748_v29, %v1737_v28  ;;  %v1834_v25 = vld [vmem:[#allocation9 + $0x2180] sm:$0xff]  ;;  %v1825_v28 = vld [vmem:[#allocation9 + $0x2138] sm:$0xff]  ;;  %v1836_v29 = vld [vmem:[#allocation9 + $0x2190] sm:$0xff] }
 0x383   :  { %4831 = vmatpush1.bf16.msra.mxu0 %v4830_v44  ;;  %v4846_v44 = vpack.c.bf16 %v1745_v34, %v1734_v33  ;;  %v1822_v33 = vld [vmem:[#allocation9 + $0x2120] sm:$0xff]  ;;  %v1833_v34 = vld [vmem:[#allocation9 + $0x2178] sm:$0xff] }
 0x384   :  { %5055 = vmatpush1.bf16.msra.mxu1 %v5054_v27  ;;  %4833 = vmatprep.subr.bf16.mxu0 %v4832_v48  ;;  %v5070_v27 = vpack.c.bf16 %v1747_v38, %v1736_v35  ;;  %v4848_v48 = vpack.c.bf16 %v1768_v40, %v1757_v39  ;;  %v1824_v35 = vld [vmem:[#allocation9 + $0x2130] sm:$0xff]  ;;  %v1835_v38 = vld [vmem:[#allocation9 + $0x2188] sm:$0xff]  ;;  %v1845_v39 = vld [vmem:[#allocation9 + $0x21d8] sm:$0xff] }
 0x385   :  { %5057 = vmatprep.subr.bf16.mxu1 %v5056_v54  ;;  %v5072_v54 = vpack.c.bf16 %v1770_v43, %v1759_v41  ;;  %v1856_v40 = vld [vmem:[#allocation9 + $0x2230] sm:$0xff]  ;;  %v1847_v41 = vld [vmem:[#allocation9 + $0x21e8] sm:$0xff]  ;;  %v1858_v43 = vld [vmem:[#allocation9 + $0x2240] sm:$0xff] }
 0x387   :  { %4835 = vmatpush1.bf16.msra.mxu0 %v4834_v52  ;;  %v4850_v52 = vpack.c.bf16 %v1767_v51, %v1756_v50  ;;  %v1844_v50 = vld [vmem:[#allocation9 + $0x21d0] sm:$0xff]  ;;  %v1855_v51 = vld [vmem:[#allocation9 + $0x2228] sm:$0xff] }
 0x388   :  { %5059 = vmatpush1.bf16.msra.mxu1 %v5058_v59  ;;  %4837 = vmatprep.subr.bf16.mxu0 %v4836_v62  ;;  %v5074_v59 = vpack.c.bf16 %v1769_v18, %v1758_v53  ;;  %v4852_v62 = vpack.c.bf16 %v1790_v57, %v1779_v56  ;;  %v1846_v53 = vld [vmem:[#allocation9 + $0x21e0] sm:$0xff]  ;;  %v1857_v18 = vld [vmem:[#allocation9 + $0x2238] sm:$0xff]  ;;  %v1867_v56 = vld [vmem:[#allocation9 + $0x2288] sm:$0xff] }
 0x389   :  { %5061 = vmatprep.subr.bf16.mxu1 %v5060_v4  ;;  %v5076_v4 = vpack.c.bf16 %v1792_v58, %v1781_v37  ;;  %v1878_v57 = vld [vmem:[#allocation9 + $0x22e0] sm:$0xff]  ;;  %v1869_v37 = vld [vmem:[#allocation9 + $0x2298] sm:$0xff]  ;;  %v1880_v58 = vld [vmem:[#allocation9 + $0x22f0] sm:$0xff] }
 0x38b   :  { %4839 = vmatpush1.bf16.msra.mxu0 %v4838_v13  ;;  %v4854_v13 = vpack.c.bf16 %v1789_v1, %v1778_v55  ;;  %v1866_v55 = vld [vmem:[#allocation9 + $0x2280] sm:$0xff]  ;;  %v1877_v1 = vld [vmem:[#allocation9 + $0x22d8] sm:$0xff] }
 0x38c   :  { %5063 = vmatpush1.bf16.msra.mxu1 %v5062_v14  ;;  %4841 = vmatprep.subr.bf16.mxu0 %v4840_v15  ;;  %v5078_v14 = vpack.c.bf16 %v1791_v5, %v1780_v3  ;;  %v4856_v15 = vpack.c.bf16 %v1812_v8, %v1801_v6  ;;  %v1868_v3 = vld [vmem:[#allocation9 + $0x2290] sm:$0xff]  ;;  %v1879_v5 = vld [vmem:[#allocation9 + $0x22e8] sm:$0xff]  ;;  %v1889_v6 = vld [vmem:[#allocation9 + $0x2338] sm:$0xff] }
 0x38d   :  { %5065 = vmatprep.subr.bf16.mxu1 %v5064_v22  ;;  %v5080_v22 = vpack.c.bf16 %v1814_v11, %v1803_v9  ;;  %v1900_v8 = vld [vmem:[#allocation9 + $0x2390] sm:$0xff]  ;;  %v1891_v9 = vld [vmem:[#allocation9 + $0x2348] sm:$0xff]  ;;  %v1902_v11 = vld [vmem:[#allocation9 + $0x23a0] sm:$0xff] }
 0x38f   :  { %4843 = vmatpush1.bf16.msra.mxu0 %v4842_v30  ;;  %v4858_v30 = vpack.c.bf16 %v1811_v19, %v1800_v17  ;;  %v1888_v17 = vld [vmem:[#allocation9 + $0x2330] sm:$0xff]  ;;  %v1899_v19 = vld [vmem:[#allocation9 + $0x2388] sm:$0xff] }
 0x390   :  { %5067 = vmatpush1.bf16.msra.mxu1 %v5066_v31  ;;  %4845 = vmatprep.subr.bf16.mxu0 %v4844_v32  ;;  %v5082_v31 = vpack.c.bf16 %v1813_v23, %v1802_v21  ;;  %v4860_v32 = vpack.c.bf16 %v1834_v25, %v1823_v24  ;;  %v1890_v21 = vld [vmem:[#allocation9 + $0x2340] sm:$0xff]  ;;  %v1901_v23 = vld [vmem:[#allocation9 + $0x2398] sm:$0xff]  ;;  %v1911_v24 = vld [vmem:[#allocation9 + $0x23e8] sm:$0xff] }
 0x391   :  { %5069 = vmatprep.subr.bf16.mxu1 %v5068_v36  ;;  %v5084_v36 = vpack.c.bf16 %v1836_v29, %v1825_v28  ;;  %v1922_v25 = vld [vmem:[#allocation9 + $0x2440] sm:$0xff]  ;;  %v1913_v28 = vld [vmem:[#allocation9 + $0x23f8] sm:$0xff]  ;;  %v1924_v29 = vld [vmem:[#allocation9 + $0x2450] sm:$0xff] }
 0x393   :  { %4847 = vmatpush1.bf16.msra.mxu0 %v4846_v44  ;;  %v4862_v44 = vpack.c.bf16 %v1833_v34, %v1822_v33  ;;  %v1910_v33 = vld [vmem:[#allocation9 + $0x23e0] sm:$0xff]  ;;  %v1921_v34 = vld [vmem:[#allocation9 + $0x2438] sm:$0xff] }
 0x394   :  { %5071 = vmatpush1.bf16.msra.mxu1 %v5070_v27  ;;  %4849 = vmatprep.subr.bf16.mxu0 %v4848_v48  ;;  %v5086_v27 = vpack.c.bf16 %v1835_v38, %v1824_v35  ;;  %v4864_v48 = vpack.c.bf16 %v1856_v40, %v1845_v39  ;;  %v1912_v35 = vld [vmem:[#allocation9 + $0x23f0] sm:$0xff]  ;;  %v1923_v38 = vld [vmem:[#allocation9 + $0x2448] sm:$0xff]  ;;  %v1933_v39 = vld [vmem:[#allocation9 + $0x2498] sm:$0xff] }
 0x395   :  { %5073 = vmatprep.subr.bf16.mxu1 %v5072_v54  ;;  %v5088_v54 = vpack.c.bf16 %v1858_v43, %v1847_v41  ;;  %v1944_v40 = vld [vmem:[#allocation9 + $0x24f0] sm:$0xff]  ;;  %v1935_v41 = vld [vmem:[#allocation9 + $0x24a8] sm:$0xff]  ;;  %v1946_v43 = vld [vmem:[#allocation9 + $0x2500] sm:$0xff] }
 0x397   :  { %4851 = vmatpush1.bf16.msra.mxu0 %v4850_v52  ;;  %v4866_v52 = vpack.c.bf16 %v1855_v51, %v1844_v50  ;;  %v4880_v50 = vpack.c.bf16 %v1944_v40, %v1933_v39  ;;  %v1932_v51 = vld [vmem:[#allocation9 + $0x2490] sm:$0xff]  ;;  %v771_v39 = vld [vmem:[#allocation9 + $0x48] sm:$0xff]  ;;  %v782_v40 = vld [vmem:[#allocation9 + $0xa0] sm:$0xff] }
 0x398   :  { %5075 = vmatpush1.bf16.msra.mxu1 %v5074_v59  ;;  %4853 = vmatprep.subr.bf16.mxu0 %v4852_v62  ;;  %v5090_v59 = vpack.c.bf16 %v1857_v18, %v1846_v53  ;;  %v4868_v62 = vpack.c.bf16 %v1878_v57, %v1867_v56  ;;  %v1943_v53 = vld [vmem:[#allocation9 + $0x24e8] sm:$0xff]  ;;  %v5104_v18 = vpack.c.bf16 %v1946_v43, %v1935_v41  ;;  %v1945_v56 = vld [vmem:[#allocation9 + $0x24f8] sm:$0xff]  ;;  %v948_v41 = vld [vmem:[#allocation9 + $0x5d0] sm:$0xff] }
 0x399   :  { %5077 = vmatprep.subr.bf16.mxu1 %v5076_v4  ;;  %v5092_v4 = vpack.c.bf16 %v1880_v58, %v1869_v37  ;;  %v1955_v57 = vld [vmem:[#allocation9 + $0x2548] sm:$0xff]  ;;  %v1966_v37 = vld [vmem:[#allocation9 + $0x25a0] sm:$0xff] }
 0x39a   :  { %v959_v43 = vld [vmem:[#allocation9 + $0x628] sm:$0xff] }
 0x39b   :  { %4855 = vmatpush1.bf16.msra.mxu0 %v4854_v13  ;;  %v4870_v13 = vpack.c.bf16 %v1877_v1, %v1866_v55  ;;  %v4882_v1 = vpack.c.bf16 %v1943_v53, %v1932_v51  ;;  %v781_v51 = vld [vmem:[#allocation9 + $0x98] sm:$0xff]  ;;  %v5340_v53 = vpack.c.bf16 %v959_v43, %v948_v41 }
 0x39c   :  { %5079 = vmatpush1.bf16.msra.mxu1 %v5078_v14  ;;  %4857 = vmatprep.subr.bf16.mxu0 %v4856_v15  ;;  %v5094_v14 = vpack.c.bf16 %v1879_v5, %v1868_v3  ;;  %v4872_v15 = vpack.c.bf16 %v1900_v8, %v1889_v6  ;;  %v4884_v5 = vpack.c.bf16 %v1966_v37, %v1955_v57  ;;  %v1954_v6 = vld [vmem:[#allocation9 + $0x2540] sm:$0xff]  ;;  %v1965_v8 = vld [vmem:[#allocation9 + $0x2598] sm:$0xff]  ;;  %v804_v57 = vld [vmem:[#allocation9 + $0x150] sm:$0xff] }
 0x39d   :  { %5081 = vmatprep.subr.bf16.mxu1 %v5080_v22  ;;  %v5096_v22 = vpack.c.bf16 %v1902_v11, %v1891_v9  ;;  %v1956_v9 = vld [vmem:[#allocation9 + $0x2550] sm:$0xff] }
 0x39f   :  { %4859 = vmatpush1.bf16.msra.mxu0 %v4858_v30  ;;  %v4874_v30 = vpack.c.bf16 %v1899_v19, %v1888_v17  ;;  %v1988_v17 = vld [vmem:[#allocation9 + $0x2650] sm:$0xff] }
 0x3a0   :  { %5083 = vmatpush1.bf16.msra.mxu1 %v5082_v31  ;;  %4861 = vmatprep.subr.bf16.mxu0 %v4860_v32  ;;  %v5098_v31 = vpack.c.bf16 %v1901_v23, %v1890_v21  ;;  %v4876_v32 = vpack.c.bf16 %v1922_v25, %v1911_v24  ;;  %v1979_v23 = vld [vmem:[#allocation9 + $0x2608] sm:$0xff]  ;;  %v1990_v24 = vld [vmem:[#allocation9 + $0x2660] sm:$0xff] }
 0x3a1   :  { %5085 = vmatprep.subr.bf16.mxu1 %v5084_v36  ;;  %v5100_v36 = vpack.c.bf16 %v1924_v29, %v1913_v28  ;;  %v4886_v29 = vpack.c.bf16 %v1965_v8, %v1954_v6  ;;  %v826_v6 = vld [vmem:[#allocation9 + $0x200] sm:$0xff] }
 0x3a2   :  { %2828 = vmatmul.mubr.f32.vlgmr.msra.gmra.mrb[6].mxu0 %v5857_v42 }
 0x3a3   :  { %3112 = vmatmul.mubr.f32.vlgmr.msra.gmra.mrb[8].mxu1 %v5857_v42  ;;  %4863 = vmatpush1.bf16.msra.mxu0 %v4862_v44  ;;  %v4878_v44 = vpack.c.bf16 %v1921_v34, %v1910_v33  ;;  %v1976_v33 = vld [vmem:[#allocation9 + $0x25f0] sm:$0xff]  ;;  %v1987_v34 = vld [vmem:[#allocation9 + $0x2648] sm:$0xff] }
 0x3a4   :  { %5087 = vmatpush1.bf16.msra.mxu1 %v5086_v27  ;;  %4865 = vmatprep.subr.bf16.mxu0 %v4864_v48  ;;  %v1994_v27 = vld [vmem:[#allocation10] sm:$0xff]  ;;  %v5102_v48 = vpack.c.bf16 %v1923_v38, %v1912_v35  ;;  %v1989_v38 = vld [vmem:[#allocation9 + $0x2658] sm:$0xff] }
 0x3a5   :  { %5089 = vmatprep.subr.bf16.mxu1 %v5088_v54  ;;  %2898 = vmatprep.mubr.f32.mxu0 %v5669_v0  ;;  %v1934_v54 = vld [vmem:[#allocation9 + $0x24a0] sm:$0xff]  ;;  %v2001_v58 = vrot.slane %v1994_v27, %v5794_v63  ;;  %v2005_v55 = vrot.slane %v1994_v27, %v5791_v61  ;;  %v2013_v3 = vrot.slane %v1994_v27, %v458_v47 }
 0x3a6   :  { %3182 = vmatprep.mubr.f32.mxu1 %v5669_v0  ;;  %v1978_v35 = vld [vmem:[#allocation9 + $0x2600] sm:$0xff] }
 0x3a7   :  { %4867 = vmatpush1.bf16.msra.mxu0 %v4866_v52  ;;  %v1957_v52 = vld [vmem:[#allocation9 + $0x2558] sm:$0xff] }
 0x3a8   :  { %5091 = vmatpush1.bf16.msra.mxu1 %v5090_v59  ;;  %4869 = vmatprep.subr.bf16.mxu0 %v4868_v62  ;;  %v1968_v59 = vld [vmem:[#allocation9 + $0x25b0] sm:$0xff]  ;;  %v2009_v62 = vrot.slane %v1994_v27, %v5831_v20  ;;  %v5114_v27 = vpack.c.bf16 %v1989_v38, %v1978_v35  ;;  %v870_v38 = vld [vmem:[#allocation9 + $0x360] sm:$0xff] }
 0x3a9   :  { %5093 = vmatprep.subr.bf16.mxu1 %v5092_v4  ;;  %v5106_v4 = vpack.c.bf16 %v1945_v56, %v1934_v54  ;;  %v772_v54 = vld [vmem:[#allocation9 + $0x50] sm:$0xff]  ;;  %v793_v56 = vld [vmem:[#allocation9 + $0xf8] sm:$0xff] }
 0x3ab   :  { %4871 = vmatpush1.bf16.msra.mxu0 %v4870_v13  ;;  %v5108_v13 = vpack.c.bf16 %v1968_v59, %v1957_v52  ;;  %v981_v52 = vld [vmem:[#allocation9 + $0x6d8] sm:$0xff] }
 0x3ac   :  { %5095 = vmatpush1.bf16.msra.mxu1 %v5094_v14  ;;  %4873 = vmatprep.subr.bf16.mxu0 %v4872_v15  ;;  %v1967_v14 = vld [vmem:[#allocation9 + $0x25a8] sm:$0xff]  ;;  %v1977_v15 = vld [vmem:[#allocation9 + $0x25f8] sm:$0xff] }
 0x3ad   :  { %5097 = vmatprep.subr.bf16.mxu1 %v5096_v22 }
 0x3af   :  { %4875 = vmatpush1.bf16.msra.mxu0 %v4874_v30 }
 0x3b0   :  { %5099 = vmatpush1.bf16.msra.mxu1 %v5098_v31  ;;  %4877 = vmatprep.subr.bf16.mxu0 %v4876_v32  ;;  %v5110_v31 = vpack.c.bf16 %v1967_v14, %v1956_v9  ;;  %v4888_v32 = vpack.c.bf16 %v1988_v17, %v1977_v15  ;;  %v992_v9 = vld [vmem:[#allocation9 + $0x730] sm:$0xff]  ;;  %v814_v17 = vld [vmem:[#allocation9 + $0x1a0] sm:$0xff] }
 0x3b1   :  { %5101 = vmatprep.subr.bf16.mxu1 %v5100_v36  ;;  %v5112_v36 = vpack.c.bf16 %v1990_v24, %v1979_v23  ;;  %v827_v23 = vld [vmem:[#allocation9 + $0x208] sm:$0xff]  ;;  %v837_v24 = vld [vmem:[#allocation9 + $0x258] sm:$0xff] }
 0x3b3   :  { %4879 = vmatpush1.bf16.msra.mxu0 %v4878_v44  ;;  %v4890_v44 = vpack.c.bf16 %v1987_v34, %v1976_v33  ;;  %v847_v33 = vld [vmem:[#allocation9 + $0x2a8] sm:$0xff]  ;;  %v838_v34 = vld [vmem:[#allocation9 + $0x260] sm:$0xff] }
 0x3b4   :  { %5103 = vmatpush1.bf16.msra.mxu1 %v5102_v48  ;;  %4881 = vmatprep.subr.bf16.mxu0 %v4880_v50  ;;  %v5116_v48 = vpack.c.bf16 %v782_v40, %v771_v39  ;;  %v770_v50 = vld [vmem:[#allocation9 + $0x40] sm:$0xff]  ;;  %v1036_v39 = vld [vmem:[#allocation9 + $0x890] sm:$0xff]  ;;  %v1047_v40 = vld [vmem:[#allocation9 + $0x8e8] sm:$0xff] }
 0x3b5   :  { %v2332_v11 = vpop.f32.mrb[4].mxu0  ;;  %5105 = vmatprep.subr.bf16.mxu1 %v5104_v18  ;;  %v783_v18 = vld [vmem:[#allocation9 + $0xa8] sm:$0xff]  ;;  %v5118_v37 = vpack.c.bf16 %v781_v51, %v770_v50  ;;  %v860_v50 = vld [vmem:[#allocation9 + $0x310] sm:$0xff]  ;;  %v5356_v51 = vpack.c.bf16 %v1047_v40, %v1036_v39 }
 0x3b6   :  { %v5460_v19 = vadd.f32 %v2332_v11, %v2001_v58  ;;  %v2616_v21 = vpop.f32.mrb[6].mxu1  ;;  %v2334_v22 = vpop.f32.mrb[5].mxu0  ;;  %v970_v58 = vld [vmem:[#allocation9 + $0x680] sm:$0xff]  ;;  %v5342_v59 = vpack.c.bf16 %v783_v18, %v772_v54  ;;  %v1003_v11 = vld [vmem:[#allocation9 + $0x788] sm:$0xff]  ;;  %v881_v54 = vld [vmem:[#allocation9 + $0x3b8] sm:$0xff] }
 0x3b7   :  { %v5462_v25 = vadd.f32 %v2616_v21, %v2009_v62  ;;  %v5461_v28 = vadd.f32 %v2334_v22, %v2005_v55  ;;  %v2618_v47 = vpop.f32.mrb[7].mxu1  ;;  %4883 = vmatpush1.bf16.msra.mxu0 %v4882_v1  ;;  %v792_v62 = vld [vmem:[#allocation9 + $0xf0] sm:$0xff]  ;;  %v803_v55 = vld [vmem:[#allocation9 + $0x148] sm:$0xff]  ;;  %v794_v1 = vld [vmem:[#allocation9 + $0x100] sm:$0xff]  ;;  %v5344_v8 = vpack.c.bf16 %v981_v52, %v970_v58  ;;  %v5348_v22 = vpack.c.bf16 %v1003_v11, %v992_v9 }
 0x3b8   :  { %3753 = vst [vmem:[%s5967_s7] sm:$0xff] %v5460_v19  ;;  %v5463_v30 = vadd.f32 %v2618_v47, %v2013_v3  ;;  %5107 = vmatpush1.bf16.msra.mxu1 %v5106_v4  ;;  %4885 = vmatprep.subr.bf16.mxu0 %v4884_v5  ;;  %v5120_v3 = vpack.c.bf16 %v804_v57, %v793_v56  ;;  %v805_v4 = vld [vmem:[#allocation9 + $0x158] sm:$0xff]  ;;  %v815_v5 = vld [vmem:[#allocation9 + $0x1a8] sm:$0xff]  ;;  %v816_v21 = vld [vmem:[#allocation9 + $0x1b0] sm:$0xff] }
 0x3b9   :  { %3755 = vst [vmem:[%s5967_s7 + $0x10] sm:$0xff] %v5462_v25  ;;  %3754 = vst [vmem:[%s5967_s7 + $0x8] sm:$0xff] %v5461_v28  ;;  %5109 = vmatprep.subr.bf16.mxu1 %v5108_v13  ;;  %v5122_v13 = vpack.c.bf16 %v803_v55, %v792_v62  ;;  %v5346_v14 = vpack.c.bf16 %v805_v4, %v794_v1  ;;  %v5124_v15 = vpack.c.bf16 %v826_v6, %v815_v5  ;;  %v825_v19 = vld [vmem:[#allocation9 + $0x1f8] sm:$0xff]  ;;  %v848_v25 = vld [vmem:[#allocation9 + $0x2b0] sm:$0xff] }
 0x3ba   :  { %3756 = vst [vmem:[%s5967_s7 + $0x18] sm:$0xff] %v5463_v30  ;;  %v1014_v28 = vld [vmem:[#allocation9 + $0x7e0] sm:$0xff]  ;;  %v1025_v47 = vld [vmem:[#allocation9 + $0x838] sm:$0xff]  ;;  %v5350_v30 = vpack.c.bf16 %v827_v23, %v816_v21  ;;  %v892_v18 = vld [vmem:[#allocation9 + $0x410] sm:$0xff] }
 0x3bb   :  { %4887 = vmatpush1.bf16.msra.mxu0 %v4886_v29  ;;  %v5126_v29 = vpack.c.bf16 %v825_v19, %v814_v17  ;;  %v5352_v35 = vpack.c.bf16 %v1025_v47, %v1014_v28  ;;  %v1058_v56 = vld [vmem:[#allocation9 + $0x940] sm:$0xff]  ;;  %v1069_v57 = vld [vmem:[#allocation9 + $0x998] sm:$0xff]  ;;  %v5136_v52 = vpack.c.bf16 %v892_v18, %v881_v54  ;;  %v891_v62 = vld [vmem:[#allocation9 + $0x408] sm:$0xff] }
 0x3bc   :  { %5111 = vmatpush1.bf16.msra.mxu1 %v5110_v31  ;;  %4889 = vmatprep.subr.bf16.mxu0 %v4888_v32  ;;  %v5128_v31 = vpack.c.bf16 %v848_v25, %v837_v24  ;;  %v836_v32 = vld [vmem:[#allocation9 + $0x250] sm:$0xff]  ;;  %v882_v55 = vld [vmem:[#allocation9 + $0x3c0] sm:$0xff]  ;;  %v5360_v1 = vpack.c.bf16 %v1069_v57, %v1058_v56  ;;  %v903_v4 = vld [vmem:[#allocation9 + $0x468] sm:$0xff] }
 0x3bd   :  { %5113 = vmatprep.subr.bf16.mxu1 %v5112_v36  ;;  %v859_v36 = vld [vmem:[#allocation9 + $0x308] sm:$0xff]  ;;  %v5130_v41 = vpack.c.bf16 %v847_v33, %v836_v32  ;;  %v914_v5 = vld [vmem:[#allocation9 + $0x4c0] sm:$0xff]  ;;  %v1080_v6 = vld [vmem:[#allocation9 + $0x9f0] sm:$0xff] }
 0x3be   :  { %v904_v17 = vld [vmem:[#allocation9 + $0x470] sm:$0xff]  ;;  %v915_v21 = vld [vmem:[#allocation9 + $0x4c8] sm:$0xff]  ;;  %v1102_v24 = vld [vmem:[#allocation9 + $0xaa0] sm:$0xff] }
 0x3bf   :  { %4891 = vmatpush1.bf16.msra.mxu0 %v4890_v44  ;;  %v5132_v44 = vpack.c.bf16 %v870_v38, %v859_v36  ;;  %v936_v23 = vld [vmem:[#allocation9 + $0x570] sm:$0xff]  ;;  %v1113_v25 = vld [vmem:[#allocation9 + $0xaf8] sm:$0xff]  ;;  %v5366_v47 = vpack.c.bf16 %v915_v21, %v904_v17  ;;  %v926_v32 = vld [vmem:[#allocation9 + $0x520] sm:$0xff] }
 0x3c0   :  { %5115 = vmatpush1.bf16.msra.mxu1 %v5114_v27  ;;  %5117 = vmatprep.subr.bf16.mxu0 %v5116_v48  ;;  %v858_v27 = vld [vmem:[#allocation9 + $0x300] sm:$0xff]  ;;  %v869_v48 = vld [vmem:[#allocation9 + $0x358] sm:$0xff]  ;;  %v5368_v33 = vpack.c.bf16 %v1113_v25, %v1102_v24  ;;  %v1300_v36 = vld [vmem:[#allocation9 + $0x10d0] sm:$0xff] }
 0x3c1   :  { %5341 = vmatprep.subr.bf16.mxu1 %v5340_v53  ;;  %v871_v53 = vld [vmem:[#allocation9 + $0x368] sm:$0xff]  ;;  %v1322_v54 = vld [vmem:[#allocation9 + $0x1180] sm:$0xff]  ;;  %v1333_v18 = vld [vmem:[#allocation9 + $0x11d8] sm:$0xff] }
 0x3c2   :  { %2899 = vmatmul.mubr.f32.vlgmr.msra.gmra.mrb[6].mxu0 %v5868_v45  ;;  %v5358_v58 = vpack.c.bf16 %v871_v53, %v860_v50  ;;  %v1311_v38 = vld [vmem:[#allocation9 + $0x1128] sm:$0xff]  ;;  %v980_v53 = vld [vmem:[#allocation9 + $0x6d0] sm:$0xff] }
 0x3c3   :  { %3183 = vmatmul.mubr.f32.vlgmr.msra.gmra.mrb[8].mxu1 %v5868_v45  ;;  %5119 = vmatpush1.bf16.msra.mxu0 %v5118_v37  ;;  %v5134_v37 = vpack.c.bf16 %v869_v48, %v858_v27  ;;  %v5372_v27 = vpack.c.bf16 %v1311_v38, %v1300_v36  ;;  %v1124_v48 = vld [vmem:[#allocation9 + $0xb50] sm:$0xff]  ;;  %v1135_v50 = vld [vmem:[#allocation9 + $0xba8] sm:$0xff] }
 0x3c4   :  { %3253 = vmatprep.mubr.f32.mxu0 %v5816_v2  ;;  %5343 = vmatpush3.bf16.msra.mxu1 %v5342_v59  ;;  %v880_v59 = vld [vmem:[#allocation9 + $0x3b0] sm:$0xff]  ;;  %v5374_v57 = vpack.c.bf16 %v1135_v50, %v1124_v48  ;;  %v1179_v17 = vld [vmem:[#allocation9 + $0xd08] sm:$0xff]  ;;  %v1057_v48 = vld [vmem:[#allocation9 + $0x938] sm:$0xff] }
 0x3c5   :  { %3537 = vmatprep.mubr.f32.mxu1 %v5816_v2  ;;  %5121 = vmatprep.subr.bf16.mxu0 %v5120_v3  ;;  %v849_v2 = vld [vmem:[#allocation9 + $0x2b8] sm:$0xff]  ;;  %v5138_v9 = vpack.c.bf16 %v891_v62, %v880_v59  ;;  %v5376_v62 = vpack.c.bf16 %v1333_v18, %v1322_v54  ;;  %v1024_v21 = vld [vmem:[#allocation9 + $0x830] sm:$0xff] }
 0x3c6   :  { %5345 = vmatprep.subr.bf16.mxu1 %v5344_v8  ;;  %v5354_v43 = vpack.c.bf16 %v849_v2, %v838_v34  ;;  %v893_v3 = vld [vmem:[#allocation9 + $0x418] sm:$0xff]  ;;  %v1091_v8 = vld [vmem:[#allocation9 + $0xa48] sm:$0xff]  ;;  %v958_v2 = vld [vmem:[#allocation9 + $0x620] sm:$0xff] }
 0x3c7   :  { %5123 = vmatpush1.bf16.msra.mxu0 %v5122_v13  ;;  %v5362_v11 = vpack.c.bf16 %v893_v3, %v882_v55  ;;  %v5140_v13 = vpack.c.bf16 %v914_v5, %v903_v4  ;;  %v5364_v19 = vpack.c.bf16 %v1091_v8, %v1080_v6  ;;  %v937_v34 = vld [vmem:[#allocation9 + $0x578] sm:$0xff]  ;;  %v1002_v3 = vld [vmem:[#allocation9 + $0x780] sm:$0xff]  ;;  %v1344_v4 = vld [vmem:[#allocation9 + $0x1230] sm:$0xff] }
 0x3c8   :  { %5347 = vmatpush3.bf16.msra.mxu1 %v5346_v14  ;;  %5125 = vmatprep.subr.bf16.mxu0 %v5124_v15  ;;  %v902_v14 = vld [vmem:[#allocation9 + $0x460] sm:$0xff]  ;;  %v913_v15 = vld [vmem:[#allocation9 + $0x4b8] sm:$0xff]  ;;  %v5370_v40 = vpack.c.bf16 %v937_v34, %v926_v32  ;;  %v1355_v5 = vld [vmem:[#allocation9 + $0x1288] sm:$0xff] }
 0x3c9   :  { %5349 = vmatprep.subr.bf16.mxu1 %v5348_v22  ;;  %v925_v22 = vld [vmem:[#allocation9 + $0x518] sm:$0xff]  ;;  %v5142_v28 = vpack.c.bf16 %v913_v15, %v902_v14  ;;  %v1168_v14 = vld [vmem:[#allocation9 + $0xcb0] sm:$0xff]  ;;  %v5380_v15 = vpack.c.bf16 %v1355_v5, %v1344_v4  ;;  %v1046_v34 = vld [vmem:[#allocation9 + $0x8e0] sm:$0xff] }
 0x3ca   :  { %v1157_v55 = vld [vmem:[#allocation9 + $0xc58] sm:$0xff]  ;;  %v5382_v25 = vpack.c.bf16 %v1179_v17, %v1168_v14  ;;  %v1068_v50 = vld [vmem:[#allocation9 + $0x990] sm:$0xff]  ;;  %v1267_v14 = vld [vmem:[#allocation9 + $0xfc8] sm:$0xff] }
 0x3cb   :  { %5127 = vmatpush1.bf16.msra.mxu0 %v5126_v29  ;;  %v5144_v29 = vpack.c.bf16 %v936_v23, %v925_v22  ;;  %v1366_v22 = vld [vmem:[#allocation9 + $0x12e0] sm:$0xff]  ;;  %v1377_v23 = vld [vmem:[#allocation9 + $0x1338] sm:$0xff]  ;;  %v1112_v17 = vld [vmem:[#allocation9 + $0xaf0] sm:$0xff] }
 0x3cc   :  { %5351 = vmatpush3.bf16.msra.mxu1 %v5350_v30  ;;  %5129 = vmatprep.subr.bf16.mxu0 %v5128_v31  ;;  %v924_v30 = vld [vmem:[#allocation9 + $0x510] sm:$0xff]  ;;  %v935_v31 = vld [vmem:[#allocation9 + $0x568] sm:$0xff]  ;;  %v1201_v32 = vld [vmem:[#allocation9 + $0xdb8] sm:$0xff] }
 0x3cd   :  { %5353 = vmatprep.subr.bf16.mxu1 %v5352_v35  ;;  %v947_v35 = vld [vmem:[#allocation9 + $0x5c8] sm:$0xff]  ;;  %v5146_v39 = vpack.c.bf16 %v935_v31, %v924_v30  ;;  %v1190_v30 = vld [vmem:[#allocation9 + $0xd60] sm:$0xff]  ;;  %v5384_v31 = vpack.c.bf16 %v1377_v23, %v1366_v22 }
 0x3ce   :  { %v5386_v38 = vpack.c.bf16 %v1201_v32, %v1190_v30  ;;  %v1289_v30 = vld [vmem:[#allocation9 + $0x1078] sm:$0xff]  ;;  %v1134_v32 = vld [vmem:[#allocation9 + $0xba0] sm:$0xff] }
 0x3cf   :  { %5131 = vmatpush1.bf16.msra.mxu0 %v5130_v41  ;;  %v5148_v41 = vpack.c.bf16 %v958_v2, %v947_v35  ;;  %v1388_v35 = vld [vmem:[#allocation9 + $0x1390] sm:$0xff]  ;;  %v1399_v2 = vld [vmem:[#allocation9 + $0x13e8] sm:$0xff] }
 0x3d0   :  { %5355 = vmatpush3.bf16.msra.mxu1 %v5354_v43  ;;  %5133 = vmatprep.subr.bf16.mxu0 %v5132_v44  ;;  %v946_v43 = vld [vmem:[#allocation9 + $0x5c0] sm:$0xff]  ;;  %v957_v44 = vld [vmem:[#allocation9 + $0x618] sm:$0xff] }
 0x3d1   :  { %5357 = vmatprep.subr.bf16.mxu1 %v5356_v51  ;;  %v969_v51 = vld [vmem:[#allocation9 + $0x678] sm:$0xff]  ;;  %v5150_v56 = vpack.c.bf16 %v957_v44, %v946_v43  ;;  %v1212_v43 = vld [vmem:[#allocation9 + $0xe10] sm:$0xff]  ;;  %v5388_v44 = vpack.c.bf16 %v1399_v2, %v1388_v35 }
 0x3d2   :  { %v5152_v59 = vpack.c.bf16 %v980_v53, %v969_v51  ;;  %v1410_v51 = vld [vmem:[#allocation9 + $0x1440] sm:$0xff]  ;;  %v1421_v53 = vld [vmem:[#allocation9 + $0x1498] sm:$0xff] }
 0x3d3   :  { %5135 = vmatpush1.bf16.msra.mxu0 %v5134_v37  ;;  %v968_v37 = vld [vmem:[#allocation9 + $0x670] sm:$0xff] }
 0x3d4   :  { %5359 = vmatpush3.bf16.msra.mxu1 %v5358_v58  ;;  %5137 = vmatprep.subr.bf16.mxu0 %v5136_v52  ;;  %v979_v58 = vld [vmem:[#allocation9 + $0x6c8] sm:$0xff]  ;;  %v1146_v52 = vld [vmem:[#allocation9 + $0xc00] sm:$0xff] }
 0x3d5   :  { %5361 = vmatprep.subr.bf16.mxu1 %v5360_v1  ;;  %v991_v1 = vld [vmem:[#allocation9 + $0x728] sm:$0xff]  ;;  %v5154_v6 = vpack.c.bf16 %v979_v58, %v968_v37  ;;  %v5378_v8 = vpack.c.bf16 %v1157_v55, %v1146_v52  ;;  %v1234_v58 = vld [vmem:[#allocation9 + $0xec0] sm:$0xff]  ;;  %v5392_v52 = vpack.c.bf16 %v1421_v53, %v1410_v51  ;;  %v1685_v51 = vld [vmem:[#allocation9 + $0x1cd8] sm:$0xff] }
 0x3d6   :  { %v1067_v37 = vld [vmem:[#allocation9 + $0x988] sm:$0xff]  ;;  %v1090_v55 = vld [vmem:[#allocation9 + $0xa40] sm:$0xff] }
 0x3d7   :  { %5139 = vmatpush1.bf16.msra.mxu0 %v5138_v9  ;;  %v5156_v9 = vpack.c.bf16 %v1002_v3, %v991_v1  ;;  %v1432_v1 = vld [vmem:[#allocation9 + $0x14f0] sm:$0xff]  ;;  %v1443_v3 = vld [vmem:[#allocation9 + $0x1548] sm:$0xff] }
 0x3d8   :  { %5363 = vmatpush3.bf16.msra.mxu1 %v5362_v11  ;;  %5141 = vmatprep.subr.bf16.mxu0 %v5140_v13  ;;  %v990_v11 = vld [vmem:[#allocation9 + $0x720] sm:$0xff]  ;;  %v1001_v13 = vld [vmem:[#allocation9 + $0x778] sm:$0xff] }
 0x3d9   :  { %5365 = vmatprep.subr.bf16.mxu1 %v5364_v19  ;;  %v1013_v19 = vld [vmem:[#allocation9 + $0x7d8] sm:$0xff]  ;;  %v5158_v24 = vpack.c.bf16 %v1001_v13, %v990_v11  ;;  %v1256_v11 = vld [vmem:[#allocation9 + $0xf70] sm:$0xff]  ;;  %v5396_v13 = vpack.c.bf16 %v1443_v3, %v1432_v1 }
 0x3da   :  { %v5398_v23 = vpack.c.bf16 %v1267_v14, %v1256_v11  ;;  %v1189_v11 = vld [vmem:[#allocation9 + $0xd58] sm:$0xff]  ;;  %v1718_v14 = vld [vmem:[#allocation9 + $0x1de0] sm:$0xff] }
 0x3db   :  { %5143 = vmatpush1.bf16.msra.mxu0 %v5142_v28  ;;  %v5160_v28 = vpack.c.bf16 %v1024_v21, %v1013_v19  ;;  %v1454_v19 = vld [vmem:[#allocation9 + $0x15a0] sm:$0xff]  ;;  %v1465_v21 = vld [vmem:[#allocation9 + $0x15f8] sm:$0xff] }
 0x3dc   :  { %5367 = vmatpush3.bf16.msra.mxu1 %v5366_v47  ;;  %5145 = vmatprep.subr.bf16.mxu0 %v5144_v29  ;;  %v1012_v47 = vld [vmem:[#allocation9 + $0x7d0] sm:$0xff]  ;;  %v1023_v29 = vld [vmem:[#allocation9 + $0x828] sm:$0xff] }
 0x3dd   :  { %5369 = vmatprep.subr.bf16.mxu1 %v5368_v33  ;;  %v1035_v33 = vld [vmem:[#allocation9 + $0x888] sm:$0xff]  ;;  %v5162_v36 = vpack.c.bf16 %v1023_v29, %v1012_v47  ;;  %v1278_v47 = vld [vmem:[#allocation9 + $0x1020] sm:$0xff]  ;;  %v5400_v29 = vpack.c.bf16 %v1465_v21, %v1454_v19  ;;  %v1188_v21 = vld [vmem:[#allocation9 + $0xd50] sm:$0xff] }
 0x3de   :  { %v5402_v2 = vpack.c.bf16 %v1289_v30, %v1278_v47  ;;  %v1222_v47 = vld [vmem:[#allocation9 + $0xe60] sm:$0xff]  ;;  %v1751_v30 = vld [vmem:[#allocation9 + $0x1ee8] sm:$0xff] }
 0x3df   :  { %5147 = vmatpush1.bf16.msra.mxu0 %v5146_v39  ;;  %v5164_v39 = vpack.c.bf16 %v1046_v34, %v1035_v33  ;;  %v1652_v33 = vld [vmem:[#allocation9 + $0x1bd0] sm:$0xff]  ;;  %v1663_v34 = vld [vmem:[#allocation9 + $0x1c28] sm:$0xff] }
 0x3e0   :  { %5371 = vmatpush3.bf16.msra.mxu1 %v5370_v40  ;;  %5149 = vmatprep.subr.bf16.mxu0 %v5148_v41  ;;  %v1034_v40 = vld [vmem:[#allocation9 + $0x880] sm:$0xff]  ;;  %v1045_v41 = vld [vmem:[#allocation9 + $0x8d8] sm:$0xff] }
 0x3e1   :  { %5373 = vmatprep.subr.bf16.mxu1 %v5372_v27  ;;  %v1223_v27 = vld [vmem:[#allocation9 + $0xe68] sm:$0xff]  ;;  %v5166_v54 = vpack.c.bf16 %v1045_v41, %v1034_v40  ;;  %v5404_v40 = vpack.c.bf16 %v1663_v34, %v1652_v33  ;;  %v1476_v41 = vld [vmem:[#allocation9 + $0x1650] sm:$0xff]  ;;  %v1210_v34 = vld [vmem:[#allocation9 + $0xe00] sm:$0xff] }
 0x3e2   :  { %v5390_v18 = vpack.c.bf16 %v1223_v27, %v1212_v43  ;;  %v1487_v43 = vld [vmem:[#allocation9 + $0x16a8] sm:$0xff]  ;;  %v1156_v27 = vld [vmem:[#allocation9 + $0xc50] sm:$0xff] }
 0x3e3   :  { %3538 = vmatmul.mubr.f32.vlgmr.msra.gmra.mrb[10].mxu1 %v5818_v7  ;;  %5151 = vmatpush1.bf16.msra.mxu0 %v5150_v56  ;;  %v5168_v56 = vpack.c.bf16 %v1068_v50, %v1057_v48  ;;  %v1674_v50 = vld [vmem:[#allocation9 + $0x1c80] sm:$0xff]  ;;  %v5406_v53 = vpack.c.bf16 %v1487_v43, %v1476_v41  ;;  %v1773_v43 = vld [vmem:[#allocation9 + $0x1f98] sm:$0xff] }
 0x3e4   :  { %5375 = vmatpush3.bf16.msra.mxu1 %v5374_v57  ;;  %3607 = vmatprep.mubr.f32.mxu1 %v5822_v16  ;;  %v1056_v57 = vld [vmem:[#allocation9 + $0x930] sm:$0xff]  ;;  %v1762_v41 = vld [vmem:[#allocation9 + $0x1f40] sm:$0xff] }
 0x3e5   :  { %5153 = vmatprep.subr.bf16.mxu0 %v5152_v59  ;;  %5377 = vmatprep.subr.bf16.mxu1 %v5376_v62  ;;  %v1245_v59 = vld [vmem:[#allocation9 + $0xf18] sm:$0xff]  ;;  %v1079_v62 = vld [vmem:[#allocation9 + $0x9e8] sm:$0xff]  ;;  %v5170_v4 = vpack.c.bf16 %v1067_v37, %v1056_v57 }
 0x3e6   :  { %v5394_v5 = vpack.c.bf16 %v1245_v59, %v1234_v58  ;;  %v1509_v37 = vld [vmem:[#allocation9 + $0x1758] sm:$0xff]  ;;  %v1167_v58 = vld [vmem:[#allocation9 + $0xca8] sm:$0xff]  ;;  %v5408_v59 = vpack.c.bf16 %v1685_v51, %v1674_v50  ;;  %v1232_v50 = vld [vmem:[#allocation9 + $0xeb0] sm:$0xff] }
 0x3e7   :  { %5155 = vmatpush1.bf16.msra.mxu0 %v5154_v6  ;;  %v5172_v6 = vpack.c.bf16 %v1090_v55, %v1079_v62  ;;  %v1696_v62 = vld [vmem:[#allocation9 + $0x1d30] sm:$0xff]  ;;  %v1707_v55 = vld [vmem:[#allocation9 + $0x1d88] sm:$0xff] }
 0x3e8   :  { %5379 = vmatpush3.bf16.msra.mxu1 %v5378_v8  ;;  %5157 = vmatprep.subr.bf16.mxu0 %v5156_v9  ;;  %v1078_v8 = vld [vmem:[#allocation9 + $0x9e0] sm:$0xff]  ;;  %v1089_v9 = vld [vmem:[#allocation9 + $0xa38] sm:$0xff]  ;;  %v1243_v51 = vld [vmem:[#allocation9 + $0xf08] sm:$0xff] }
 0x3e9   :  { %5381 = vmatprep.subr.bf16.mxu1 %v5380_v15  ;;  %v1101_v15 = vld [vmem:[#allocation9 + $0xa98] sm:$0xff]  ;;  %v5174_v22 = vpack.c.bf16 %v1089_v9, %v1078_v8  ;;  %v1520_v8 = vld [vmem:[#allocation9 + $0x17b0] sm:$0xff]  ;;  %v5412_v9 = vpack.c.bf16 %v1707_v55, %v1696_v62  ;;  %v1254_v55 = vld [vmem:[#allocation9 + $0xf60] sm:$0xff] }
 0x3eb   :  { %5159 = vmatpush1.bf16.msra.mxu0 %v5158_v24  ;;  %v5176_v24 = vpack.c.bf16 %v1112_v17, %v1101_v15  ;;  %v1729_v15 = vld [vmem:[#allocation9 + $0x1e38] sm:$0xff] }
 0x3ec   :  { %5383 = vmatpush3.bf16.msra.mxu1 %v5382_v25  ;;  %5161 = vmatprep.subr.bf16.mxu0 %v5160_v28  ;;  %v1100_v25 = vld [vmem:[#allocation9 + $0xa90] sm:$0xff]  ;;  %v1111_v28 = vld [vmem:[#allocation9 + $0xae8] sm:$0xff] }
 0x3ed   :  { %5385 = vmatprep.subr.bf16.mxu1 %v5384_v31  ;;  %v1123_v31 = vld [vmem:[#allocation9 + $0xb48] sm:$0xff]  ;;  %v5178_v35 = vpack.c.bf16 %v1111_v28, %v1100_v25  ;;  %v1553_v25 = vld [vmem:[#allocation9 + $0x18b8] sm:$0xff] }
 0x3ee   :  { %v1211_v28 = vld [vmem:[#allocation9 + $0xe08] sm:$0xff] }
 0x3ef   :  { %5163 = vmatpush1.bf16.msra.mxu0 %v5162_v36  ;;  %v5180_v36 = vpack.c.bf16 %v1134_v32, %v1123_v31  ;;  %v5196_v33 = vpack.c.bf16 %v1222_v47, %v1211_v28  ;;  %v1298_v47 = vld [vmem:[#allocation9 + $0x10c0] sm:$0xff] }
 0x3f0   :  { %5387 = vmatpush3.bf16.msra.mxu1 %v5386_v38  ;;  %5165 = vmatprep.subr.bf16.mxu0 %v5164_v39  ;;  %v1122_v38 = vld [vmem:[#allocation9 + $0xb40] sm:$0xff]  ;;  %v1133_v39 = vld [vmem:[#allocation9 + $0xb98] sm:$0xff] }
 0x3f1   :  { %5389 = vmatprep.subr.bf16.mxu1 %v5388_v44  ;;  %v1145_v44 = vld [vmem:[#allocation9 + $0xbf8] sm:$0xff]  ;;  %v5182_v48 = vpack.c.bf16 %v1133_v39, %v1122_v38  ;;  %v1575_v38 = vld [vmem:[#allocation9 + $0x1968] sm:$0xff] }
 0x3f2   :  { %v5184_v57 = vpack.c.bf16 %v1156_v27, %v1145_v44  ;;  %v1233_v39 = vld [vmem:[#allocation9 + $0xeb8] sm:$0xff] }
 0x3f3   :  { %5167 = vmatpush1.bf16.msra.mxu0 %v5166_v54  ;;  %v1144_v54 = vld [vmem:[#allocation9 + $0xbf0] sm:$0xff] }
 0x3f4   :  { %5391 = vmatpush3.bf16.msra.mxu1 %v5390_v18  ;;  %5169 = vmatprep.subr.bf16.mxu0 %v5168_v56  ;;  %v1155_v18 = vld [vmem:[#allocation9 + $0xc48] sm:$0xff]  ;;  %v1498_v56 = vld [vmem:[#allocation9 + $0x1700] sm:$0xff] }
 0x3f5   :  { %5393 = vmatprep.subr.bf16.mxu1 %v5392_v52  ;;  %v1178_v52 = vld [vmem:[#allocation9 + $0xd00] sm:$0xff]  ;;  %v5186_v1 = vpack.c.bf16 %v1155_v18, %v1144_v54  ;;  %v5410_v3 = vpack.c.bf16 %v1509_v37, %v1498_v56  ;;  %v5424_v54 = vpack.c.bf16 %v1773_v43, %v1762_v41  ;;  %v1597_v18 = vld [vmem:[#allocation9 + $0x1a18] sm:$0xff]  ;;  %v1255_v56 = vld [vmem:[#allocation9 + $0xf68] sm:$0xff] }
 0x3f6   :  { %v1784_v37 = vld [vmem:[#allocation9 + $0x1ff0] sm:$0xff]  ;;  %v1861_v41 = vld [vmem:[#allocation9 + $0x2258] sm:$0xff]  ;;  %v1343_v43 = vld [vmem:[#allocation9 + $0x1228] sm:$0xff] }
 0x3f7   :  { %5171 = vmatpush1.bf16.msra.mxu0 %v5170_v4  ;;  %v5188_v4 = vpack.c.bf16 %v1178_v52, %v1167_v58  ;;  %v1795_v58 = vld [vmem:[#allocation9 + $0x2048] sm:$0xff]  ;;  %v5202_v52 = vpack.c.bf16 %v1243_v51, %v1232_v50  ;;  %v1342_v51 = vld [vmem:[#allocation9 + $0x1220] sm:$0xff] }
 0x3f8   :  { %5395 = vmatpush3.bf16.msra.mxu1 %v5394_v5  ;;  %5173 = vmatprep.subr.bf16.mxu0 %v5172_v6  ;;  %v1166_v5 = vld [vmem:[#allocation9 + $0xca0] sm:$0xff]  ;;  %v1177_v6 = vld [vmem:[#allocation9 + $0xcf8] sm:$0xff] }
 0x3f9   :  { %5397 = vmatprep.subr.bf16.mxu1 %v5396_v13  ;;  %v1200_v13 = vld [vmem:[#allocation9 + $0xdb0] sm:$0xff]  ;;  %v5190_v17 = vpack.c.bf16 %v1177_v6, %v1166_v5  ;;  %v1619_v5 = vld [vmem:[#allocation9 + $0x1ac8] sm:$0xff]  ;;  %v1277_v6 = vld [vmem:[#allocation9 + $0x1018] sm:$0xff] }
 0x3fa   :  { %v5192_v19 = vpack.c.bf16 %v1200_v13, %v1189_v11 }
 0x3fb   :  { %5175 = vmatpush1.bf16.msra.mxu0 %v5174_v22  ;;  %v1199_v22 = vld [vmem:[#allocation9 + $0xda8] sm:$0xff] }
 0x3fc   :  { %5399 = vmatpush3.bf16.msra.mxu1 %v5398_v23  ;;  %5177 = vmatprep.subr.bf16.mxu0 %v5176_v24  ;;  %v1542_v23 = vld [vmem:[#allocation9 + $0x1860] sm:$0xff]  ;;  %v5416_v24 = vpack.c.bf16 %v1729_v15, %v1718_v14  ;;  %v5194_v31 = vpack.c.bf16 %v1199_v22, %v1188_v21  ;;  %v1276_v15 = vld [vmem:[#allocation9 + $0x1010] sm:$0xff]  ;;  %v1641_v21 = vld [vmem:[#allocation9 + $0x1b78] sm:$0xff] }
 0x3fd   :  { %5401 = vmatprep.subr.bf16.mxu1 %v5400_v29  ;;  %v1740_v29 = vld [vmem:[#allocation9 + $0x1e90] sm:$0xff]  ;;  %v5418_v32 = vpack.c.bf16 %v1553_v25, %v1542_v23  ;;  %v1299_v22 = vld [vmem:[#allocation9 + $0x10c8] sm:$0xff]  ;;  %v1310_v23 = vld [vmem:[#allocation9 + $0x1120] sm:$0xff] }
 0x3fe   :  { %v5212_v28 = vpack.c.bf16 %v1310_v23, %v1299_v22  ;;  %v1419_v22 = vld [vmem:[#allocation9 + $0x1488] sm:$0xff]  ;;  %v1938_v23 = vld [vmem:[#allocation9 + $0x24c0] sm:$0xff] }
 0x3ff   :  { %5179 = vmatpush1.bf16.msra.mxu0 %v5178_v35  ;;  %v1221_v35 = vld [vmem:[#allocation9 + $0xe58] sm:$0xff] }
 0x400   :  { %5403 = vmatpush3.bf16.msra.mxu1 %v5402_v2  ;;  %5181 = vmatprep.subr.bf16.mxu0 %v5180_v36  ;;  %v1564_v2 = vld [vmem:[#allocation9 + $0x1910] sm:$0xff]  ;;  %v5420_v36 = vpack.c.bf16 %v1751_v30, %v1740_v29  ;;  %v5198_v44 = vpack.c.bf16 %v1221_v35, %v1210_v34  ;;  %v1309_v29 = vld [vmem:[#allocation9 + $0x1118] sm:$0xff] }
 0x401   :  { %5405 = vmatprep.subr.bf16.mxu1 %v5404_v40  ;;  %v1244_v40 = vld [vmem:[#allocation9 + $0xf10] sm:$0xff]  ;;  %v5422_v27 = vpack.c.bf16 %v1575_v38, %v1564_v2  ;;  %v5214_v34 = vpack.c.bf16 %v1309_v29, %v1298_v47  ;;  %v1331_v38 = vld [vmem:[#allocation9 + $0x11c8] sm:$0xff] }
 0x402   :  { %3254 = vmatmul.mubr.f32.vlgmr.msra.gmra.mrb[8].mxu0 %v5818_v7  ;;  %v1531_v7 = vld [vmem:[#allocation9 + $0x1808] sm:$0xff]  ;;  %v1828_v30 = vld [vmem:[#allocation9 + $0x2150] sm:$0xff] }
 0x403   :  { %3608 = vmatmul.mubr.f32.vlgmr.msra.gmra.mrb[12].mxu1 %v5842_v49  ;;  %5183 = vmatpush1.bf16.msra.mxu0 %v5182_v48  ;;  %v5200_v48 = vpack.c.bf16 %v1244_v40, %v1233_v39  ;;  %v1850_v39 = vld [vmem:[#allocation9 + $0x2200] sm:$0xff]  ;;  %v5670_v40 = vmov 0.0|0.0  }
 0x404   :  { %3324 = vmatprep.mubr.f32.mxu0 %v5822_v16  ;;  %5407 = vmatpush3.bf16.msra.mxu1 %v5406_v53  ;;  %v5414_v16 = vpack.c.bf16 %v1531_v7, %v1520_v8  ;;  %v1586_v53 = vld [vmem:[#allocation9 + $0x19c0] sm:$0xff]  ;;  %v1288_v8 = vld [vmem:[#allocation9 + $0x1070] sm:$0xff]  ;;  %v1817_v7 = vld [vmem:[#allocation9 + $0x20f8] sm:$0xff] }
 0x405   :  { %3677 = vmatprep.mubr.f32.mxu1 %v5844_v46  ;;  %5185 = vmatprep.subr.bf16.mxu0 %v5184_v57  ;;  %v1266_v57 = vld [vmem:[#allocation9 + $0xfc0] sm:$0xff]  ;;  %v5208_v14 = vpack.c.bf16 %v1288_v8, %v1277_v6 }
 0x406   :  { %5409 = vmatprep.subr.bf16.mxu1 %v5408_v59  ;;  %v5426_v59 = vpack.c.bf16 %v1597_v18, %v1586_v53  ;;  %v5204_v62 = vpack.c.bf16 %v1266_v57, %v1255_v56  ;;  %v1353_v53 = vld [vmem:[#allocation9 + $0x1278] sm:$0xff]  ;;  %v1883_v18 = vld [vmem:[#allocation9 + $0x2308] sm:$0xff]  ;;  %v1376_v57 = vld [vmem:[#allocation9 + $0x1330] sm:$0xff] }
 0x407   :  { %5187 = vmatpush1.bf16.msra.mxu0 %v5186_v1  ;;  %v1265_v1 = vld [vmem:[#allocation9 + $0xfb8] sm:$0xff] }
 0x408   :  { %5411 = vmatpush3.bf16.msra.mxu1 %v5410_v3  ;;  %5189 = vmatprep.subr.bf16.mxu0 %v5188_v4  ;;  %v1608_v3 = vld [vmem:[#allocation9 + $0x1a70] sm:$0xff]  ;;  %v5428_v4 = vpack.c.bf16 %v1795_v58, %v1784_v37  ;;  %v5206_v11 = vpack.c.bf16 %v1265_v1, %v1254_v55  ;;  %v1365_v56 = vld [vmem:[#allocation9 + $0x12d8] sm:$0xff]  ;;  %v5222_v37 = vpack.c.bf16 %v1353_v53, %v1342_v51  ;;  %v1894_v55 = vld [vmem:[#allocation9 + $0x2360] sm:$0xff] }
 0x409   :  { %5413 = vmatprep.subr.bf16.mxu1 %v5412_v9  ;;  %v1806_v9 = vld [vmem:[#allocation9 + $0x20a0] sm:$0xff]  ;;  %v5430_v13 = vpack.c.bf16 %v1619_v5, %v1608_v3  ;;  %v1905_v1 = vld [vmem:[#allocation9 + $0x23b8] sm:$0xff]  ;;  %v1387_v3 = vld [vmem:[#allocation9 + $0x1388] sm:$0xff] }
 0x40a   :  { %v5446_v6 = vpack.c.bf16 %v1905_v1, %v1894_v55  ;;  %v1519_v55 = vld [vmem:[#allocation9 + $0x17a8] sm:$0xff]  ;;  %v1530_v1 = vld [vmem:[#allocation9 + $0x1800] sm:$0xff] }
 0x40b   :  { %5191 = vmatpush1.bf16.msra.mxu0 %v5190_v17  ;;  %v1287_v17 = vld [vmem:[#allocation9 + $0x1068] sm:$0xff] }
 0x40c   :  { %5415 = vmatpush3.bf16.msra.mxu1 %v5414_v16  ;;  %5193 = vmatprep.subr.bf16.mxu0 %v5192_v19  ;;  %v1630_v16 = vld [vmem:[#allocation9 + $0x1b20] sm:$0xff]  ;;  %v5432_v19 = vpack.c.bf16 %v1817_v7, %v1806_v9  ;;  %v1397_v7 = vld [vmem:[#allocation9 + $0x13d8] sm:$0xff] }
 0x40d   :  { %5417 = vmatprep.subr.bf16.mxu1 %v5416_v24  ;;  %v5210_v24 = vpack.c.bf16 %v1287_v17, %v1276_v15  ;;  %v5434_v25 = vpack.c.bf16 %v1641_v21, %v1630_v16  ;;  %v1386_v9 = vld [vmem:[#allocation9 + $0x1380] sm:$0xff]  ;;  %v1420_v15 = vld [vmem:[#allocation9 + $0x1490] sm:$0xff] }
 0x40e   :  { %v5230_v17 = vpack.c.bf16 %v1397_v7, %v1386_v9  ;;  %v1408_v21 = vld [vmem:[#allocation9 + $0x1430] sm:$0xff] }
 0x40f   :  { %5195 = vmatpush1.bf16.msra.mxu0 %v5194_v31  ;;  %v1839_v31 = vld [vmem:[#allocation9 + $0x21a8] sm:$0xff]  ;;  %v5234_v47 = vpack.c.bf16 %v1419_v22, %v1408_v21  ;;  %v1596_v21 = vld [vmem:[#allocation9 + $0x1a10] sm:$0xff] }
 0x410   :  { %5419 = vmatpush3.bf16.msra.mxu1 %v5418_v32  ;;  %5197 = vmatprep.subr.bf16.mxu0 %v5196_v33  ;;  %v1321_v32 = vld [vmem:[#allocation9 + $0x1178] sm:$0xff]  ;;  %v1332_v33 = vld [vmem:[#allocation9 + $0x11d0] sm:$0xff]  ;;  %v5437_v35 = vpack.c.bf16 %v1839_v31, %v1828_v30  ;;  %v1430_v31 = vld [vmem:[#allocation9 + $0x14e0] sm:$0xff] }
 0x411   :  { %5421 = vmatprep.subr.bf16.mxu1 %v5420_v36  ;;  %v5216_v2 = vpack.c.bf16 %v1332_v33, %v1321_v32  ;;  %v1320_v36 = vld [vmem:[#allocation9 + $0x1170] sm:$0xff]  ;;  %v1441_v32 = vld [vmem:[#allocation9 + $0x1538] sm:$0xff] }
 0x412   :  { %v1960_v33 = vld [vmem:[#allocation9 + $0x2570] sm:$0xff] }
 0x413   :  { %5199 = vmatpush1.bf16.msra.mxu0 %v5198_v44  ;;  %v1354_v44 = vld [vmem:[#allocation9 + $0x1280] sm:$0xff] }
 0x414   :  { %5423 = vmatpush3.bf16.msra.mxu1 %v5422_v27  ;;  %5201 = vmatprep.subr.bf16.mxu0 %v5200_v48  ;;  %v5218_v27 = vpack.c.bf16 %v1331_v38, %v1320_v36  ;;  %v5440_v48 = vpack.c.bf16 %v1861_v41, %v1850_v39  ;;  %v5220_v50 = vpack.c.bf16 %v1354_v44, %v1343_v43  ;;  %v1452_v41 = vld [vmem:[#allocation9 + $0x1590] sm:$0xff]  ;;  %v1463_v43 = vld [vmem:[#allocation9 + $0x15e8] sm:$0xff]  ;;  %v1982_v44 = vld [vmem:[#allocation9 + $0x2620] sm:$0xff] }
 0x415   :  { %5425 = vmatprep.subr.bf16.mxu1 %v5424_v54  ;;  %v1872_v54 = vld [vmem:[#allocation9 + $0x22b0] sm:$0xff]  ;;  %v5238_v36 = vpack.c.bf16 %v1441_v32, %v1430_v31  ;;  %v5242_v51 = vpack.c.bf16 %v1463_v43, %v1452_v41  ;;  %v1606_v31 = vld [vmem:[#allocation9 + $0x1a60] sm:$0xff]  ;;  %v1617_v32 = vld [vmem:[#allocation9 + $0x1ab8] sm:$0xff] }
 0x416   :  { %v5443_v58 = vpack.c.bf16 %v1883_v18, %v1872_v54  ;;  %v1474_v18 = vld [vmem:[#allocation9 + $0x1640] sm:$0xff] }
 0x417   :  { %5203 = vmatpush1.bf16.msra.mxu0 %v5202_v52  ;;  %v5224_v52 = vpack.c.bf16 %v1376_v57, %v1365_v56  ;;  %v1485_v56 = vld [vmem:[#allocation9 + $0x1698] sm:$0xff]  ;;  %v1662_v41 = vld [vmem:[#allocation9 + $0x1c20] sm:$0xff] }
 0x418   :  { %5427 = vmatpush3.bf16.msra.mxu1 %v5426_v59  ;;  %5205 = vmatprep.subr.bf16.mxu0 %v5204_v62  ;;  %v1364_v59 = vld [vmem:[#allocation9 + $0x12d0] sm:$0xff]  ;;  %v1375_v62 = vld [vmem:[#allocation9 + $0x1328] sm:$0xff]  ;;  %v1497_v57 = vld [vmem:[#allocation9 + $0x16f8] sm:$0xff] }
 0x419   :  { %5429 = vmatprep.subr.bf16.mxu1 %v5428_v4  ;;  %v1398_v4 = vld [vmem:[#allocation9 + $0x13e0] sm:$0xff]  ;;  %v5226_v5 = vpack.c.bf16 %v1375_v62, %v1364_v59  ;;  %v1496_v59 = vld [vmem:[#allocation9 + $0x16f0] sm:$0xff]  ;;  %v1507_v62 = vld [vmem:[#allocation9 + $0x1748] sm:$0xff] }
 0x41a   :  { %v5228_v8 = vpack.c.bf16 %v1398_v4, %v1387_v3  ;;  %v5250_v3 = vpack.c.bf16 %v1507_v62, %v1496_v59  ;;  %v1518_v4 = vld [vmem:[#allocation9 + $0x17a0] sm:$0xff]  ;;  %v1705_v62 = vld [vmem:[#allocation9 + $0x1d78] sm:$0xff] }
 0x41b   :  { %5207 = vmatpush1.bf16.msra.mxu0 %v5206_v11  ;;  %v1916_v11 = vld [vmem:[#allocation9 + $0x2410] sm:$0xff]  ;;  %v1694_v59 = vld [vmem:[#allocation9 + $0x1d20] sm:$0xff] }
 0x41c   :  { %5431 = vmatpush3.bf16.msra.mxu1 %v5430_v13  ;;  %5209 = vmatprep.subr.bf16.mxu0 %v5208_v14  ;;  %v1927_v13 = vld [vmem:[#allocation9 + $0x2468] sm:$0xff]  ;;  %v1409_v14 = vld [vmem:[#allocation9 + $0x1438] sm:$0xff] }
 0x41d   :  { %5433 = vmatprep.subr.bf16.mxu1 %v5432_v19  ;;  %v5449_v16 = vpack.c.bf16 %v1927_v13, %v1916_v11  ;;  %v5232_v19 = vpack.c.bf16 %v1420_v15, %v1409_v14  ;;  %v1540_v11 = vld [vmem:[#allocation9 + $0x1850] sm:$0xff]  ;;  %v1551_v13 = vld [vmem:[#allocation9 + $0x18a8] sm:$0xff] }
 0x41e   :  { %v1563_v14 = vld [vmem:[#allocation9 + $0x1908] sm:$0xff]  ;;  %v5258_v15 = vpack.c.bf16 %v1551_v13, %v1540_v11  ;;  %v1738_v11 = vld [vmem:[#allocation9 + $0x1e80] sm:$0xff]  ;;  %v1749_v13 = vld [vmem:[#allocation9 + $0x1ed8] sm:$0xff] }
 0x41f   :  { %5211 = vmatpush1.bf16.msra.mxu0 %v5210_v24  ;;  %v1949_v24 = vld [vmem:[#allocation9 + $0x2518] sm:$0xff] }
 0x420   :  { %5435 = vmatpush3.bf16.msra.mxu1 %v5434_v25  ;;  %5213 = vmatprep.subr.bf16.mxu0 %v5212_v28  ;;  %v1431_v25 = vld [vmem:[#allocation9 + $0x14e8] sm:$0xff]  ;;  %v1442_v28 = vld [vmem:[#allocation9 + $0x1540] sm:$0xff]  ;;  %v5452_v29 = vpack.c.bf16 %v1949_v24, %v1938_v23  ;;  %v1584_v24 = vld [vmem:[#allocation9 + $0x19b0] sm:$0xff] }
 0x421   :  { %5436 = vmatprep.subr.bf16.mxu1 %v5670_v40  ;;  %v5236_v30 = vpack.c.bf16 %v1442_v28, %v1431_v25  ;;  %v1595_v25 = vld [vmem:[#allocation9 + $0x1a08] sm:$0xff] }
 0x422   :  { %v1607_v28 = vld [vmem:[#allocation9 + $0x1a68] sm:$0xff] }
 0x423   :  { %3678 = vmatmul.mubr.f32.vlgmr.msra.gmra.mrb[14].mxu1 %v5857_v42  ;;  %5215 = vmatpush1.bf16.msra.mxu0 %v5214_v34  ;;  %v1971_v34 = vld [vmem:[#allocation9 + $0x25c8] sm:$0xff] }
 0x424   :  { %5438 = vmatpush3.bf16.msra.mxu1 %v5437_v35  ;;  %5217 = vmatprep.subr.bf16.mxu0 %v5216_v2  ;;  %v1453_v35 = vld [vmem:[#allocation9 + $0x1598] sm:$0xff]  ;;  %v1464_v2 = vld [vmem:[#allocation9 + $0x15f0] sm:$0xff]  ;;  %v5455_v38 = vpack.c.bf16 %v1971_v34, %v1960_v33 }
 0x425   :  { %5439 = vmatprep.subr.bf16.mxu1 %v5670_v40  ;;  %3961 = vmatprep.mubr.msk.f32.mxu1 %vm5671_vm0, %v5669_v0  ;;  %v5240_v39 = vpack.c.bf16 %v1464_v2, %v1453_v35  ;;  %v1629_v33 = vld [vmem:[#allocation9 + $0x1b18] sm:$0xff]  ;;  %v1640_v34 = vld [vmem:[#allocation9 + $0x1b70] sm:$0xff]  ;;  %v5270_v35 = vpack.c.bf16 %v1617_v32, %v1606_v31  ;;  %v1815_v32 = vld [vmem:[#allocation9 + $0x20e8] sm:$0xff] }
 0x426   :  { %v5272_v2 = vpack.c.bf16 %v1640_v34, %v1629_v33  ;;  %v1804_v31 = vld [vmem:[#allocation9 + $0x2090] sm:$0xff]  ;;  %v1827_v33 = vld [vmem:[#allocation9 + $0x2148] sm:$0xff]  ;;  %v1838_v34 = vld [vmem:[#allocation9 + $0x21a0] sm:$0xff] }
 0x427   :  { %5219 = vmatpush1.bf16.msra.mxu0 %v5218_v27  ;;  %v1993_v27 = vld [vmem:[#allocation9 + $0x2678] sm:$0xff] }
 0x428   :  { %5441 = vmatpush3.bf16.msra.mxu1 %v5440_v48  ;;  %5221 = vmatprep.subr.bf16.mxu0 %v5220_v50  ;;  %v1475_v48 = vld [vmem:[#allocation9 + $0x1648] sm:$0xff]  ;;  %v1486_v50 = vld [vmem:[#allocation9 + $0x16a0] sm:$0xff]  ;;  %v5458_v53 = vpack.c.bf16 %v1993_v27, %v1982_v44 }
 0x429   :  { %5442 = vmatprep.subr.bf16.mxu1 %v5670_v40  ;;  %v5244_v54 = vpack.c.bf16 %v1486_v50, %v1475_v48  ;;  %v1650_v27 = vld [vmem:[#allocation9 + $0x1bc0] sm:$0xff]  ;;  %v1661_v48 = vld [vmem:[#allocation9 + $0x1c18] sm:$0xff] }
 0x42a   :  { %v1673_v50 = vld [vmem:[#allocation9 + $0x1c78] sm:$0xff] }
 0x42b   :  { %5223 = vmatpush1.bf16.msra.mxu0 %v5222_v37  ;;  %v1508_v37 = vld [vmem:[#allocation9 + $0x1750] sm:$0xff] }
 0x42c   :  { %5444 = vmatpush3.bf16.msra.mxu1 %v5443_v58  ;;  %5225 = vmatprep.subr.bf16.mxu0 %v5224_v52  ;;  %v5246_v58 = vpack.c.bf16 %v1485_v56, %v1474_v18  ;;  %v5248_v52 = vpack.c.bf16 %v1508_v37, %v1497_v57  ;;  %v1672_v18 = vld [vmem:[#allocation9 + $0x1c70] sm:$0xff]  ;;  %v1683_v56 = vld [vmem:[#allocation9 + $0x1cc8] sm:$0xff]  ;;  %v1706_v37 = vld [vmem:[#allocation9 + $0x1d80] sm:$0xff] }
 0x42d   :  { %5445 = vmatprep.subr.bf16.mxu1 %v5670_v40  ;;  %v1695_v57 = vld [vmem:[#allocation9 + $0x1d28] sm:$0xff] }
 0x42f   :  { %5227 = vmatpush1.bf16.msra.mxu0 %v5226_v5  ;;  %v1529_v5 = vld [vmem:[#allocation9 + $0x17f8] sm:$0xff] }
 0x430   :  { %5447 = vmatpush3.bf16.msra.mxu1 %v5446_v6  ;;  %5229 = vmatprep.subr.bf16.mxu0 %v5228_v8  ;;  %v1541_v6 = vld [vmem:[#allocation9 + $0x1858] sm:$0xff]  ;;  %v1552_v8 = vld [vmem:[#allocation9 + $0x18b0] sm:$0xff]  ;;  %v5254_v9 = vpack.c.bf16 %v1529_v5, %v1518_v4  ;;  %v1727_v5 = vld [vmem:[#allocation9 + $0x1e28] sm:$0xff] }
 0x431   :  { %5448 = vmatprep.subr.bf16.mxu1 %v5670_v40  ;;  %v5256_v7 = vpack.c.bf16 %v1552_v8, %v1541_v6  ;;  %v1716_v4 = vld [vmem:[#allocation9 + $0x1dd0] sm:$0xff]  ;;  %v1739_v6 = vld [vmem:[#allocation9 + $0x1e88] sm:$0xff]  ;;  %v1750_v8 = vld [vmem:[#allocation9 + $0x1ee0] sm:$0xff] }
 0x433   :  { %5231 = vmatpush1.bf16.msra.mxu0 %v5230_v17 }
 0x434   :  { %5450 = vmatpush3.bf16.msra.mxu1 %v5449_v16  ;;  %5233 = vmatprep.subr.bf16.mxu0 %v5232_v19  ;;  %v1562_v16 = vld [vmem:[#allocation9 + $0x1900] sm:$0xff]  ;;  %v1585_v19 = vld [vmem:[#allocation9 + $0x19b8] sm:$0xff] }
 0x435   :  { %5451 = vmatprep.subr.bf16.mxu1 %v5670_v40  ;;  %v5264_v23 = vpack.c.bf16 %v1596_v21, %v1585_v19  ;;  %v1783_v19 = vld [vmem:[#allocation9 + $0x1fe8] sm:$0xff]  ;;  %v1794_v21 = vld [vmem:[#allocation9 + $0x2040] sm:$0xff] }
 0x437   :  { %5235 = vmatpush1.bf16.msra.mxu0 %v5234_v47  ;;  %v1618_v47 = vld [vmem:[#allocation9 + $0x1ac0] sm:$0xff] }
 0x438   :  { %5453 = vmatpush3.bf16.msra.mxu1 %v5452_v29  ;;  %5237 = vmatprep.subr.bf16.mxu0 %v5236_v30  ;;  %v5266_v29 = vpack.c.bf16 %v1595_v25, %v1584_v24  ;;  %v5268_v30 = vpack.c.bf16 %v1618_v47, %v1607_v28  ;;  %v1782_v24 = vld [vmem:[#allocation9 + $0x1fe0] sm:$0xff]  ;;  %v1793_v25 = vld [vmem:[#allocation9 + $0x2038] sm:$0xff]  ;;  %v1816_v47 = vld [vmem:[#allocation9 + $0x20f0] sm:$0xff] }
 0x439   :  { %5454 = vmatprep.subr.bf16.mxu1 %v5670_v40  ;;  %v1805_v28 = vld [vmem:[#allocation9 + $0x2098] sm:$0xff] }
 0x43b   :  { %5239 = vmatpush1.bf16.msra.mxu0 %v5238_v36  ;;  %v1628_v36 = vld [vmem:[#allocation9 + $0x1b10] sm:$0xff] }
 0x43c   :  { %5456 = vmatpush3.bf16.msra.mxu1 %v5455_v38  ;;  %5241 = vmatprep.subr.bf16.mxu0 %v5240_v39  ;;  %v1639_v38 = vld [vmem:[#allocation9 + $0x1b68] sm:$0xff] }
 0x43d   :  { %5457 = vmatprep.subr.bf16.mxu1 %v5670_v40  ;;  %v5252_v40 = vpack.c.bf16 %v1530_v1, %v1519_v55  ;;  %v1651_v39 = vld [vmem:[#allocation9 + $0x1bc8] sm:$0xff]  ;;  %v5274_v43 = vpack.c.bf16 %v1639_v38, %v1628_v36  ;;  %v1717_v55 = vld [vmem:[#allocation9 + $0x1dd8] sm:$0xff]  ;;  %v1728_v1 = vld [vmem:[#allocation9 + $0x1e30] sm:$0xff] }
 0x43e   :  { %v5276_v44 = vpack.c.bf16 %v1662_v41, %v1651_v39  ;;  %v1826_v36 = vld [vmem:[#allocation9 + $0x2140] sm:$0xff]  ;;  %v1837_v38 = vld [vmem:[#allocation9 + $0x2198] sm:$0xff]  ;;  %v1860_v41 = vld [vmem:[#allocation9 + $0x2250] sm:$0xff] }
 0x43f   :  { %5243 = vmatpush1.bf16.msra.mxu0 %v5242_v51  ;;  %v1684_v51 = vld [vmem:[#allocation9 + $0x1cd0] sm:$0xff]  ;;  %v1849_v39 = vld [vmem:[#allocation9 + $0x21f8] sm:$0xff] }
 0x440   :  { %5459 = vmatpush3.bf16.msra.mxu1 %v5458_v53  ;;  %5245 = vmatprep.subr.bf16.mxu0 %v5244_v54  ;;  %v5278_v53 = vpack.c.bf16 %v1661_v48, %v1650_v27  ;;  %v5280_v54 = vpack.c.bf16 %v1684_v51, %v1673_v50  ;;  %v1848_v27 = vld [vmem:[#allocation9 + $0x21f0] sm:$0xff]  ;;  %v1859_v48 = vld [vmem:[#allocation9 + $0x2248] sm:$0xff]  ;;  %v1882_v51 = vld [vmem:[#allocation9 + $0x2300] sm:$0xff] }
 0x441   :  { %v1871_v50 = vld [vmem:[#allocation9 + $0x22a8] sm:$0xff] }
 0x442   :  { %3325 = vmatmul.mubr.f32.vlgmr.msra.gmra.mrb[8].mxu0 %v5842_v49  ;;  %v1574_v49 = vld [vmem:[#allocation9 + $0x1960] sm:$0xff] }
 0x443   :  { %3962 = vmatmul.mubr.f32.vlgmr.msra.gmra.mrb[16].mxu1 %v5868_v45  ;;  %5247 = vmatpush1.bf16.msra.mxu0 %v5246_v58  ;;  %v5260_v17 = vpack.c.bf16 %v1574_v49, %v1563_v14  ;;  %v5282_v58 = vpack.c.bf16 %v1683_v56, %v1672_v18  ;;  %v1761_v14 = vld [vmem:[#allocation9 + $0x1f38] sm:$0xff]  ;;  %v1772_v49 = vld [vmem:[#allocation9 + $0x1f90] sm:$0xff]  ;;  %v1870_v18 = vld [vmem:[#allocation9 + $0x22a0] sm:$0xff] }
 0x444   :  { %3395 = vmatprep.mubr.f32.mxu0 %v5844_v46  ;;  %5249 = vmatprep.subr.bf16.mxu0 %v5248_v52  ;;  %v1573_v46 = vld [vmem:[#allocation9 + $0x1958] sm:$0xff]  ;;  %v5284_v52 = vpack.c.bf16 %v1706_v37, %v1695_v57  ;;  %v1904_v37 = vld [vmem:[#allocation9 + $0x23b0] sm:$0xff] }
 0x445   :  { %v5262_v22 = vpack.c.bf16 %v1573_v46, %v1562_v16  ;;  %v1760_v16 = vld [vmem:[#allocation9 + $0x1f30] sm:$0xff]  ;;  %v1771_v46 = vld [vmem:[#allocation9 + $0x1f88] sm:$0xff]  ;;  %v1881_v56 = vld [vmem:[#allocation9 + $0x22f8] sm:$0xff] }
 0x446   :  { %v1893_v57 = vld [vmem:[#allocation9 + $0x2358] sm:$0xff] }
 0x447   :  { %5251 = vmatpush1.bf16.msra.mxu0 %v5250_v3  ;;  %v5286_v3 = vpack.c.bf16 %v1705_v62, %v1694_v59  ;;  %v1892_v59 = vld [vmem:[#allocation9 + $0x2350] sm:$0xff]  ;;  %v1903_v62 = vld [vmem:[#allocation9 + $0x23a8] sm:$0xff] }
 0x448   :  { %5253 = vmatprep.subr.bf16.mxu0 %v5252_v40  ;;  %v5288_v40 = vpack.c.bf16 %v1728_v1, %v1717_v55  ;;  %v1915_v55 = vld [vmem:[#allocation9 + $0x2408] sm:$0xff]  ;;  %v1926_v1 = vld [vmem:[#allocation9 + $0x2460] sm:$0xff] }
 0x44b   :  { %5255 = vmatpush1.bf16.msra.mxu0 %v5254_v9  ;;  %v5290_v9 = vpack.c.bf16 %v1727_v5, %v1716_v4  ;;  %v1937_v4 = vld [vmem:[#allocation9 + $0x24b8] sm:$0xff]  ;;  %v1948_v5 = vld [vmem:[#allocation9 + $0x2510] sm:$0xff] }
 0x44c   :  { %5257 = vmatprep.subr.bf16.mxu0 %v5256_v7  ;;  %v5292_v7 = vpack.c.bf16 %v1750_v8, %v1739_v6  ;;  %v2028_v8 = vsub.s32 7, %v5788_v60 }
 0x44f   :  { %5259 = vmatpush1.bf16.msra.mxu0 %v5258_v15  ;;  %v5294_v15 = vpack.c.bf16 %v1749_v13, %v1738_v11  ;;  %v1947_v11 = vld [vmem:[#allocation9 + $0x2508] sm:$0xff] }
 0x450   :  { %5261 = vmatprep.subr.bf16.mxu0 %v5260_v17  ;;  %v5296_v17 = vpack.c.bf16 %v1772_v49, %v1761_v14  ;;  %v1959_v13 = vld [vmem:[#allocation9 + $0x2568] sm:$0xff]  ;;  %v1970_v14 = vld [vmem:[#allocation9 + $0x25c0] sm:$0xff] }
 0x451   :  { %v5516_v49 = vld [vmem:[#allocation10] sm:$0xff] }
 0x453   :  { %5263 = vmatpush1.bf16.msra.mxu0 %v5262_v22  ;;  %v5298_v22 = vpack.c.bf16 %v1771_v46, %v1760_v16  ;;  %v2021_v16 = vrot.slane %v5516_v49, %v466_v26 }
 0x454   :  { %5265 = vmatprep.subr.bf16.mxu0 %v5264_v23  ;;  %v5300_v23 = vpack.c.bf16 %v1794_v21, %v1783_v19  ;;  %v2029_v19 = vrot.slane %v5516_v49, %v2028_v8  ;;  %v5332_v21 = vpack.c.bf16 %v1970_v14, %v1959_v13 }
 0x457   :  { %5267 = vmatpush1.bf16.msra.mxu0 %v5266_v29  ;;  %v5302_v29 = vpack.c.bf16 %v1793_v25, %v1782_v24  ;;  %v1981_v25 = vld [vmem:[#allocation9 + $0x2618] sm:$0xff] }
 0x458   :  { %5269 = vmatprep.subr.bf16.mxu0 %v5268_v30  ;;  %v5304_v30 = vpack.c.bf16 %v1816_v47, %v1805_v28  ;;  %v1992_v28 = vld [vmem:[#allocation9 + $0x2670] sm:$0xff] }
 0x459   :  { %v5336_v26 = vpack.c.bf16 %v1992_v28, %v1981_v25 }
 0x45b   :  { %5271 = vmatpush1.bf16.msra.mxu0 %v5270_v35  ;;  %v5306_v35 = vpack.c.bf16 %v1815_v32, %v1804_v31 }
 0x45c   :  { %5273 = vmatprep.subr.bf16.mxu0 %v5272_v2  ;;  %v5308_v2 = vpack.c.bf16 %v1838_v34, %v1827_v33  ;;  %v1980_v33 = vld [vmem:[#allocation9 + $0x2610] sm:$0xff]  ;;  %v1991_v34 = vld [vmem:[#allocation9 + $0x2668] sm:$0xff] }
 0x45f   :  { %5275 = vmatpush1.bf16.msra.mxu0 %v5274_v43  ;;  %v5310_v43 = vpack.c.bf16 %v1837_v38, %v1826_v36 }
 0x460   :  { %5277 = vmatprep.subr.bf16.mxu0 %v5276_v44  ;;  %v5312_v44 = vpack.c.bf16 %v1860_v41, %v1849_v39  ;;  %v1995_v39 = vld [vmem:[#allocation10 + $0x8] sm:$0x7] }
 0x461   :  { %v2041_v41 = vrot.slane %v1995_v39, %v5831_v20  ;;  %v2037_v20 = vrot.slane %v1995_v39, %v5791_v61 }
 0x463   :  { %5279 = vmatpush1.bf16.msra.mxu0 %v5278_v53  ;;  %v5314_v53 = vpack.c.bf16 %v1859_v48, %v1848_v27 }
 0x464   :  { %5281 = vmatprep.subr.bf16.mxu0 %v5280_v54  ;;  %v5316_v54 = vpack.c.bf16 %v1882_v51, %v1871_v50 }
 0x467   :  { %5283 = vmatpush1.bf16.msra.mxu0 %v5282_v58  ;;  %v5318_v58 = vpack.c.bf16 %v1881_v56, %v1870_v18 }
 0x468   :  { %5285 = vmatprep.subr.bf16.mxu0 %v5284_v52  ;;  %v5320_v52 = vpack.c.bf16 %v1904_v37, %v1893_v57 }
 0x46b   :  { %5287 = vmatpush1.bf16.msra.mxu0 %v5286_v3  ;;  %v5324_v3 = vpack.c.bf16 %v1926_v1, %v1915_v55 }
 0x46c   :  { %5289 = vmatprep.subr.bf16.mxu0 %v5288_v40  ;;  %v1914_v40 = vld [vmem:[#allocation9 + $0x2400] sm:$0xff] }
 0x46f   :  { %5291 = vmatpush1.bf16.msra.mxu0 %v5290_v9  ;;  %v5328_v9 = vpack.c.bf16 %v1948_v5, %v1937_v4 }
 0x470   :  { %5293 = vmatprep.subr.bf16.mxu0 %v5292_v7  ;;  %v1936_v7 = vld [vmem:[#allocation9 + $0x24b0] sm:$0xff] }
 0x471   :  { %v5330_v46 = vpack.c.bf16 %v1947_v11, %v1936_v7 }
 0x473   :  { %5295 = vmatpush1.bf16.msra.mxu0 %v5294_v15  ;;  %v2017_v15 = vrot.slane %v5516_v49, %v462_v10 }
 0x474   :  { %5297 = vmatprep.subr.bf16.mxu0 %v5296_v17  ;;  %v2025_v17 = vrot.slane %v5516_v49, %v470_v12 }
 0x477   :  { %5299 = vmatpush1.bf16.msra.mxu0 %v5298_v22  ;;  %v1958_v22 = vld [vmem:[#allocation9 + $0x2560] sm:$0xff] }
 0x478   :  { %5301 = vmatprep.subr.bf16.mxu0 %v5300_v23  ;;  %v1969_v23 = vld [vmem:[#allocation9 + $0x25b8] sm:$0xff] }
 0x479   :  { %v5334_v12 = vpack.c.bf16 %v1969_v23, %v1958_v22 }
 0x47b   :  { %5303 = vmatpush1.bf16.msra.mxu0 %v5302_v29 }
 0x47c   :  { %5305 = vmatprep.subr.bf16.mxu0 %v5304_v30 }
 0x47f   :  { %5307 = vmatpush1.bf16.msra.mxu0 %v5306_v35  ;;  %v5338_v35 = vpack.c.bf16 %v1991_v34, %v1980_v33 }
 0x480   :  { %5309 = vmatprep.subr.bf16.mxu0 %v5308_v2 }
 0x482   :  { %3396 = vmatmul.mubr.f32.vlgmr.msra.gmra.mrb[8].mxu0 %v5857_v42  ;;  %v5322_v42 = vpack.c.bf16 %v1903_v62, %v1892_v59 }
 0x483   :  { %5311 = vmatpush1.bf16.msra.mxu0 %v5310_v43  ;;  %3466 = vmatprep.mubr.f32.mxu0 %v5669_v0  ;;  %v1925_v0 = vld [vmem:[#allocation9 + $0x2458] sm:$0xff] }
 0x484   :  { %5313 = vmatprep.subr.bf16.mxu0 %v5312_v44  ;;  %v5326_v6 = vpack.c.bf16 %v1925_v0, %v1914_v40 }
 0x487   :  { %5315 = vmatpush1.bf16.msra.mxu0 %v5314_v53 }
 0x488   :  { %5317 = vmatprep.subr.bf16.mxu0 %v5316_v54 }
 0x48b   :  { %5319 = vmatpush1.bf16.msra.mxu0 %v5318_v58 }
 0x48c   :  { %5321 = vmatprep.subr.bf16.mxu0 %v5320_v52 }
 0x48f   :  { %5323 = vmatpush1.bf16.msra.mxu0 %v5322_v42 }
 0x490   :  { %5325 = vmatprep.subr.bf16.mxu0 %v5324_v3 }
 0x493   :  { %5327 = vmatpush1.bf16.msra.mxu0 %v5326_v6 }
 0x494   :  { %5329 = vmatprep.subr.bf16.mxu0 %v5328_v9 }
 0x495   :  { %v2900_v24 = vpop.f32.mrb[6].mxu0 }
 0x496   :  { %v5464_v47 = vadd.f32 %v2900_v24, %v2017_v15  ;;  %v3184_v29 = vpop.f32.mrb[8].mxu1  ;;  %v2902_v30 = vpop.f32.mrb[7].mxu0 }
 0x497   :  { %v5466_v10 = vadd.f32 %v3184_v29, %v2025_v17  ;;  %v5465_v31 = vadd.f32 %v2902_v30, %v2021_v16  ;;  %v3186_v32 = vpop.f32.mrb[9].mxu1  ;;  %5331 = vmatpush1.bf16.msra.mxu0 %v5330_v46 }
 0x498   :  { %3757 = vst [vmem:[%s5967_s7 + $0x20] sm:$0xff] %v5464_v47  ;;  %v5467_v60 = vadd.f32 %v3186_v32, %v2029_v19  ;;  %5333 = vmatprep.subr.bf16.mxu0 %v5332_v21 }
 0x499   :  { %3759 = vst [vmem:[%s5967_s7 + $0x30] sm:$0xff] %v5466_v10  ;;  %3758 = vst [vmem:[%s5967_s7 + $0x28] sm:$0xff] %v5465_v31 }
 0x49a   :  { %3760 = vst [vmem:[%s5967_s7 + $0x38] sm:$0xff] %v5467_v60 }
 0x49b   :  { %5335 = vmatpush1.bf16.msra.mxu0 %v5334_v12 }
 0x49c   :  { %5337 = vmatprep.subr.bf16.mxu0 %v5336_v26 }
 0x49f   :  { %5339 = vmatpush1.bf16.msra.mxu0 %v5338_v35 }
 0x4a2   :  { %3467 = vmatmul.mubr.f32.vlgmr.msra.gmra.mrb[8].mxu0 %v5868_v45  ;;  %v2033_v45 = vrot.slane %v1995_v39, %v5794_v63 }
 0x4b6   :  { %v3839_v2 = vpop.f32.mrb[10].mxu1 }
 0x4b7   :  { %v3840_v36 = vpop.f32.mrb[11].mxu1 }
 0x4b8   :  { %v3841_v38 = vadd.f32 %v3840_v36, %v3839_v2 }
 0x4ba   :  { %v3540_v27 = vadd.f32 %v3841_v38, %v2041_v41 }
 0x4d6   :  { %v3874_v43 = vpop.f32.mrb[12].mxu1 }
 0x4d7   :  { %v3875_v44 = vpop.f32.mrb[13].mxu1 }
 0x4d8   :  { %v3876_v48 = vadd.f32 %v3875_v44, %v3874_v43 }
 0x4da   :  { %v3610_v50 = vadd.f32 %v3876_v48, %v3540_v27 }
 0x4f6   :  { %v3909_v51 = vpop.f32.mrb[14].mxu1 }
 0x4f7   :  { %v3910_v53 = vpop.f32.mrb[15].mxu1 }
 0x4f8   :  { %v3911_v54 = vadd.f32 %v3910_v53, %v3909_v51 }
 0x4fa   :  { %v3680_v18 = vadd.f32 %v3911_v54, %v3610_v50 }
 0x516   :  { %v3749_v56 = vpop.f32.mrb[16].mxu1 }
 0x517   :  { %v3750_v57 = vadd.f32 %v3749_v56, %v3680_v18  ;;  %v3963_v37 = vpop.f32.mrb[17].mxu1 }
 0x519   :  { %3763 = vst [vmem:[%s5967_s7 + $0x50] sm:$0xff] %v3750_v57 }
 0x575   :  { %v3468_v58 = vpop.f32.mrb[8].mxu0 }
 0x576   :  { %v5468_v52 = vadd.f32 %v3468_v58, %v2033_v45  ;;  %v3470_v59 = vpop.f32.mrb[9].mxu0 }
 0x577   :  { %v5469_v62 = vadd.f32 %v3470_v59, %v2037_v20 }
 0x578   :  { %3761 = vst [vmem:[%s5967_s7 + $0x40] sm:$0xff] %v5468_v52 }
 0x579   :  { %3762 = vst [vmem:[%s5967_s7 + $0x48] sm:$0xff] %v5469_v62 }
 0x57a   :  { %3768 = vsyncpa [#allocation3], 1 }
 0x57b   :  { %3769 = vsyncpa [#allocation5], 1 }
 0x57c   :  { %3770 = vsyncpa [#allocation8], 1 }
 0x57d   :  { %3771 = vsyncpa [#allocation11], 1 }

</bundles_post_ra>
